<compile_context>
chip_gen: v5e
topology: v5e:2x2
jax: 0.10.0
libtpu: 0.0.40
codegen_flags: <defaults>
</compile_context>

<pallas_src>
import functools
import math

import jax
import jax.numpy as jnp
from jax.experimental import pallas as pl
from jax.experimental.pallas import tpu as pltpu


# ----------------------------------------------------------------------------
# Pallas kernel: full forward for one batch block (whole recurrence in vregs)
# ----------------------------------------------------------------------------
def discrete_gru_bayes_kernel(
    # inputs
    cov_ref, x_ref, m_ref,
    wc1_ref, bc1_ref, wc2_ref, bc2_ref,            # covariates_map
    wp1_ref, bp1_ref, wp2_ref, bp2_ref,            # p_model (tight 2*D output)
    wgnz_ref, wgnh_ref, bgn_ref,                   # fused gru_next row blocks
    wprep_ref, bprep_ref,                          # GRUBayes prep (block-diag)
    wgdp_ref, wgdm_ref, wgdh_ref, bgd_ref,         # fused gru_d row blocks
    # outputs
    pre_ref, post_ref,
    *, hidden_size, input_size, prep_hidden_size,
    num_observed, num_steps, impute, compute_dtype):
    H, D, P = hidden_size, input_size, prep_hidden_size
    f32 = jnp.float32
    cdt = compute_dtype

    def dot(a, w_ref):
        # low-precision operands, f32 accumulation on the MXU
        return jnp.dot(a.astype(cdt), w_ref[...], preferred_element_type=f32)

    def gru_update(g, h):
        # gate columns packed tight: [r | z | gi_n | gh_n], pitch = H
        r = jax.nn.sigmoid(g[:, 0:H])
        u = jax.nn.sigmoid(g[:, H:2 * H])
        n = jnp.tanh(g[:, 2 * H:3 * H] + r * g[:, 3 * H:4 * H])
        return (1.0 - u) * n + u * h

    def p_hidden(h):
        # TODO(synk): torch.nn.Dropout treated as identity (eval mode); no RNG dropout.
        return jnp.tanh(dot(h, wp1_ref) + bp1_ref[...])

    def p_to_pred(z, xt, mt):
        p = dot(z, wp2_ref) + bp2_ref[...]          # [B, 2D] = [mean | logstd]
        mean = p[:, 0:D]
        logstd = p[:, D:2 * D]
        delta = mt * (xt - mean)                    # missing obs -> delta == 0
        dnorm = delta * jnp.exp(-logstd)            # delta / sigma without a divide
        return jnp.concatenate([mean, logstd, delta, dnorm], axis=1)   # [B, 4D]

    # initial state: h = covariates_map(cov), z = p_model hidden(h)
    c = jax.nn.relu(dot(cov_ref[...], wc1_ref) + bc1_ref[...])
    h = jnp.tanh(dot(c, wc2_ref) + bc2_ref[...])
    z = p_hidden(h)

    def pre_step(t, h, z):
        xt = x_ref[t]                               # [B, D] (NaN-cleaned)
        mt = m_ref[t]                               # [B, D] observation mask
        g = dot(h, wgnh_ref) + bgn_ref[...]         # partial dots, no lane concat
        if impute:
            g = g + dot(z, wgnz_ref)                # wp2/bp2 folded into wgnz/bgn
        h = gru_update(g, h)
        z = p_hidden(h)
        pre_row = p_to_pred(z, xt, mt)
        pre_ref[t] = pre_row
        return h, z, xt, mt, pre_row

    # ---- observed steps: pre prediction + GRUBayes jump update --------------
    for t in range(num_observed):
        h, z, xt, mt, pre_row = pre_step(t, h, z)
        # single stacked block-diagonal matmul (p-major prep columns: col = k*D+d)
        prep = jax.nn.relu(dot(pre_row, wprep_ref) + bprep_ref[...])
        prep = prep * jnp.concatenate([mt] * P, axis=1)        # mask replicate
        g = (dot(prep, wgdp_ref) + dot(mt, wgdm_ref) + dot(h, wgdh_ref)
             + bgd_ref[...])
        h = gru_update(g, h)
        z = p_hidden(h)
        post_ref[t] = p_to_pred(z, xt, mt)

    # ---- trailing steps: pre prediction only ---------------------------------
    for t in range(num_observed, num_steps):
        h, z, _, _, _ = pre_step(t, h, z)


# ----------------------------------------------------------------------------
# Wrapper: weight stacking / folding (glue in plain JAX) + pallas_call
# ----------------------------------------------------------------------------
def _round_up(x, m):
    return ((x + m - 1) // m) * m


def discrete_gru_bayes_forward(params, X, num_observed, cov, *, impute=True,
                               compute_dtype=jnp.bfloat16, batch_block=None):
    f32 = jnp.float32
    cdt = compute_dtype
    T, B, D = X.shape
    H = params["whh_n"].shape[1]
    P = params["w_prep"].shape[2]
    C = cov.shape[1]
    Ph = params["wp1"].shape[0]

    NO = int(min(int(num_observed), T))
    BP = _round_up(B, 8)                      # sublane-pad batch

    # --- NaN handling done once outside the kernel ---------------------------
    nan = jnp.isnan(X)
    Xc = jnp.where(nan, 0.0, X).astype(f32)
    M = jnp.where(nan, 0.0, 1.0).astype(f32)
    covp = cov.astype(f32)
    if BP != B:
        Xc = jnp.pad(Xc, ((0, 0), (0, BP - B), (0, 0)))
        M = jnp.pad(M, ((0, 0), (0, BP - B), (0, 0)))
        covp = jnp.pad(covp, ((0, BP - B), (0, 0)))

    # --- plain linears --------------------------------------------------------
    wc1_t = params["wc1"].T.astype(f32); bc1 = params["bc1"].reshape(1, -1).astype(f32)
    wc2_t = params["wc2"].T.astype(f32); bc2 = params["bc2"].reshape(1, -1).astype(f32)
    wp1_t = params["wp1"].T.astype(f32); bp1 = params["bp1"].reshape(1, -1).astype(f32)
    wp2_t = params["wp2"].T.astype(f32)                 # [Ph, 2D] = [mean | logstd]
    bp2 = params["bp2"].astype(f32)                     # [2D]

    # --- fused GRU weights: tight gate packing [r | z | gi_n | gh_n], pitch H
    def gate_cols_h(whh_t, b_ih, b_hh):
        Wh = jnp.zeros((H, 4 * H), f32)
        Wh = Wh.at[:, 0:2 * H].set(whh_t[:, 0:2 * H])          # r, z hidden parts
        Wh = Wh.at[:, 3 * H:4 * H].set(whh_t[:, 2 * H:3 * H])  # gh_n
        b = jnp.zeros((4 * H,), f32)
        b = b.at[0:2 * H].set(b_ih[0:2 * H] + b_hh[0:2 * H])
        b = b.at[2 * H:3 * H].set(b_ih[2 * H:3 * H])
        b = b.at[3 * H:4 * H].set(b_hh[2 * H:3 * H])
        return Wh, b.reshape(1, -1)

    def gate_cols_x(wih_t):
        # input row block: columns [r | z | gi_n | 0]
        W = jnp.zeros((wih_t.shape[0], 4 * H), f32)
        return W.at[:, 0:3 * H].set(wih_t)

    # gru_next: fold wp2/bp2 so the x-input is the p_model hidden z ([B, Ph])
    bih_n = params["bih_n"].astype(f32)
    bhh_n = params["bhh_n"].astype(f32)
    if impute:
        wihn_t = params["wih_n"].T.astype(f32)            # [2D, 3H]
        wgnz = gate_cols_x(wp2_t @ wihn_t)                # [Ph, 4H]
        bih_eff = bih_n + bp2 @ wihn_t
    else:
        wgnz = jnp.zeros((Ph, 4 * H), f32)                # unused: module zeroes p
        bih_eff = bih_n
    wgnh, bgn = gate_cols_h(params["whh_n"].T.astype(f32), bih_eff, bhh_n)

    # GRUBayes prep: stacked block-diagonal matmul, p-major columns (col = k*D+d)
    w_prep = params["w_prep"].astype(f32)                 # [D, 4, P]
    eye = jnp.eye(D, dtype=f32)
    w_blk = jnp.transpose(w_prep, (1, 0, 2))[:, :, :, None] * eye[None, :, None, :]
    wprep_stk = w_blk.reshape(4 * D, P * D)               # row = i*D+d, col = k*D+e
    bprep = params["bias_prep"].astype(f32).T.reshape(1, P * D)

    # gru_d: input row blocks [prep (p-major) | mask | h]
    wihd_t = params["wih_d"].T.astype(f32)                # [(P+1)*D, 3H], d-major rows
    perm = jnp.array([d * (P + 1) + k for k in range(P) for d in range(D)]
                     + [d * (P + 1) + P for d in range(D)], dtype=jnp.int32)
    wihd_x = wihd_t[perm]
    wgdp = gate_cols_x(wihd_x[:P * D])                    # prep rows
    wgdm = gate_cols_x(wihd_x[P * D:])                    # mask rows
    wgdh, bgd = gate_cols_h(params["whh_d"].T.astype(f32),
                            params["bih_d"].astype(f32),
                            params["bhh_d"].astype(f32))

    # --- cast weights to the compute dtype (biases / carry stay f32) ---------
    cast = lambda w: w.astype(cdt)
    wc1_c, wc2_c, wp1_c, wp2_c = map(cast, (wc1_t, wc2_t, wp1_t, wp2_t))
    wgnz_c, wgnh_c = cast(wgnz), cast(wgnh)
    wprep_c = cast(wprep_stk)
    wgdp_c, wgdm_c, wgdh_c = cast(wgdp), cast(wgdm), cast(wgdh)
    bp2_r = bp2.reshape(1, -1)

    # --- batch blocking (>=2 blocks lets v7x use both TensorCores) -----------
    if batch_block is not None:
        BB = int(batch_block)
    elif BP >= 16 and (BP // 2) % 8 == 0:
        BB = BP // 2
    else:
        BB = BP
    assert BP % BB == 0 and BB % 8 == 0
    NB = BP // BB

    inputs = [covp, Xc, M,
              wc1_c, bc1, wc2_c, bc2,
              wp1_c, bp1, wp2_c, bp2_r,
              wgnz_c, wgnh_c, bgn,
              wprep_c, bprep,
              wgdp_c, wgdm_c, wgdh_c, bgd]

    def const_spec(a):
        nd = a.ndim
        return pl.BlockSpec(a.shape, lambda b, _nd=nd: (0,) * _nd)

    in_specs = ([pl.BlockSpec((BB, C), lambda b: (b, 0)),
                 pl.BlockSpec((T, BB, D), lambda b: (0, b, 0)),
                 pl.BlockSpec((T, BB, D), lambda b: (0, b, 0))]
                + [const_spec(a) for a in inputs[3:]])

    out_specs = [pl.BlockSpec((T, BB, 4 * D), lambda b: (0, b, 0)),
                 pl.BlockSpec((NO, BB, 4 * D), lambda b: (0, b, 0))]
    out_shape = (jax.ShapeDtypeStruct((T, BP, 4 * D), f32),
                 jax.ShapeDtypeStruct((NO, BP, 4 * D), f32))

    kern = functools.partial(
        discrete_gru_bayes_kernel,
        hidden_size=int(H), input_size=int(D), prep_hidden_size=int(P),
        num_observed=NO, num_steps=int(T), impute=bool(impute),
        compute_dtype=cdt)

    pre_flat, post_flat = pl.pallas_call(
        kern,
        out_shape=out_shape,
        grid_spec=pltpu.PrefetchScalarGridSpec(
            num_scalar_prefetch=0,
            grid=(NB,),
            in_specs=in_specs,
            out_specs=out_specs),
        compiler_params=pltpu.CompilerParams(
            dimension_semantics=("parallel",)),   # batch blocks are independent
    )(*inputs)

    # [T, B, 4D] (component-major) -> [T, B, D, 4] to match the PyTorch layout.
    out_pre = jnp.swapaxes(pre_flat[:, :B].reshape(T, B, 4, D), -1, -2)
    out_post = jnp.swapaxes(post_flat[:, :B].reshape(NO, B, 4, D), -1, -2)
    return out_pre, out_post


# ----------------------------------------------------------------------------
# Pure-JAX reference (direct transcription of the PyTorch forward)
# ----------------------------------------------------------------------------
def reference_forward(params, X, num_observed, cov, *, impute=True):
    def linear(x, w, b):
        return x @ w.T + b

    def gru_cell(x, h, wih, whh, bih, bhh):
        H = h.shape[1]
        gi = x @ wih.T + bih
        gh = h @ whh.T + bhh
        r = jax.nn.sigmoid(gi[:, :H] + gh[:, :H])
        z = jax.nn.sigmoid(gi[:, H:2 * H] + gh[:, H:2 * H])
        n = jnp.tanh(gi[:, 2 * H:] + r * gh[:, 2 * H:])
        return (1.0 - z) * n + z * h

    def p_model(h):
        return linear(jnp.tanh(linear(h, params["wp1"], params["bp1"])),
                      params["wp2"], params["bp2"])

    def p_to_pred(p, xt):
        D = xt.shape[1]
        mean, logstd = p[:, :D], p[:, D:]
        sigma = jnp.exp(logstd)
        nan = jnp.isnan(xt)
        delta = jnp.where(nan, 0.0, xt - mean)
        return mean, logstd, delta, delta / sigma

    h = jnp.tanh(linear(jax.nn.relu(linear(cov, params["wc1"], params["bc1"])),
                        params["wc2"], params["bc2"]))
    p = p_model(h)
    pre_list, post_list = [], []
    for t in range(X.shape[0]):
        xt = X[t]
        pp = p if impute else jnp.zeros_like(p)
        h = gru_cell(pp, h, params["wih_n"], params["whh_n"],
                     params["bih_n"], params["bhh_n"])
        p = p_model(h)
        pre = jnp.stack(p_to_pred(p, xt), axis=-1)
        pre_list.append(pre)
        if t < num_observed:
            mask = jnp.where(jnp.isnan(xt), 0.0, 1.0)
            gi = jnp.einsum("bdi,dip->bdp", pre, params["w_prep"]) + params["bias_prep"]
            gi = jax.nn.relu(gi) * mask[:, :, None]
            gi = jnp.concatenate([gi, mask[:, :, None]], axis=-1)
            gi = gi.reshape(xt.shape[0], -1)
            h = gru_cell(gi, h, params["wih_d"], params["whh_d"],
                         params["bih_d"], params["bhh_d"])
            p = p_model(h)
            post_list.append(jnp.stack(p_to_pred(p, xt), axis=-1))
    return jnp.stack(pre_list, 0), jnp.stack(post_list, 0)


# ----------------------------------------------------------------------------
# Deterministic parameter init (shapes follow the module's __init__)
# ----------------------------------------------------------------------------
def init_params(key, D, H, Ph, P, C, Ch):
    ks = jax.random.split(key, 13)
    f32 = jnp.float32

    def unif(k, shape, scale):
        return jax.random.uniform(k, shape, f32, -scale, scale)

    def xavier(k, fan_out, fan_in):
        limit = math.sqrt(6.0 / (fan_in + fan_out))
        return jax.random.uniform(k, (fan_out, fan_in), f32, -limit, limit)

    kgru = 1.0 / math.sqrt(H)
    std_prep = math.sqrt(2.0 / (4 + P))
    return dict(
        wc1=xavier(ks[0], Ch, C), bc1=jnp.zeros((Ch,), f32),
        wc2=xavier(ks[1], H, Ch), bc2=jnp.zeros((H,), f32),
        wp1=xavier(ks[2], Ph, H), bp1=jnp.zeros((Ph,), f32),
        wp2=xavier(ks[3], 2 * D, Ph), bp2=jnp.zeros((2 * D,), f32),
        wih_n=unif(ks[4], (3 * H, 2 * D), kgru),
        whh_n=unif(ks[5], (3 * H, H), kgru),
        bih_n=unif(ks[6], (3 * H,), kgru),
        bhh_n=unif(ks[7], (3 * H,), kgru),
        w_prep=std_prep * jax.random.normal(ks[8], (D, 4, P), f32),
        bias_prep=0.1 + jnp.zeros((D, P), f32),
        wih_d=unif(ks[9], (3 * H, (P + 1) * D), kgru),
        whh_d=unif(ks[10], (3 * H, H), kgru),
        bih_d=unif(ks[11], (3 * H,), kgru),
        bhh_d=unif(ks[12], (3 * H,), kgru),
    )


if __name__ == "__main__":
    # conf: input_size=4, hidden_size=32, p_hidden_size=16, prep_hidden_size=3,
    #       cov_size=5, cov_hidden_size=8, impute=True, dropout (eval, identity)
    D, H, Ph, P, C, Ch = 4, 32, 16, 3, 5, 8
    T, B, num_observed = 8, 2, 5
    impute = True

    key = jax.random.PRNGKey(0)
    kp, kx, kc, kn = jax.random.split(key, 4)
    params = init_params(kp, D, H, Ph, P, C, Ch)

    X = jax.random.normal(kx, (T, B, D), jnp.float32)
    X = jnp.where(jax.random.bernoulli(kn, 0.3, (T, B, D)), jnp.nan, X)  # missing obs
    cov = jax.random.normal(kc, (B, C), jnp.float32)

    ref_pre, ref_post = reference_forward(params, X, num_observed, cov, impute=impute)

    # 1) exact-arithmetic check of the restructured kernel (f32 operands)
    pre32, post32 = discrete_gru_bayes_forward(
        params, X, num_observed, cov, impute=impute, compute_dtype=jnp.float32)
    jax.block_until_ready((pre32, post32))
    assert pre32.shape == (T, B, D, 4), pre32.shape
    assert post32.shape == (num_observed, B, D, 4), post32.shape
    err32 = max(float(jnp.max(jnp.abs(pre32 - ref_pre))),
                float(jnp.max(jnp.abs(post32 - ref_post))))
    assert err32 < 1e-3, f"f32 max abs err {err32}"

    # 2) perf path: bf16 operands, f32 MXU accumulation / f32 state carry
    pre_bf, post_bf = discrete_gru_bayes_forward(
        params, X, num_observed, cov, impute=impute, compute_dtype=jnp.bfloat16)
    jax.block_until_ready((pre_bf, post_bf))
    err_bf = max(float(jnp.max(jnp.abs(pre_bf - ref_pre))),
                 float(jnp.max(jnp.abs(post_bf - ref_post))))
    assert err_bf < 5e-2, f"bf16 max abs err {err_bf}"

    print("KERNEL_OK")
</pallas_src>

<mosaic_0001>
module attributes {stable_mosaic.version = 11 : i64} {
  func.func @discrete_gru_bayes_kernel(%arg0: i32, %arg1: memref<8x5xf32, #tpu.memory_space<vmem>>, %arg2: memref<8x8x4xf32, #tpu.memory_space<vmem>>, %arg3: memref<8x8x4xf32, #tpu.memory_space<vmem>>, %arg4: memref<5x8xf32, #tpu.memory_space<vmem>>, %arg5: memref<1x8xf32, #tpu.memory_space<vmem>>, %arg6: memref<8x32xf32, #tpu.memory_space<vmem>>, %arg7: memref<1x32xf32, #tpu.memory_space<vmem>>, %arg8: memref<32x16xf32, #tpu.memory_space<vmem>>, %arg9: memref<1x16xf32, #tpu.memory_space<vmem>>, %arg10: memref<16x8xf32, #tpu.memory_space<vmem>>, %arg11: memref<1x8xf32, #tpu.memory_space<vmem>>, %arg12: memref<16x128xf32, #tpu.memory_space<vmem>>, %arg13: memref<32x128xf32, #tpu.memory_space<vmem>>, %arg14: memref<1x128xf32, #tpu.memory_space<vmem>>, %arg15: memref<16x12xf32, #tpu.memory_space<vmem>>, %arg16: memref<1x12xf32, #tpu.memory_space<vmem>>, %arg17: memref<12x128xf32, #tpu.memory_space<vmem>>, %arg18: memref<4x128xf32, #tpu.memory_space<vmem>>, %arg19: memref<32x128xf32, #tpu.memory_space<vmem>>, %arg20: memref<1x128xf32, #tpu.memory_space<vmem>>, %arg21: memref<8x8x16xf32, #tpu.memory_space<vmem>>, %arg22: memref<5x8x16xf32, #tpu.memory_space<vmem>>) attributes {dimension_semantics = [#tpu.dimension_semantics<parallel>], iteration_bounds = array<i64: 1>, scalar_prefetch = 0 : i64, scratch_operands = 0 : i64, tpu.core_type = #tpu.core_type<tc>, window_params = [{transform_indices = @transform_0, window_bounds = array<i64: 8, 5>}, {transform_indices = @transform_1, window_bounds = array<i64: 8, 8, 4>}, {transform_indices = @transform_2, window_bounds = array<i64: 8, 8, 4>}, {pipeline_mode = #tpu.pipeline_mode<synchronous>, transform_indices = @transform_3, window_bounds = array<i64: 5, 8>}, {pipeline_mode = #tpu.pipeline_mode<synchronous>, transform_indices = @transform_4, window_bounds = array<i64: 1, 8>}, {pipeline_mode = #tpu.pipeline_mode<synchronous>, transform_indices = @transform_5, window_bounds = array<i64: 8, 32>}, {pipeline_mode = #tpu.pipeline_mode<synchronous>, transform_indices = @transform_6, window_bounds = array<i64: 1, 32>}, {pipeline_mode = #tpu.pipeline_mode<synchronous>, transform_indices = @transform_7, window_bounds = array<i64: 32, 16>}, {pipeline_mode = #tpu.pipeline_mode<synchronous>, transform_indices = @transform_8, window_bounds = array<i64: 1, 16>}, {pipeline_mode = #tpu.pipeline_mode<synchronous>, transform_indices = @transform_9, window_bounds = array<i64: 16, 8>}, {pipeline_mode = #tpu.pipeline_mode<synchronous>, transform_indices = @transform_10, window_bounds = array<i64: 1, 8>}, {pipeline_mode = #tpu.pipeline_mode<synchronous>, transform_indices = @transform_11, window_bounds = array<i64: 16, 128>}, {pipeline_mode = #tpu.pipeline_mode<synchronous>, transform_indices = @transform_12, window_bounds = array<i64: 32, 128>}, {pipeline_mode = #tpu.pipeline_mode<synchronous>, transform_indices = @transform_13, window_bounds = array<i64: 1, 128>}, {pipeline_mode = #tpu.pipeline_mode<synchronous>, transform_indices = @transform_14, window_bounds = array<i64: 16, 12>}, {pipeline_mode = #tpu.pipeline_mode<synchronous>, transform_indices = @transform_15, window_bounds = array<i64: 1, 12>}, {pipeline_mode = #tpu.pipeline_mode<synchronous>, transform_indices = @transform_16, window_bounds = array<i64: 12, 128>}, {pipeline_mode = #tpu.pipeline_mode<synchronous>, transform_indices = @transform_17, window_bounds = array<i64: 4, 128>}, {pipeline_mode = #tpu.pipeline_mode<synchronous>, transform_indices = @transform_18, window_bounds = array<i64: 32, 128>}, {pipeline_mode = #tpu.pipeline_mode<synchronous>, transform_indices = @transform_19, window_bounds = array<i64: 1, 128>}, {transform_indices = @transform_20, window_bounds = array<i64: 8, 8, 16>}, {transform_indices = @transform_21, window_bounds = array<i64: 5, 8, 16>}]} {
    %c0 = arith.constant 0 : index
    %c0_0 = arith.constant 0 : index
    %0 = vector.load %arg1[%c0, %c0_0] : memref<8x5xf32, #tpu.memory_space<vmem>>, vector<8x5xf32>
    %c0_1 = arith.constant 0 : index
    %c0_2 = arith.constant 0 : index
    %1 = vector.load %arg4[%c0_1, %c0_2] : memref<5x8xf32, #tpu.memory_space<vmem>>, vector<5x8xf32>
    %cst = arith.constant dense<0.000000e+00> : vector<8x8xf32>
    %2 = tpu.matmul %0, %1, %cst {dimension_numbers = #tpu.dot_dimension_numbers<[1], [0], [0], [1], [0, 0, 1, 1], [], []>} : vector<8x5xf32>, vector<5x8xf32>, vector<8x8xf32> -> vector<8x8xf32>
    %c0_3 = arith.constant 0 : index
    %c0_4 = arith.constant 0 : index
    %3 = vector.load %arg5[%c0_3, %c0_4] : memref<1x8xf32, #tpu.memory_space<vmem>>, vector<1x8xf32>
    %4 = vector.broadcast %3 : vector<1x8xf32> to vector<8x8xf32>
    %5 = arith.addf %2, %4 : vector<8x8xf32>
    %cst_5 = arith.constant 0.000000e+00 : f32
    %6 = vector.broadcast %cst_5 : f32 to vector<8x8xf32>
    %7 = arith.maximumf %5, %6 : vector<8x8xf32>
    %c0_6 = arith.constant 0 : index
    %c0_7 = arith.constant 0 : index
    %8 = vector.load %arg6[%c0_6, %c0_7] : memref<8x32xf32, #tpu.memory_space<vmem>>, vector<8x32xf32>
    %cst_8 = arith.constant dense<0.000000e+00> : vector<8x32xf32>
    %9 = tpu.matmul %7, %8, %cst_8 {dimension_numbers = #tpu.dot_dimension_numbers<[1], [0], [0], [1], [0, 0, 1, 1], [], []>} : vector<8x8xf32>, vector<8x32xf32>, vector<8x32xf32> -> vector<8x32xf32>
    %c0_9 = arith.constant 0 : index
    %c0_10 = arith.constant 0 : index
    %10 = vector.load %arg7[%c0_9, %c0_10] : memref<1x32xf32, #tpu.memory_space<vmem>>, vector<1x32xf32>
    %11 = vector.broadcast %10 : vector<1x32xf32> to vector<8x32xf32>
    %12 = arith.addf %9, %11 : vector<8x32xf32>
    %13 = math.tanh %12 : vector<8x32xf32>
    %c0_11 = arith.constant 0 : index
    %c0_12 = arith.constant 0 : index
    %14 = vector.load %arg8[%c0_11, %c0_12] : memref<32x16xf32, #tpu.memory_space<vmem>>, vector<32x16xf32>
    %cst_13 = arith.constant dense<0.000000e+00> : vector<8x16xf32>
    %15 = tpu.matmul %13, %14, %cst_13 {dimension_numbers = #tpu.dot_dimension_numbers<[1], [0], [0], [1], [0, 0, 1, 1], [], []>} : vector<8x32xf32>, vector<32x16xf32>, vector<8x16xf32> -> vector<8x16xf32>
    %c0_14 = arith.constant 0 : index
    %c0_15 = arith.constant 0 : index
    %16 = vector.load %arg9[%c0_14, %c0_15] : memref<1x16xf32, #tpu.memory_space<vmem>>, vector<1x16xf32>
    %17 = vector.broadcast %16 : vector<1x16xf32> to vector<8x16xf32>
    %18 = arith.addf %15, %17 : vector<8x16xf32>
    %19 = math.tanh %18 : vector<8x16xf32>
    %c0_16 = arith.constant 0 : index
    %c0_17 = arith.constant 0 : index
    %c0_18 = arith.constant 0 : index
    %20 = vector.load %arg2[%c0_16, %c0_17, %c0_18] : memref<8x8x4xf32, #tpu.memory_space<vmem>>, vector<1x8x4xf32>
    %21 = vector.shape_cast %20 : vector<1x8x4xf32> to vector<8x4xf32>
    %c0_19 = arith.constant 0 : index
    %c0_20 = arith.constant 0 : index
    %c0_21 = arith.constant 0 : index
    %22 = vector.load %arg3[%c0_19, %c0_20, %c0_21] : memref<8x8x4xf32, #tpu.memory_space<vmem>>, vector<1x8x4xf32>
    %23 = vector.shape_cast %22 : vector<1x8x4xf32> to vector<8x4xf32>
    %c0_22 = arith.constant 0 : index
    %c0_23 = arith.constant 0 : index
    %24 = vector.load %arg13[%c0_22, %c0_23] : memref<32x128xf32, #tpu.memory_space<vmem>>, vector<32x128xf32>
    %cst_24 = arith.constant dense<0.000000e+00> : vector<8x128xf32>
    %25 = tpu.matmul %13, %24, %cst_24 {dimension_numbers = #tpu.dot_dimension_numbers<[1], [0], [0], [1], [0, 0, 1, 1], [], []>} : vector<8x32xf32>, vector<32x128xf32>, vector<8x128xf32> -> vector<8x128xf32>
    %c0_25 = arith.constant 0 : index
    %c0_26 = arith.constant 0 : index
    %26 = vector.load %arg14[%c0_25, %c0_26] : memref<1x128xf32, #tpu.memory_space<vmem>>, vector<1x128xf32>
    %27 = vector.broadcast %26 : vector<1x128xf32> to vector<8x128xf32>
    %28 = arith.addf %25, %27 : vector<8x128xf32>
    %c0_27 = arith.constant 0 : index
    %c0_28 = arith.constant 0 : index
    %29 = vector.load %arg12[%c0_27, %c0_28] : memref<16x128xf32, #tpu.memory_space<vmem>>, vector<16x128xf32>
    %cst_29 = arith.constant dense<0.000000e+00> : vector<8x128xf32>
    %30 = tpu.matmul %19, %29, %cst_29 {dimension_numbers = #tpu.dot_dimension_numbers<[1], [0], [0], [1], [0, 0, 1, 1], [], []>} : vector<8x16xf32>, vector<16x128xf32>, vector<8x128xf32> -> vector<8x128xf32>
    %31 = arith.addf %28, %30 : vector<8x128xf32>
    %32 = vector.extract_strided_slice %31 {offsets = [0, 0], sizes = [8, 32], strides = [1, 1]} : vector<8x128xf32> to vector<8x32xf32>
    %33 = arith.negf %32 : vector<8x32xf32>
    %34 = math.exp %33 : vector<8x32xf32>
    %cst_30 = arith.constant 1.000000e+00 : f32
    %35 = vector.broadcast %cst_30 : f32 to vector<8x32xf32>
    %36 = arith.addf %35, %34 : vector<8x32xf32>
    %37 = arith.divf %35, %36 : vector<8x32xf32>
    %38 = vector.extract_strided_slice %31 {offsets = [0, 32], sizes = [8, 32], strides = [1, 1]} : vector<8x128xf32> to vector<8x32xf32>
    %39 = arith.negf %38 : vector<8x32xf32>
    %40 = math.exp %39 : vector<8x32xf32>
    %cst_31 = arith.constant 1.000000e+00 : f32
    %41 = vector.broadcast %cst_31 : f32 to vector<8x32xf32>
    %42 = arith.addf %41, %40 : vector<8x32xf32>
    %43 = arith.divf %41, %42 : vector<8x32xf32>
    %44 = vector.extract_strided_slice %31 {offsets = [0, 64], sizes = [8, 32], strides = [1, 1]} : vector<8x128xf32> to vector<8x32xf32>
    %45 = vector.extract_strided_slice %31 {offsets = [0, 96], sizes = [8, 32], strides = [1, 1]} : vector<8x128xf32> to vector<8x32xf32>
    %46 = arith.mulf %37, %45 : vector<8x32xf32>
    %47 = arith.addf %44, %46 : vector<8x32xf32>
    %48 = math.tanh %47 : vector<8x32xf32>
    %cst_32 = arith.constant 1.000000e+00 : f32
    %49 = vector.broadcast %cst_32 : f32 to vector<8x32xf32>
    %50 = arith.subf %49, %43 : vector<8x32xf32>
    %51 = arith.mulf %50, %48 : vector<8x32xf32>
    %52 = arith.mulf %43, %13 : vector<8x32xf32>
    %53 = arith.addf %51, %52 : vector<8x32xf32>
    %c0_33 = arith.constant 0 : index
    %c0_34 = arith.constant 0 : index
    %54 = vector.load %arg8[%c0_33, %c0_34] : memref<32x16xf32, #tpu.memory_space<vmem>>, vector<32x16xf32>
    %cst_35 = arith.constant dense<0.000000e+00> : vector<8x16xf32>
    %55 = tpu.matmul %53, %54, %cst_35 {dimension_numbers = #tpu.dot_dimension_numbers<[1], [0], [0], [1], [0, 0, 1, 1], [], []>} : vector<8x32xf32>, vector<32x16xf32>, vector<8x16xf32> -> vector<8x16xf32>
    %c0_36 = arith.constant 0 : index
    %c0_37 = arith.constant 0 : index
    %56 = vector.load %arg9[%c0_36, %c0_37] : memref<1x16xf32, #tpu.memory_space<vmem>>, vector<1x16xf32>
    %57 = vector.broadcast %56 : vector<1x16xf32> to vector<8x16xf32>
    %58 = arith.addf %55, %57 : vector<8x16xf32>
    %59 = math.tanh %58 : vector<8x16xf32>
    %c0_38 = arith.constant 0 : index
    %c0_39 = arith.constant 0 : index
    %60 = vector.load %arg10[%c0_38, %c0_39] : memref<16x8xf32, #tpu.memory_space<vmem>>, vector<16x8xf32>
    %cst_40 = arith.constant dense<0.000000e+00> : vector<8x8xf32>
    %61 = tpu.matmul %59, %60, %cst_40 {dimension_numbers = #tpu.dot_dimension_numbers<[1], [0], [0], [1], [0, 0, 1, 1], [], []>} : vector<8x16xf32>, vector<16x8xf32>, vector<8x8xf32> -> vector<8x8xf32>
    %c0_41 = arith.constant 0 : index
    %c0_42 = arith.constant 0 : index
    %62 = vector.load %arg11[%c0_41, %c0_42] : memref<1x8xf32, #tpu.memory_space<vmem>>, vector<1x8xf32>
    %63 = vector.broadcast %62 : vector<1x8xf32> to vector<8x8xf32>
    %64 = arith.addf %61, %63 : vector<8x8xf32>
    %65 = vector.extract_strided_slice %64 {offsets = [0, 0], sizes = [8, 4], strides = [1, 1]} : vector<8x8xf32> to vector<8x4xf32>
    %66 = vector.extract_strided_slice %64 {offsets = [0, 4], sizes = [8, 4], strides = [1, 1]} : vector<8x8xf32> to vector<8x4xf32>
    %67 = arith.subf %21, %65 : vector<8x4xf32>
    %68 = arith.mulf %23, %67 : vector<8x4xf32>
    %cst_43 = arith.constant 0.000000e+00 : f32
    %69 = vector.broadcast %cst_43 : f32 to vector<8x4xf32>
    %70 = arith.subf %69, %66 : vector<8x4xf32>
    %71 = math.exp %70 : vector<8x4xf32>
    %72 = arith.mulf %68, %71 : vector<8x4xf32>
    %73 = tpu.concatenate %65, %66, %68, %72 in 1 : vector<8x4xf32>, vector<8x4xf32>, vector<8x4xf32>, vector<8x4xf32> -> vector<8x16xf32>
    %c0_44 = arith.constant 0 : index
    %c0_45 = arith.constant 0 : index
    %c0_46 = arith.constant 0 : index
    %74 = vector.load %arg21[%c0_44, %c0_45, %c0_46] : memref<8x8x16xf32, #tpu.memory_space<vmem>>, vector<1x8x16xf32>
    %75 = vector.shape_cast %74 : vector<1x8x16xf32> to vector<8x16xf32>
    %76 = vector.shape_cast %73 : vector<8x16xf32> to vector<1x8x16xf32>
    tpu.vector_store %arg21[%c0_44, %c0_45, %c0_46], %76 {strides = array<i32>} : memref<8x8x16xf32, #tpu.memory_space<vmem>>, vector<1x8x16xf32>,
    %c0_47 = arith.constant 0 : index
    %c0_48 = arith.constant 0 : index
    %77 = vector.load %arg15[%c0_47, %c0_48] : memref<16x12xf32, #tpu.memory_space<vmem>>, vector<16x12xf32>
    %cst_49 = arith.constant dense<0.000000e+00> : vector<8x12xf32>
    %78 = tpu.matmul %73, %77, %cst_49 {dimension_numbers = #tpu.dot_dimension_numbers<[1], [0], [0], [1], [0, 0, 1, 1], [], []>} : vector<8x16xf32>, vector<16x12xf32>, vector<8x12xf32> -> vector<8x12xf32>
    %c0_50 = arith.constant 0 : index
    %c0_51 = arith.constant 0 : index
    %79 = vector.load %arg16[%c0_50, %c0_51] : memref<1x12xf32, #tpu.memory_space<vmem>>, vector<1x12xf32>
    %80 = vector.broadcast %79 : vector<1x12xf32> to vector<8x12xf32>
    %81 = arith.addf %78, %80 : vector<8x12xf32>
    %cst_52 = arith.constant 0.000000e+00 : f32
    %82 = vector.broadcast %cst_52 : f32 to vector<8x12xf32>
    %83 = arith.maximumf %81, %82 : vector<8x12xf32>
    %84 = tpu.concatenate %23, %23, %23 in 1 : vector<8x4xf32>, vector<8x4xf32>, vector<8x4xf32> -> vector<8x12xf32>
    %85 = arith.mulf %83, %84 : vector<8x12xf32>
    %c0_53 = arith.constant 0 : index
    %c0_54 = arith.constant 0 : index
    %86 = vector.load %arg17[%c0_53, %c0_54] : memref<12x128xf32, #tpu.memory_space<vmem>>, vector<12x128xf32>
    %cst_55 = arith.constant dense<0.000000e+00> : vector<8x128xf32>
    %87 = tpu.matmul %85, %86, %cst_55 {dimension_numbers = #tpu.dot_dimension_numbers<[1], [0], [0], [1], [0, 0, 1, 1], [], []>} : vector<8x12xf32>, vector<12x128xf32>, vector<8x128xf32> -> vector<8x128xf32>
    %c0_56 = arith.constant 0 : index
    %c0_57 = arith.constant 0 : index
    %88 = vector.load %arg18[%c0_56, %c0_57] : memref<4x128xf32, #tpu.memory_space<vmem>>, vector<4x128xf32>
    %cst_58 = arith.constant dense<0.000000e+00> : vector<8x128xf32>
    %89 = tpu.matmul %23, %88, %cst_58 {dimension_numbers = #tpu.dot_dimension_numbers<[1], [0], [0], [1], [0, 0, 1, 1], [], []>} : vector<8x4xf32>, vector<4x128xf32>, vector<8x128xf32> -> vector<8x128xf32>
    %90 = arith.addf %87, %89 : vector<8x128xf32>
    %c0_59 = arith.constant 0 : index
    %c0_60 = arith.constant 0 : index
    %91 = vector.load %arg19[%c0_59, %c0_60] : memref<32x128xf32, #tpu.memory_space<vmem>>, vector<32x128xf32>
    %cst_61 = arith.constant dense<0.000000e+00> : vector<8x128xf32>
    %92 = tpu.matmul %53, %91, %cst_61 {dimension_numbers = #tpu.dot_dimension_numbers<[1], [0], [0], [1], [0, 0, 1, 1], [], []>} : vector<8x32xf32>, vector<32x128xf32>, vector<8x128xf32> -> vector<8x128xf32>
    %93 = arith.addf %90, %92 : vector<8x128xf32>
    %c0_62 = arith.constant 0 : index
    %c0_63 = arith.constant 0 : index
    %94 = vector.load %arg20[%c0_62, %c0_63] : memref<1x128xf32, #tpu.memory_space<vmem>>, vector<1x128xf32>
    %95 = vector.broadcast %94 : vector<1x128xf32> to vector<8x128xf32>
    %96 = arith.addf %93, %95 : vector<8x128xf32>
    %97 = vector.extract_strided_slice %96 {offsets = [0, 0], sizes = [8, 32], strides = [1, 1]} : vector<8x128xf32> to vector<8x32xf32>
    %98 = arith.negf %97 : vector<8x32xf32>
    %99 = math.exp %98 : vector<8x32xf32>
    %cst_64 = arith.constant 1.000000e+00 : f32
    %100 = vector.broadcast %cst_64 : f32 to vector<8x32xf32>
    %101 = arith.addf %100, %99 : vector<8x32xf32>
    %102 = arith.divf %100, %101 : vector<8x32xf32>
    %103 = vector.extract_strided_slice %96 {offsets = [0, 32], sizes = [8, 32], strides = [1, 1]} : vector<8x128xf32> to vector<8x32xf32>
    %104 = arith.negf %103 : vector<8x32xf32>
    %105 = math.exp %104 : vector<8x32xf32>
    %cst_65 = arith.constant 1.000000e+00 : f32
    %106 = vector.broadcast %cst_65 : f32 to vector<8x32xf32>
    %107 = arith.addf %106, %105 : vector<8x32xf32>
    %108 = arith.divf %106, %107 : vector<8x32xf32>
    %109 = vector.extract_strided_slice %96 {offsets = [0, 64], sizes = [8, 32], strides = [1, 1]} : vector<8x128xf32> to vector<8x32xf32>
    %110 = vector.extract_strided_slice %96 {offsets = [0, 96], sizes = [8, 32], strides = [1, 1]} : vector<8x128xf32> to vector<8x32xf32>
    %111 = arith.mulf %102, %110 : vector<8x32xf32>
    %112 = arith.addf %109, %111 : vector<8x32xf32>
    %113 = math.tanh %112 : vector<8x32xf32>
    %cst_66 = arith.constant 1.000000e+00 : f32
    %114 = vector.broadcast %cst_66 : f32 to vector<8x32xf32>
    %115 = arith.subf %114, %108 : vector<8x32xf32>
    %116 = arith.mulf %115, %113 : vector<8x32xf32>
    %117 = arith.mulf %108, %53 : vector<8x32xf32>
    %118 = arith.addf %116, %117 : vector<8x32xf32>
    %c0_67 = arith.constant 0 : index
    %c0_68 = arith.constant 0 : index
    %119 = vector.load %arg8[%c0_67, %c0_68] : memref<32x16xf32, #tpu.memory_space<vmem>>, vector<32x16xf32>
    %cst_69 = arith.constant dense<0.000000e+00> : vector<8x16xf32>
    %120 = tpu.matmul %118, %119, %cst_69 {dimension_numbers = #tpu.dot_dimension_numbers<[1], [0], [0], [1], [0, 0, 1, 1], [], []>} : vector<8x32xf32>, vector<32x16xf32>, vector<8x16xf32> -> vector<8x16xf32>
    %c0_70 = arith.constant 0 : index
    %c0_71 = arith.constant 0 : index
    %121 = vector.load %arg9[%c0_70, %c0_71] : memref<1x16xf32, #tpu.memory_space<vmem>>, vector<1x16xf32>
    %122 = vector.broadcast %121 : vector<1x16xf32> to vector<8x16xf32>
    %123 = arith.addf %120, %122 : vector<8x16xf32>
    %124 = math.tanh %123 : vector<8x16xf32>
    %c0_72 = arith.constant 0 : index
    %c0_73 = arith.constant 0 : index
    %125 = vector.load %arg10[%c0_72, %c0_73] : memref<16x8xf32, #tpu.memory_space<vmem>>, vector<16x8xf32>
    %cst_74 = arith.constant dense<0.000000e+00> : vector<8x8xf32>
    %126 = tpu.matmul %124, %125, %cst_74 {dimension_numbers = #tpu.dot_dimension_numbers<[1], [0], [0], [1], [0, 0, 1, 1], [], []>} : vector<8x16xf32>, vector<16x8xf32>, vector<8x8xf32> -> vector<8x8xf32>
    %c0_75 = arith.constant 0 : index
    %c0_76 = arith.constant 0 : index
    %127 = vector.load %arg11[%c0_75, %c0_76] : memref<1x8xf32, #tpu.memory_space<vmem>>, vector<1x8xf32>
    %128 = vector.broadcast %127 : vector<1x8xf32> to vector<8x8xf32>
    %129 = arith.addf %126, %128 : vector<8x8xf32>
    %130 = vector.extract_strided_slice %129 {offsets = [0, 0], sizes = [8, 4], strides = [1, 1]} : vector<8x8xf32> to vector<8x4xf32>
    %131 = vector.extract_strided_slice %129 {offsets = [0, 4], sizes = [8, 4], strides = [1, 1]} : vector<8x8xf32> to vector<8x4xf32>
    %132 = arith.subf %21, %130 : vector<8x4xf32>
    %133 = arith.mulf %23, %132 : vector<8x4xf32>
    %cst_77 = arith.constant 0.000000e+00 : f32
    %134 = vector.broadcast %cst_77 : f32 to vector<8x4xf32>
    %135 = arith.subf %134, %131 : vector<8x4xf32>
    %136 = math.exp %135 : vector<8x4xf32>
    %137 = arith.mulf %133, %136 : vector<8x4xf32>
    %138 = tpu.concatenate %130, %131, %133, %137 in 1 : vector<8x4xf32>, vector<8x4xf32>, vector<8x4xf32>, vector<8x4xf32> -> vector<8x16xf32>
    %c0_78 = arith.constant 0 : index
    %c0_79 = arith.constant 0 : index
    %c0_80 = arith.constant 0 : index
    %139 = vector.load %arg22[%c0_78, %c0_79, %c0_80] : memref<5x8x16xf32, #tpu.memory_space<vmem>>, vector<1x8x16xf32>
    %140 = vector.shape_cast %139 : vector<1x8x16xf32> to vector<8x16xf32>
    %141 = vector.shape_cast %138 : vector<8x16xf32> to vector<1x8x16xf32>
    tpu.vector_store %arg22[%c0_78, %c0_79, %c0_80], %141 {strides = array<i32>} : memref<5x8x16xf32, #tpu.memory_space<vmem>>, vector<1x8x16xf32>,
    %c1 = arith.constant 1 : index
    %c0_81 = arith.constant 0 : index
    %c0_82 = arith.constant 0 : index
    %142 = vector.load %arg2[%c1, %c0_81, %c0_82] : memref<8x8x4xf32, #tpu.memory_space<vmem>>, vector<1x8x4xf32>
    %143 = vector.shape_cast %142 : vector<1x8x4xf32> to vector<8x4xf32>
    %c1_83 = arith.constant 1 : index
    %c0_84 = arith.constant 0 : index
    %c0_85 = arith.constant 0 : index
    %144 = vector.load %arg3[%c1_83, %c0_84, %c0_85] : memref<8x8x4xf32, #tpu.memory_space<vmem>>, vector<1x8x4xf32>
    %145 = vector.shape_cast %144 : vector<1x8x4xf32> to vector<8x4xf32>
    %c0_86 = arith.constant 0 : index
    %c0_87 = arith.constant 0 : index
    %146 = vector.load %arg13[%c0_86, %c0_87] : memref<32x128xf32, #tpu.memory_space<vmem>>, vector<32x128xf32>
    %cst_88 = arith.constant dense<0.000000e+00> : vector<8x128xf32>
    %147 = tpu.matmul %118, %146, %cst_88 {dimension_numbers = #tpu.dot_dimension_numbers<[1], [0], [0], [1], [0, 0, 1, 1], [], []>} : vector<8x32xf32>, vector<32x128xf32>, vector<8x128xf32> -> vector<8x128xf32>
    %c0_89 = arith.constant 0 : index
    %c0_90 = arith.constant 0 : index
    %148 = vector.load %arg14[%c0_89, %c0_90] : memref<1x128xf32, #tpu.memory_space<vmem>>, vector<1x128xf32>
    %149 = vector.broadcast %148 : vector<1x128xf32> to vector<8x128xf32>
    %150 = arith.addf %147, %149 : vector<8x128xf32>
    %c0_91 = arith.constant 0 : index
    %c0_92 = arith.constant 0 : index
    %151 = vector.load %arg12[%c0_91, %c0_92] : memref<16x128xf32, #tpu.memory_space<vmem>>, vector<16x128xf32>
    %cst_93 = arith.constant dense<0.000000e+00> : vector<8x128xf32>
    %152 = tpu.matmul %124, %151, %cst_93 {dimension_numbers = #tpu.dot_dimension_numbers<[1], [0], [0], [1], [0, 0, 1, 1], [], []>} : vector<8x16xf32>, vector<16x128xf32>, vector<8x128xf32> -> vector<8x128xf32>
    %153 = arith.addf %150, %152 : vector<8x128xf32>
    %154 = vector.extract_strided_slice %153 {offsets = [0, 0], sizes = [8, 32], strides = [1, 1]} : vector<8x128xf32> to vector<8x32xf32>
    %155 = arith.negf %154 : vector<8x32xf32>
    %156 = math.exp %155 : vector<8x32xf32>
    %cst_94 = arith.constant 1.000000e+00 : f32
    %157 = vector.broadcast %cst_94 : f32 to vector<8x32xf32>
    %158 = arith.addf %157, %156 : vector<8x32xf32>
    %159 = arith.divf %157, %158 : vector<8x32xf32>
    %160 = vector.extract_strided_slice %153 {offsets = [0, 32], sizes = [8, 32], strides = [1, 1]} : vector<8x128xf32> to vector<8x32xf32>
    %161 = arith.negf %160 : vector<8x32xf32>
    %162 = math.exp %161 : vector<8x32xf32>
    %cst_95 = arith.constant 1.000000e+00 : f32
    %163 = vector.broadcast %cst_95 : f32 to vector<8x32xf32>
    %164 = arith.addf %163, %162 : vector<8x32xf32>
    %165 = arith.divf %163, %164 : vector<8x32xf32>
    %166 = vector.extract_strided_slice %153 {offsets = [0, 64], sizes = [8, 32], strides = [1, 1]} : vector<8x128xf32> to vector<8x32xf32>
    %167 = vector.extract_strided_slice %153 {offsets = [0, 96], sizes = [8, 32], strides = [1, 1]} : vector<8x128xf32> to vector<8x32xf32>
    %168 = arith.mulf %159, %167 : vector<8x32xf32>
    %169 = arith.addf %166, %168 : vector<8x32xf32>
    %170 = math.tanh %169 : vector<8x32xf32>
    %cst_96 = arith.constant 1.000000e+00 : f32
    %171 = vector.broadcast %cst_96 : f32 to vector<8x32xf32>
    %172 = arith.subf %171, %165 : vector<8x32xf32>
    %173 = arith.mulf %172, %170 : vector<8x32xf32>
    %174 = arith.mulf %165, %118 : vector<8x32xf32>
    %175 = arith.addf %173, %174 : vector<8x32xf32>
    %c0_97 = arith.constant 0 : index
    %c0_98 = arith.constant 0 : index
    %176 = vector.load %arg8[%c0_97, %c0_98] : memref<32x16xf32, #tpu.memory_space<vmem>>, vector<32x16xf32>
    %cst_99 = arith.constant dense<0.000000e+00> : vector<8x16xf32>
    %177 = tpu.matmul %175, %176, %cst_99 {dimension_numbers = #tpu.dot_dimension_numbers<[1], [0], [0], [1], [0, 0, 1, 1], [], []>} : vector<8x32xf32>, vector<32x16xf32>, vector<8x16xf32> -> vector<8x16xf32>
    %c0_100 = arith.constant 0 : index
    %c0_101 = arith.constant 0 : index
    %178 = vector.load %arg9[%c0_100, %c0_101] : memref<1x16xf32, #tpu.memory_space<vmem>>, vector<1x16xf32>
    %179 = vector.broadcast %178 : vector<1x16xf32> to vector<8x16xf32>
    %180 = arith.addf %177, %179 : vector<8x16xf32>
    %181 = math.tanh %180 : vector<8x16xf32>
    %c0_102 = arith.constant 0 : index
    %c0_103 = arith.constant 0 : index
    %182 = vector.load %arg10[%c0_102, %c0_103] : memref<16x8xf32, #tpu.memory_space<vmem>>, vector<16x8xf32>
    %cst_104 = arith.constant dense<0.000000e+00> : vector<8x8xf32>
    %183 = tpu.matmul %181, %182, %cst_104 {dimension_numbers = #tpu.dot_dimension_numbers<[1], [0], [0], [1], [0, 0, 1, 1], [], []>} : vector<8x16xf32>, vector<16x8xf32>, vector<8x8xf32> -> vector<8x8xf32>
    %c0_105 = arith.constant 0 : index
    %c0_106 = arith.constant 0 : index
    %184 = vector.load %arg11[%c0_105, %c0_106] : memref<1x8xf32, #tpu.memory_space<vmem>>, vector<1x8xf32>
    %185 = vector.broadcast %184 : vector<1x8xf32> to vector<8x8xf32>
    %186 = arith.addf %183, %185 : vector<8x8xf32>
    %187 = vector.extract_strided_slice %186 {offsets = [0, 0], sizes = [8, 4], strides = [1, 1]} : vector<8x8xf32> to vector<8x4xf32>
    %188 = vector.extract_strided_slice %186 {offsets = [0, 4], sizes = [8, 4], strides = [1, 1]} : vector<8x8xf32> to vector<8x4xf32>
    %189 = arith.subf %143, %187 : vector<8x4xf32>
    %190 = arith.mulf %145, %189 : vector<8x4xf32>
    %cst_107 = arith.constant 0.000000e+00 : f32
    %191 = vector.broadcast %cst_107 : f32 to vector<8x4xf32>
    %192 = arith.subf %191, %188 : vector<8x4xf32>
    %193 = math.exp %192 : vector<8x4xf32>
    %194 = arith.mulf %190, %193 : vector<8x4xf32>
    %195 = tpu.concatenate %187, %188, %190, %194 in 1 : vector<8x4xf32>, vector<8x4xf32>, vector<8x4xf32>, vector<8x4xf32> -> vector<8x16xf32>
    %c1_108 = arith.constant 1 : index
    %c0_109 = arith.constant 0 : index
    %c0_110 = arith.constant 0 : index
    %196 = vector.load %arg21[%c1_108, %c0_109, %c0_110] : memref<8x8x16xf32, #tpu.memory_space<vmem>>, vector<1x8x16xf32>
    %197 = vector.shape_cast %196 : vector<1x8x16xf32> to vector<8x16xf32>
    %198 = vector.shape_cast %195 : vector<8x16xf32> to vector<1x8x16xf32>
    tpu.vector_store %arg21[%c1_108, %c0_109, %c0_110], %198 {strides = array<i32>} : memref<8x8x16xf32, #tpu.memory_space<vmem>>, vector<1x8x16xf32>,
    %c0_111 = arith.constant 0 : index
    %c0_112 = arith.constant 0 : index
    %199 = vector.load %arg15[%c0_111, %c0_112] : memref<16x12xf32, #tpu.memory_space<vmem>>, vector<16x12xf32>
    %cst_113 = arith.constant dense<0.000000e+00> : vector<8x12xf32>
    %200 = tpu.matmul %195, %199, %cst_113 {dimension_numbers = #tpu.dot_dimension_numbers<[1], [0], [0], [1], [0, 0, 1, 1], [], []>} : vector<8x16xf32>, vector<16x12xf32>, vector<8x12xf32> -> vector<8x12xf32>
    %c0_114 = arith.constant 0 : index
    %c0_115 = arith.constant 0 : index
    %201 = vector.load %arg16[%c0_114, %c0_115] : memref<1x12xf32, #tpu.memory_space<vmem>>, vector<1x12xf32>
    %202 = vector.broadcast %201 : vector<1x12xf32> to vector<8x12xf32>
    %203 = arith.addf %200, %202 : vector<8x12xf32>
    %cst_116 = arith.constant 0.000000e+00 : f32
    %204 = vector.broadcast %cst_116 : f32 to vector<8x12xf32>
    %205 = arith.maximumf %203, %204 : vector<8x12xf32>
    %206 = tpu.concatenate %145, %145, %145 in 1 : vector<8x4xf32>, vector<8x4xf32>, vector<8x4xf32> -> vector<8x12xf32>
    %207 = arith.mulf %205, %206 : vector<8x12xf32>
    %c0_117 = arith.constant 0 : index
    %c0_118 = arith.constant 0 : index
    %208 = vector.load %arg17[%c0_117, %c0_118] : memref<12x128xf32, #tpu.memory_space<vmem>>, vector<12x128xf32>
    %cst_119 = arith.constant dense<0.000000e+00> : vector<8x128xf32>
    %209 = tpu.matmul %207, %208, %cst_119 {dimension_numbers = #tpu.dot_dimension_numbers<[1], [0], [0], [1], [0, 0, 1, 1], [], []>} : vector<8x12xf32>, vector<12x128xf32>, vector<8x128xf32> -> vector<8x128xf32>
    %c0_120 = arith.constant 0 : index
    %c0_121 = arith.constant 0 : index
    %210 = vector.load %arg18[%c0_120, %c0_121] : memref<4x128xf32, #tpu.memory_space<vmem>>, vector<4x128xf32>
    %cst_122 = arith.constant dense<0.000000e+00> : vector<8x128xf32>
    %211 = tpu.matmul %145, %210, %cst_122 {dimension_numbers = #tpu.dot_dimension_numbers<[1], [0], [0], [1], [0, 0, 1, 1], [], []>} : vector<8x4xf32>, vector<4x128xf32>, vector<8x128xf32> -> vector<8x128xf32>
    %212 = arith.addf %209, %211 : vector<8x128xf32>
    %c0_123 = arith.constant 0 : index
    %c0_124 = arith.constant 0 : index
    %213 = vector.load %arg19[%c0_123, %c0_124] : memref<32x128xf32, #tpu.memory_space<vmem>>, vector<32x128xf32>
    %cst_125 = arith.constant dense<0.000000e+00> : vector<8x128xf32>
    %214 = tpu.matmul %175, %213, %cst_125 {dimension_numbers = #tpu.dot_dimension_numbers<[1], [0], [0], [1], [0, 0, 1, 1], [], []>} : vector<8x32xf32>, vector<32x128xf32>, vector<8x128xf32> -> vector<8x128xf32>
    %215 = arith.addf %212, %214 : vector<8x128xf32>
    %c0_126 = arith.constant 0 : index
    %c0_127 = arith.constant 0 : index
    %216 = vector.load %arg20[%c0_126, %c0_127] : memref<1x128xf32, #tpu.memory_space<vmem>>, vector<1x128xf32>
    %217 = vector.broadcast %216 : vector<1x128xf32> to vector<8x128xf32>
    %218 = arith.addf %215, %217 : vector<8x128xf32>
    %219 = vector.extract_strided_slice %218 {offsets = [0, 0], sizes = [8, 32], strides = [1, 1]} : vector<8x128xf32> to vector<8x32xf32>
    %220 = arith.negf %219 : vector<8x32xf32>
    %221 = math.exp %220 : vector<8x32xf32>
    %cst_128 = arith.constant 1.000000e+00 : f32
    %222 = vector.broadcast %cst_128 : f32 to vector<8x32xf32>
    %223 = arith.addf %222, %221 : vector<8x32xf32>
    %224 = arith.divf %222, %223 : vector<8x32xf32>
    %225 = vector.extract_strided_slice %218 {offsets = [0, 32], sizes = [8, 32], strides = [1, 1]} : vector<8x128xf32> to vector<8x32xf32>
    %226 = arith.negf %225 : vector<8x32xf32>
    %227 = math.exp %226 : vector<8x32xf32>
    %cst_129 = arith.constant 1.000000e+00 : f32
    %228 = vector.broadcast %cst_129 : f32 to vector<8x32xf32>
    %229 = arith.addf %228, %227 : vector<8x32xf32>
    %230 = arith.divf %228, %229 : vector<8x32xf32>
    %231 = vector.extract_strided_slice %218 {offsets = [0, 64], sizes = [8, 32], strides = [1, 1]} : vector<8x128xf32> to vector<8x32xf32>
    %232 = vector.extract_strided_slice %218 {offsets = [0, 96], sizes = [8, 32], strides = [1, 1]} : vector<8x128xf32> to vector<8x32xf32>
    %233 = arith.mulf %224, %232 : vector<8x32xf32>
    %234 = arith.addf %231, %233 : vector<8x32xf32>
    %235 = math.tanh %234 : vector<8x32xf32>
    %cst_130 = arith.constant 1.000000e+00 : f32
    %236 = vector.broadcast %cst_130 : f32 to vector<8x32xf32>
    %237 = arith.subf %236, %230 : vector<8x32xf32>
    %238 = arith.mulf %237, %235 : vector<8x32xf32>
    %239 = arith.mulf %230, %175 : vector<8x32xf32>
    %240 = arith.addf %238, %239 : vector<8x32xf32>
    %c0_131 = arith.constant 0 : index
    %c0_132 = arith.constant 0 : index
    %241 = vector.load %arg8[%c0_131, %c0_132] : memref<32x16xf32, #tpu.memory_space<vmem>>, vector<32x16xf32>
    %cst_133 = arith.constant dense<0.000000e+00> : vector<8x16xf32>
    %242 = tpu.matmul %240, %241, %cst_133 {dimension_numbers = #tpu.dot_dimension_numbers<[1], [0], [0], [1], [0, 0, 1, 1], [], []>} : vector<8x32xf32>, vector<32x16xf32>, vector<8x16xf32> -> vector<8x16xf32>
    %c0_134 = arith.constant 0 : index
    %c0_135 = arith.constant 0 : index
    %243 = vector.load %arg9[%c0_134, %c0_135] : memref<1x16xf32, #tpu.memory_space<vmem>>, vector<1x16xf32>
    %244 = vector.broadcast %243 : vector<1x16xf32> to vector<8x16xf32>
    %245 = arith.addf %242, %244 : vector<8x16xf32>
    %246 = math.tanh %245 : vector<8x16xf32>
    %c0_136 = arith.constant 0 : index
    %c0_137 = arith.constant 0 : index
    %247 = vector.load %arg10[%c0_136, %c0_137] : memref<16x8xf32, #tpu.memory_space<vmem>>, vector<16x8xf32>
    %cst_138 = arith.constant dense<0.000000e+00> : vector<8x8xf32>
    %248 = tpu.matmul %246, %247, %cst_138 {dimension_numbers = #tpu.dot_dimension_numbers<[1], [0], [0], [1], [0, 0, 1, 1], [], []>} : vector<8x16xf32>, vector<16x8xf32>, vector<8x8xf32> -> vector<8x8xf32>
    %c0_139 = arith.constant 0 : index
    %c0_140 = arith.constant 0 : index
    %249 = vector.load %arg11[%c0_139, %c0_140] : memref<1x8xf32, #tpu.memory_space<vmem>>, vector<1x8xf32>
    %250 = vector.broadcast %249 : vector<1x8xf32> to vector<8x8xf32>
    %251 = arith.addf %248, %250 : vector<8x8xf32>
    %252 = vector.extract_strided_slice %251 {offsets = [0, 0], sizes = [8, 4], strides = [1, 1]} : vector<8x8xf32> to vector<8x4xf32>
    %253 = vector.extract_strided_slice %251 {offsets = [0, 4], sizes = [8, 4], strides = [1, 1]} : vector<8x8xf32> to vector<8x4xf32>
    %254 = arith.subf %143, %252 : vector<8x4xf32>
    %255 = arith.mulf %145, %254 : vector<8x4xf32>
    %cst_141 = arith.constant 0.000000e+00 : f32
    %256 = vector.broadcast %cst_141 : f32 to vector<8x4xf32>
    %257 = arith.subf %256, %253 : vector<8x4xf32>
    %258 = math.exp %257 : vector<8x4xf32>
    %259 = arith.mulf %255, %258 : vector<8x4xf32>
    %260 = tpu.concatenate %252, %253, %255, %259 in 1 : vector<8x4xf32>, vector<8x4xf32>, vector<8x4xf32>, vector<8x4xf32> -> vector<8x16xf32>
    %c1_142 = arith.constant 1 : index
    %c0_143 = arith.constant 0 : index
    %c0_144 = arith.constant 0 : index
    %261 = vector.load %arg22[%c1_142, %c0_143, %c0_144] : memref<5x8x16xf32, #tpu.memory_space<vmem>>, vector<1x8x16xf32>
    %262 = vector.shape_cast %261 : vector<1x8x16xf32> to vector<8x16xf32>
    %263 = vector.shape_cast %260 : vector<8x16xf32> to vector<1x8x16xf32>
    tpu.vector_store %arg22[%c1_142, %c0_143, %c0_144], %263 {strides = array<i32>} : memref<5x8x16xf32, #tpu.memory_space<vmem>>, vector<1x8x16xf32>,
    %c2 = arith.constant 2 : index
    %c0_145 = arith.constant 0 : index
    %c0_146 = arith.constant 0 : index
    %264 = vector.load %arg2[%c2, %c0_145, %c0_146] : memref<8x8x4xf32, #tpu.memory_space<vmem>>, vector<1x8x4xf32>
    %265 = vector.shape_cast %264 : vector<1x8x4xf32> to vector<8x4xf32>
    %c2_147 = arith.constant 2 : index
    %c0_148 = arith.constant 0 : index
    %c0_149 = arith.constant 0 : index
    %266 = vector.load %arg3[%c2_147, %c0_148, %c0_149] : memref<8x8x4xf32, #tpu.memory_space<vmem>>, vector<1x8x4xf32>
    %267 = vector.shape_cast %266 : vector<1x8x4xf32> to vector<8x4xf32>
    %c0_150 = arith.constant 0 : index
    %c0_151 = arith.constant 0 : index
    %268 = vector.load %arg13[%c0_150, %c0_151] : memref<32x128xf32, #tpu.memory_space<vmem>>, vector<32x128xf32>
    %cst_152 = arith.constant dense<0.000000e+00> : vector<8x128xf32>
    %269 = tpu.matmul %240, %268, %cst_152 {dimension_numbers = #tpu.dot_dimension_numbers<[1], [0], [0], [1], [0, 0, 1, 1], [], []>} : vector<8x32xf32>, vector<32x128xf32>, vector<8x128xf32> -> vector<8x128xf32>
    %c0_153 = arith.constant 0 : index
    %c0_154 = arith.constant 0 : index
    %270 = vector.load %arg14[%c0_153, %c0_154] : memref<1x128xf32, #tpu.memory_space<vmem>>, vector<1x128xf32>
    %271 = vector.broadcast %270 : vector<1x128xf32> to vector<8x128xf32>
    %272 = arith.addf %269, %271 : vector<8x128xf32>
    %c0_155 = arith.constant 0 : index
    %c0_156 = arith.constant 0 : index
    %273 = vector.load %arg12[%c0_155, %c0_156] : memref<16x128xf32, #tpu.memory_space<vmem>>, vector<16x128xf32>
    %cst_157 = arith.constant dense<0.000000e+00> : vector<8x128xf32>
    %274 = tpu.matmul %246, %273, %cst_157 {dimension_numbers = #tpu.dot_dimension_numbers<[1], [0], [0], [1], [0, 0, 1, 1], [], []>} : vector<8x16xf32>, vector<16x128xf32>, vector<8x128xf32> -> vector<8x128xf32>
    %275 = arith.addf %272, %274 : vector<8x128xf32>
    %276 = vector.extract_strided_slice %275 {offsets = [0, 0], sizes = [8, 32], strides = [1, 1]} : vector<8x128xf32> to vector<8x32xf32>
    %277 = arith.negf %276 : vector<8x32xf32>
    %278 = math.exp %277 : vector<8x32xf32>
    %cst_158 = arith.constant 1.000000e+00 : f32
    %279 = vector.broadcast %cst_158 : f32 to vector<8x32xf32>
    %280 = arith.addf %279, %278 : vector<8x32xf32>
    %281 = arith.divf %279, %280 : vector<8x32xf32>
    %282 = vector.extract_strided_slice %275 {offsets = [0, 32], sizes = [8, 32], strides = [1, 1]} : vector<8x128xf32> to vector<8x32xf32>
    %283 = arith.negf %282 : vector<8x32xf32>
    %284 = math.exp %283 : vector<8x32xf32>
    %cst_159 = arith.constant 1.000000e+00 : f32
    %285 = vector.broadcast %cst_159 : f32 to vector<8x32xf32>
    %286 = arith.addf %285, %284 : vector<8x32xf32>
    %287 = arith.divf %285, %286 : vector<8x32xf32>
    %288 = vector.extract_strided_slice %275 {offsets = [0, 64], sizes = [8, 32], strides = [1, 1]} : vector<8x128xf32> to vector<8x32xf32>
    %289 = vector.extract_strided_slice %275 {offsets = [0, 96], sizes = [8, 32], strides = [1, 1]} : vector<8x128xf32> to vector<8x32xf32>
    %290 = arith.mulf %281, %289 : vector<8x32xf32>
    %291 = arith.addf %288, %290 : vector<8x32xf32>
    %292 = math.tanh %291 : vector<8x32xf32>
    %cst_160 = arith.constant 1.000000e+00 : f32
    %293 = vector.broadcast %cst_160 : f32 to vector<8x32xf32>
    %294 = arith.subf %293, %287 : vector<8x32xf32>
    %295 = arith.mulf %294, %292 : vector<8x32xf32>
    %296 = arith.mulf %287, %240 : vector<8x32xf32>
    %297 = arith.addf %295, %296 : vector<8x32xf32>
    %c0_161 = arith.constant 0 : index
    %c0_162 = arith.constant 0 : index
    %298 = vector.load %arg8[%c0_161, %c0_162] : memref<32x16xf32, #tpu.memory_space<vmem>>, vector<32x16xf32>
    %cst_163 = arith.constant dense<0.000000e+00> : vector<8x16xf32>
    %299 = tpu.matmul %297, %298, %cst_163 {dimension_numbers = #tpu.dot_dimension_numbers<[1], [0], [0], [1], [0, 0, 1, 1], [], []>} : vector<8x32xf32>, vector<32x16xf32>, vector<8x16xf32> -> vector<8x16xf32>
    %c0_164 = arith.constant 0 : index
    %c0_165 = arith.constant 0 : index
    %300 = vector.load %arg9[%c0_164, %c0_165] : memref<1x16xf32, #tpu.memory_space<vmem>>, vector<1x16xf32>
    %301 = vector.broadcast %300 : vector<1x16xf32> to vector<8x16xf32>
    %302 = arith.addf %299, %301 : vector<8x16xf32>
    %303 = math.tanh %302 : vector<8x16xf32>
    %c0_166 = arith.constant 0 : index
    %c0_167 = arith.constant 0 : index
    %304 = vector.load %arg10[%c0_166, %c0_167] : memref<16x8xf32, #tpu.memory_space<vmem>>, vector<16x8xf32>
    %cst_168 = arith.constant dense<0.000000e+00> : vector<8x8xf32>
    %305 = tpu.matmul %303, %304, %cst_168 {dimension_numbers = #tpu.dot_dimension_numbers<[1], [0], [0], [1], [0, 0, 1, 1], [], []>} : vector<8x16xf32>, vector<16x8xf32>, vector<8x8xf32> -> vector<8x8xf32>
    %c0_169 = arith.constant 0 : index
    %c0_170 = arith.constant 0 : index
    %306 = vector.load %arg11[%c0_169, %c0_170] : memref<1x8xf32, #tpu.memory_space<vmem>>, vector<1x8xf32>
    %307 = vector.broadcast %306 : vector<1x8xf32> to vector<8x8xf32>
    %308 = arith.addf %305, %307 : vector<8x8xf32>
    %309 = vector.extract_strided_slice %308 {offsets = [0, 0], sizes = [8, 4], strides = [1, 1]} : vector<8x8xf32> to vector<8x4xf32>
    %310 = vector.extract_strided_slice %308 {offsets = [0, 4], sizes = [8, 4], strides = [1, 1]} : vector<8x8xf32> to vector<8x4xf32>
    %311 = arith.subf %265, %309 : vector<8x4xf32>
    %312 = arith.mulf %267, %311 : vector<8x4xf32>
    %cst_171 = arith.constant 0.000000e+00 : f32
    %313 = vector.broadcast %cst_171 : f32 to vector<8x4xf32>
    %314 = arith.subf %313, %310 : vector<8x4xf32>
    %315 = math.exp %314 : vector<8x4xf32>
    %316 = arith.mulf %312, %315 : vector<8x4xf32>
    %317 = tpu.concatenate %309, %310, %312, %316 in 1 : vector<8x4xf32>, vector<8x4xf32>, vector<8x4xf32>, vector<8x4xf32> -> vector<8x16xf32>
    %c2_172 = arith.constant 2 : index
    %c0_173 = arith.constant 0 : index
    %c0_174 = arith.constant 0 : index
    %318 = vector.load %arg21[%c2_172, %c0_173, %c0_174] : memref<8x8x16xf32, #tpu.memory_space<vmem>>, vector<1x8x16xf32>
    %319 = vector.shape_cast %318 : vector<1x8x16xf32> to vector<8x16xf32>
    %320 = vector.shape_cast %317 : vector<8x16xf32> to vector<1x8x16xf32>
    tpu.vector_store %arg21[%c2_172, %c0_173, %c0_174], %320 {strides = array<i32>} : memref<8x8x16xf32, #tpu.memory_space<vmem>>, vector<1x8x16xf32>,
    %c0_175 = arith.constant 0 : index
    %c0_176 = arith.constant 0 : index
    %321 = vector.load %arg15[%c0_175, %c0_176] : memref<16x12xf32, #tpu.memory_space<vmem>>, vector<16x12xf32>
    %cst_177 = arith.constant dense<0.000000e+00> : vector<8x12xf32>
    %322 = tpu.matmul %317, %321, %cst_177 {dimension_numbers = #tpu.dot_dimension_numbers<[1], [0], [0], [1], [0, 0, 1, 1], [], []>} : vector<8x16xf32>, vector<16x12xf32>, vector<8x12xf32> -> vector<8x12xf32>
    %c0_178 = arith.constant 0 : index
    %c0_179 = arith.constant 0 : index
    %323 = vector.load %arg16[%c0_178, %c0_179] : memref<1x12xf32, #tpu.memory_space<vmem>>, vector<1x12xf32>
    %324 = vector.broadcast %323 : vector<1x12xf32> to vector<8x12xf32>
    %325 = arith.addf %322, %324 : vector<8x12xf32>
    %cst_180 = arith.constant 0.000000e+00 : f32
    %326 = vector.broadcast %cst_180 : f32 to vector<8x12xf32>
    %327 = arith.maximumf %325, %326 : vector<8x12xf32>
    %328 = tpu.concatenate %267, %267, %267 in 1 : vector<8x4xf32>, vector<8x4xf32>, vector<8x4xf32> -> vector<8x12xf32>
    %329 = arith.mulf %327, %328 : vector<8x12xf32>
    %c0_181 = arith.constant 0 : index
    %c0_182 = arith.constant 0 : index
    %330 = vector.load %arg17[%c0_181, %c0_182] : memref<12x128xf32, #tpu.memory_space<vmem>>, vector<12x128xf32>
    %cst_183 = arith.constant dense<0.000000e+00> : vector<8x128xf32>
    %331 = tpu.matmul %329, %330, %cst_183 {dimension_numbers = #tpu.dot_dimension_numbers<[1], [0], [0], [1], [0, 0, 1, 1], [], []>} : vector<8x12xf32>, vector<12x128xf32>, vector<8x128xf32> -> vector<8x128xf32>
    %c0_184 = arith.constant 0 : index
    %c0_185 = arith.constant 0 : index
    %332 = vector.load %arg18[%c0_184, %c0_185] : memref<4x128xf32, #tpu.memory_space<vmem>>, vector<4x128xf32>
    %cst_186 = arith.constant dense<0.000000e+00> : vector<8x128xf32>
    %333 = tpu.matmul %267, %332, %cst_186 {dimension_numbers = #tpu.dot_dimension_numbers<[1], [0], [0], [1], [0, 0, 1, 1], [], []>} : vector<8x4xf32>, vector<4x128xf32>, vector<8x128xf32> -> vector<8x128xf32>
    %334 = arith.addf %331, %333 : vector<8x128xf32>
    %c0_187 = arith.constant 0 : index
    %c0_188 = arith.constant 0 : index
    %335 = vector.load %arg19[%c0_187, %c0_188] : memref<32x128xf32, #tpu.memory_space<vmem>>, vector<32x128xf32>
    %cst_189 = arith.constant dense<0.000000e+00> : vector<8x128xf32>
    %336 = tpu.matmul %297, %335, %cst_189 {dimension_numbers = #tpu.dot_dimension_numbers<[1], [0], [0], [1], [0, 0, 1, 1], [], []>} : vector<8x32xf32>, vector<32x128xf32>, vector<8x128xf32> -> vector<8x128xf32>
    %337 = arith.addf %334, %336 : vector<8x128xf32>
    %c0_190 = arith.constant 0 : index
    %c0_191 = arith.constant 0 : index
    %338 = vector.load %arg20[%c0_190, %c0_191] : memref<1x128xf32, #tpu.memory_space<vmem>>, vector<1x128xf32>
    %339 = vector.broadcast %338 : vector<1x128xf32> to vector<8x128xf32>
    %340 = arith.addf %337, %339 : vector<8x128xf32>
    %341 = vector.extract_strided_slice %340 {offsets = [0, 0], sizes = [8, 32], strides = [1, 1]} : vector<8x128xf32> to vector<8x32xf32>
    %342 = arith.negf %341 : vector<8x32xf32>
    %343 = math.exp %342 : vector<8x32xf32>
    %cst_192 = arith.constant 1.000000e+00 : f32
    %344 = vector.broadcast %cst_192 : f32 to vector<8x32xf32>
    %345 = arith.addf %344, %343 : vector<8x32xf32>
    %346 = arith.divf %344, %345 : vector<8x32xf32>
    %347 = vector.extract_strided_slice %340 {offsets = [0, 32], sizes = [8, 32], strides = [1, 1]} : vector<8x128xf32> to vector<8x32xf32>
    %348 = arith.negf %347 : vector<8x32xf32>
    %349 = math.exp %348 : vector<8x32xf32>
    %cst_193 = arith.constant 1.000000e+00 : f32
    %350 = vector.broadcast %cst_193 : f32 to vector<8x32xf32>
    %351 = arith.addf %350, %349 : vector<8x32xf32>
    %352 = arith.divf %350, %351 : vector<8x32xf32>
    %353 = vector.extract_strided_slice %340 {offsets = [0, 64], sizes = [8, 32], strides = [1, 1]} : vector<8x128xf32> to vector<8x32xf32>
    %354 = vector.extract_strided_slice %340 {offsets = [0, 96], sizes = [8, 32], strides = [1, 1]} : vector<8x128xf32> to vector<8x32xf32>
    %355 = arith.mulf %346, %354 : vector<8x32xf32>
    %356 = arith.addf %353, %355 : vector<8x32xf32>
    %357 = math.tanh %356 : vector<8x32xf32>
    %cst_194 = arith.constant 1.000000e+00 : f32
    %358 = vector.broadcast %cst_194 : f32 to vector<8x32xf32>
    %359 = arith.subf %358, %352 : vector<8x32xf32>
    %360 = arith.mulf %359, %357 : vector<8x32xf32>
    %361 = arith.mulf %352, %297 : vector<8x32xf32>
    %362 = arith.addf %360, %361 : vector<8x32xf32>
    %c0_195 = arith.constant 0 : index
    %c0_196 = arith.constant 0 : index
    %363 = vector.load %arg8[%c0_195, %c0_196] : memref<32x16xf32, #tpu.memory_space<vmem>>, vector<32x16xf32>
    %cst_197 = arith.constant dense<0.000000e+00> : vector<8x16xf32>
    %364 = tpu.matmul %362, %363, %cst_197 {dimension_numbers = #tpu.dot_dimension_numbers<[1], [0], [0], [1], [0, 0, 1, 1], [], []>} : vector<8x32xf32>, vector<32x16xf32>, vector<8x16xf32> -> vector<8x16xf32>
    %c0_198 = arith.constant 0 : index
    %c0_199 = arith.constant 0 : index
    %365 = vector.load %arg9[%c0_198, %c0_199] : memref<1x16xf32, #tpu.memory_space<vmem>>, vector<1x16xf32>
    %366 = vector.broadcast %365 : vector<1x16xf32> to vector<8x16xf32>
    %367 = arith.addf %364, %366 : vector<8x16xf32>
    %368 = math.tanh %367 : vector<8x16xf32>
    %c0_200 = arith.constant 0 : index
    %c0_201 = arith.constant 0 : index
    %369 = vector.load %arg10[%c0_200, %c0_201] : memref<16x8xf32, #tpu.memory_space<vmem>>, vector<16x8xf32>
    %cst_202 = arith.constant dense<0.000000e+00> : vector<8x8xf32>
    %370 = tpu.matmul %368, %369, %cst_202 {dimension_numbers = #tpu.dot_dimension_numbers<[1], [0], [0], [1], [0, 0, 1, 1], [], []>} : vector<8x16xf32>, vector<16x8xf32>, vector<8x8xf32> -> vector<8x8xf32>
    %c0_203 = arith.constant 0 : index
    %c0_204 = arith.constant 0 : index
    %371 = vector.load %arg11[%c0_203, %c0_204] : memref<1x8xf32, #tpu.memory_space<vmem>>, vector<1x8xf32>
    %372 = vector.broadcast %371 : vector<1x8xf32> to vector<8x8xf32>
    %373 = arith.addf %370, %372 : vector<8x8xf32>
    %374 = vector.extract_strided_slice %373 {offsets = [0, 0], sizes = [8, 4], strides = [1, 1]} : vector<8x8xf32> to vector<8x4xf32>
    %375 = vector.extract_strided_slice %373 {offsets = [0, 4], sizes = [8, 4], strides = [1, 1]} : vector<8x8xf32> to vector<8x4xf32>
    %376 = arith.subf %265, %374 : vector<8x4xf32>
    %377 = arith.mulf %267, %376 : vector<8x4xf32>
    %cst_205 = arith.constant 0.000000e+00 : f32
    %378 = vector.broadcast %cst_205 : f32 to vector<8x4xf32>
    %379 = arith.subf %378, %375 : vector<8x4xf32>
    %380 = math.exp %379 : vector<8x4xf32>
    %381 = arith.mulf %377, %380 : vector<8x4xf32>
    %382 = tpu.concatenate %374, %375, %377, %381 in 1 : vector<8x4xf32>, vector<8x4xf32>, vector<8x4xf32>, vector<8x4xf32> -> vector<8x16xf32>
    %c2_206 = arith.constant 2 : index
    %c0_207 = arith.constant 0 : index
    %c0_208 = arith.constant 0 : index
    %383 = vector.load %arg22[%c2_206, %c0_207, %c0_208] : memref<5x8x16xf32, #tpu.memory_space<vmem>>, vector<1x8x16xf32>
    %384 = vector.shape_cast %383 : vector<1x8x16xf32> to vector<8x16xf32>
    %385 = vector.shape_cast %382 : vector<8x16xf32> to vector<1x8x16xf32>
    tpu.vector_store %arg22[%c2_206, %c0_207, %c0_208], %385 {strides = array<i32>} : memref<5x8x16xf32, #tpu.memory_space<vmem>>, vector<1x8x16xf32>,
    %c3 = arith.constant 3 : index
    %c0_209 = arith.constant 0 : index
    %c0_210 = arith.constant 0 : index
    %386 = vector.load %arg2[%c3, %c0_209, %c0_210] : memref<8x8x4xf32, #tpu.memory_space<vmem>>, vector<1x8x4xf32>
    %387 = vector.shape_cast %386 : vector<1x8x4xf32> to vector<8x4xf32>
    %c3_211 = arith.constant 3 : index
    %c0_212 = arith.constant 0 : index
    %c0_213 = arith.constant 0 : index
    %388 = vector.load %arg3[%c3_211, %c0_212, %c0_213] : memref<8x8x4xf32, #tpu.memory_space<vmem>>, vector<1x8x4xf32>
    %389 = vector.shape_cast %388 : vector<1x8x4xf32> to vector<8x4xf32>
    %c0_214 = arith.constant 0 : index
    %c0_215 = arith.constant 0 : index
    %390 = vector.load %arg13[%c0_214, %c0_215] : memref<32x128xf32, #tpu.memory_space<vmem>>, vector<32x128xf32>
    %cst_216 = arith.constant dense<0.000000e+00> : vector<8x128xf32>
    %391 = tpu.matmul %362, %390, %cst_216 {dimension_numbers = #tpu.dot_dimension_numbers<[1], [0], [0], [1], [0, 0, 1, 1], [], []>} : vector<8x32xf32>, vector<32x128xf32>, vector<8x128xf32> -> vector<8x128xf32>
    %c0_217 = arith.constant 0 : index
    %c0_218 = arith.constant 0 : index
    %392 = vector.load %arg14[%c0_217, %c0_218] : memref<1x128xf32, #tpu.memory_space<vmem>>, vector<1x128xf32>
    %393 = vector.broadcast %392 : vector<1x128xf32> to vector<8x128xf32>
    %394 = arith.addf %391, %393 : vector<8x128xf32>
    %c0_219 = arith.constant 0 : index
    %c0_220 = arith.constant 0 : index
    %395 = vector.load %arg12[%c0_219, %c0_220] : memref<16x128xf32, #tpu.memory_space<vmem>>, vector<16x128xf32>
    %cst_221 = arith.constant dense<0.000000e+00> : vector<8x128xf32>
    %396 = tpu.matmul %368, %395, %cst_221 {dimension_numbers = #tpu.dot_dimension_numbers<[1], [0], [0], [1], [0, 0, 1, 1], [], []>} : vector<8x16xf32>, vector<16x128xf32>, vector<8x128xf32> -> vector<8x128xf32>
    %397 = arith.addf %394, %396 : vector<8x128xf32>
    %398 = vector.extract_strided_slice %397 {offsets = [0, 0], sizes = [8, 32], strides = [1, 1]} : vector<8x128xf32> to vector<8x32xf32>
    %399 = arith.negf %398 : vector<8x32xf32>
    %400 = math.exp %399 : vector<8x32xf32>
    %cst_222 = arith.constant 1.000000e+00 : f32
    %401 = vector.broadcast %cst_222 : f32 to vector<8x32xf32>
    %402 = arith.addf %401, %400 : vector<8x32xf32>
    %403 = arith.divf %401, %402 : vector<8x32xf32>
    %404 = vector.extract_strided_slice %397 {offsets = [0, 32], sizes = [8, 32], strides = [1, 1]} : vector<8x128xf32> to vector<8x32xf32>
    %405 = arith.negf %404 : vector<8x32xf32>
    %406 = math.exp %405 : vector<8x32xf32>
    %cst_223 = arith.constant 1.000000e+00 : f32
    %407 = vector.broadcast %cst_223 : f32 to vector<8x32xf32>
    %408 = arith.addf %407, %406 : vector<8x32xf32>
    %409 = arith.divf %407, %408 : vector<8x32xf32>
    %410 = vector.extract_strided_slice %397 {offsets = [0, 64], sizes = [8, 32], strides = [1, 1]} : vector<8x128xf32> to vector<8x32xf32>
    %411 = vector.extract_strided_slice %397 {offsets = [0, 96], sizes = [8, 32], strides = [1, 1]} : vector<8x128xf32> to vector<8x32xf32>
    %412 = arith.mulf %403, %411 : vector<8x32xf32>
    %413 = arith.addf %410, %412 : vector<8x32xf32>
    %414 = math.tanh %413 : vector<8x32xf32>
    %cst_224 = arith.constant 1.000000e+00 : f32
    %415 = vector.broadcast %cst_224 : f32 to vector<8x32xf32>
    %416 = arith.subf %415, %409 : vector<8x32xf32>
    %417 = arith.mulf %416, %414 : vector<8x32xf32>
    %418 = arith.mulf %409, %362 : vector<8x32xf32>
    %419 = arith.addf %417, %418 : vector<8x32xf32>
    %c0_225 = arith.constant 0 : index
    %c0_226 = arith.constant 0 : index
    %420 = vector.load %arg8[%c0_225, %c0_226] : memref<32x16xf32, #tpu.memory_space<vmem>>, vector<32x16xf32>
    %cst_227 = arith.constant dense<0.000000e+00> : vector<8x16xf32>
    %421 = tpu.matmul %419, %420, %cst_227 {dimension_numbers = #tpu.dot_dimension_numbers<[1], [0], [0], [1], [0, 0, 1, 1], [], []>} : vector<8x32xf32>, vector<32x16xf32>, vector<8x16xf32> -> vector<8x16xf32>
    %c0_228 = arith.constant 0 : index
    %c0_229 = arith.constant 0 : index
    %422 = vector.load %arg9[%c0_228, %c0_229] : memref<1x16xf32, #tpu.memory_space<vmem>>, vector<1x16xf32>
    %423 = vector.broadcast %422 : vector<1x16xf32> to vector<8x16xf32>
    %424 = arith.addf %421, %423 : vector<8x16xf32>
    %425 = math.tanh %424 : vector<8x16xf32>
    %c0_230 = arith.constant 0 : index
    %c0_231 = arith.constant 0 : index
    %426 = vector.load %arg10[%c0_230, %c0_231] : memref<16x8xf32, #tpu.memory_space<vmem>>, vector<16x8xf32>
    %cst_232 = arith.constant dense<0.000000e+00> : vector<8x8xf32>
    %427 = tpu.matmul %425, %426, %cst_232 {dimension_numbers = #tpu.dot_dimension_numbers<[1], [0], [0], [1], [0, 0, 1, 1], [], []>} : vector<8x16xf32>, vector<16x8xf32>, vector<8x8xf32> -> vector<8x8xf32>
    %c0_233 = arith.constant 0 : index
    %c0_234 = arith.constant 0 : index
    %428 = vector.load %arg11[%c0_233, %c0_234] : memref<1x8xf32, #tpu.memory_space<vmem>>, vector<1x8xf32>
    %429 = vector.broadcast %428 : vector<1x8xf32> to vector<8x8xf32>
    %430 = arith.addf %427, %429 : vector<8x8xf32>
    %431 = vector.extract_strided_slice %430 {offsets = [0, 0], sizes = [8, 4], strides = [1, 1]} : vector<8x8xf32> to vector<8x4xf32>
    %432 = vector.extract_strided_slice %430 {offsets = [0, 4], sizes = [8, 4], strides = [1, 1]} : vector<8x8xf32> to vector<8x4xf32>
    %433 = arith.subf %387, %431 : vector<8x4xf32>
    %434 = arith.mulf %389, %433 : vector<8x4xf32>
    %cst_235 = arith.constant 0.000000e+00 : f32
    %435 = vector.broadcast %cst_235 : f32 to vector<8x4xf32>
    %436 = arith.subf %435, %432 : vector<8x4xf32>
    %437 = math.exp %436 : vector<8x4xf32>
    %438 = arith.mulf %434, %437 : vector<8x4xf32>
    %439 = tpu.concatenate %431, %432, %434, %438 in 1 : vector<8x4xf32>, vector<8x4xf32>, vector<8x4xf32>, vector<8x4xf32> -> vector<8x16xf32>
    %c3_236 = arith.constant 3 : index
    %c0_237 = arith.constant 0 : index
    %c0_238 = arith.constant 0 : index
    %440 = vector.load %arg21[%c3_236, %c0_237, %c0_238] : memref<8x8x16xf32, #tpu.memory_space<vmem>>, vector<1x8x16xf32>
    %441 = vector.shape_cast %440 : vector<1x8x16xf32> to vector<8x16xf32>
    %442 = vector.shape_cast %439 : vector<8x16xf32> to vector<1x8x16xf32>
    tpu.vector_store %arg21[%c3_236, %c0_237, %c0_238], %442 {strides = array<i32>} : memref<8x8x16xf32, #tpu.memory_space<vmem>>, vector<1x8x16xf32>,
    %c0_239 = arith.constant 0 : index
    %c0_240 = arith.constant 0 : index
    %443 = vector.load %arg15[%c0_239, %c0_240] : memref<16x12xf32, #tpu.memory_space<vmem>>, vector<16x12xf32>
    %cst_241 = arith.constant dense<0.000000e+00> : vector<8x12xf32>
    %444 = tpu.matmul %439, %443, %cst_241 {dimension_numbers = #tpu.dot_dimension_numbers<[1], [0], [0], [1], [0, 0, 1, 1], [], []>} : vector<8x16xf32>, vector<16x12xf32>, vector<8x12xf32> -> vector<8x12xf32>
    %c0_242 = arith.constant 0 : index
    %c0_243 = arith.constant 0 : index
    %445 = vector.load %arg16[%c0_242, %c0_243] : memref<1x12xf32, #tpu.memory_space<vmem>>, vector<1x12xf32>
    %446 = vector.broadcast %445 : vector<1x12xf32> to vector<8x12xf32>
    %447 = arith.addf %444, %446 : vector<8x12xf32>
    %cst_244 = arith.constant 0.000000e+00 : f32
    %448 = vector.broadcast %cst_244 : f32 to vector<8x12xf32>
    %449 = arith.maximumf %447, %448 : vector<8x12xf32>
    %450 = tpu.concatenate %389, %389, %389 in 1 : vector<8x4xf32>, vector<8x4xf32>, vector<8x4xf32> -> vector<8x12xf32>
    %451 = arith.mulf %449, %450 : vector<8x12xf32>
    %c0_245 = arith.constant 0 : index
    %c0_246 = arith.constant 0 : index
    %452 = vector.load %arg17[%c0_245, %c0_246] : memref<12x128xf32, #tpu.memory_space<vmem>>, vector<12x128xf32>
    %cst_247 = arith.constant dense<0.000000e+00> : vector<8x128xf32>
    %453 = tpu.matmul %451, %452, %cst_247 {dimension_numbers = #tpu.dot_dimension_numbers<[1], [0], [0], [1], [0, 0, 1, 1], [], []>} : vector<8x12xf32>, vector<12x128xf32>, vector<8x128xf32> -> vector<8x128xf32>
    %c0_248 = arith.constant 0 : index
    %c0_249 = arith.constant 0 : index
    %454 = vector.load %arg18[%c0_248, %c0_249] : memref<4x128xf32, #tpu.memory_space<vmem>>, vector<4x128xf32>
    %cst_250 = arith.constant dense<0.000000e+00> : vector<8x128xf32>
    %455 = tpu.matmul %389, %454, %cst_250 {dimension_numbers = #tpu.dot_dimension_numbers<[1], [0], [0], [1], [0, 0, 1, 1], [], []>} : vector<8x4xf32>, vector<4x128xf32>, vector<8x128xf32> -> vector<8x128xf32>
    %456 = arith.addf %453, %455 : vector<8x128xf32>
    %c0_251 = arith.constant 0 : index
    %c0_252 = arith.constant 0 : index
    %457 = vector.load %arg19[%c0_251, %c0_252] : memref<32x128xf32, #tpu.memory_space<vmem>>, vector<32x128xf32>
    %cst_253 = arith.constant dense<0.000000e+00> : vector<8x128xf32>
    %458 = tpu.matmul %419, %457, %cst_253 {dimension_numbers = #tpu.dot_dimension_numbers<[1], [0], [0], [1], [0, 0, 1, 1], [], []>} : vector<8x32xf32>, vector<32x128xf32>, vector<8x128xf32> -> vector<8x128xf32>
    %459 = arith.addf %456, %458 : vector<8x128xf32>
    %c0_254 = arith.constant 0 : index
    %c0_255 = arith.constant 0 : index
    %460 = vector.load %arg20[%c0_254, %c0_255] : memref<1x128xf32, #tpu.memory_space<vmem>>, vector<1x128xf32>
    %461 = vector.broadcast %460 : vector<1x128xf32> to vector<8x128xf32>
    %462 = arith.addf %459, %461 : vector<8x128xf32>
    %463 = vector.extract_strided_slice %462 {offsets = [0, 0], sizes = [8, 32], strides = [1, 1]} : vector<8x128xf32> to vector<8x32xf32>
    %464 = arith.negf %463 : vector<8x32xf32>
    %465 = math.exp %464 : vector<8x32xf32>
    %cst_256 = arith.constant 1.000000e+00 : f32
    %466 = vector.broadcast %cst_256 : f32 to vector<8x32xf32>
    %467 = arith.addf %466, %465 : vector<8x32xf32>
    %468 = arith.divf %466, %467 : vector<8x32xf32>
    %469 = vector.extract_strided_slice %462 {offsets = [0, 32], sizes = [8, 32], strides = [1, 1]} : vector<8x128xf32> to vector<8x32xf32>
    %470 = arith.negf %469 : vector<8x32xf32>
    %471 = math.exp %470 : vector<8x32xf32>
    %cst_257 = arith.constant 1.000000e+00 : f32
    %472 = vector.broadcast %cst_257 : f32 to vector<8x32xf32>
    %473 = arith.addf %472, %471 : vector<8x32xf32>
    %474 = arith.divf %472, %473 : vector<8x32xf32>
    %475 = vector.extract_strided_slice %462 {offsets = [0, 64], sizes = [8, 32], strides = [1, 1]} : vector<8x128xf32> to vector<8x32xf32>
    %476 = vector.extract_strided_slice %462 {offsets = [0, 96], sizes = [8, 32], strides = [1, 1]} : vector<8x128xf32> to vector<8x32xf32>
    %477 = arith.mulf %468, %476 : vector<8x32xf32>
    %478 = arith.addf %475, %477 : vector<8x32xf32>
    %479 = math.tanh %478 : vector<8x32xf32>
    %cst_258 = arith.constant 1.000000e+00 : f32
    %480 = vector.broadcast %cst_258 : f32 to vector<8x32xf32>
    %481 = arith.subf %480, %474 : vector<8x32xf32>
    %482 = arith.mulf %481, %479 : vector<8x32xf32>
    %483 = arith.mulf %474, %419 : vector<8x32xf32>
    %484 = arith.addf %482, %483 : vector<8x32xf32>
    %c0_259 = arith.constant 0 : index
    %c0_260 = arith.constant 0 : index
    %485 = vector.load %arg8[%c0_259, %c0_260] : memref<32x16xf32, #tpu.memory_space<vmem>>, vector<32x16xf32>
    %cst_261 = arith.constant dense<0.000000e+00> : vector<8x16xf32>
    %486 = tpu.matmul %484, %485, %cst_261 {dimension_numbers = #tpu.dot_dimension_numbers<[1], [0], [0], [1], [0, 0, 1, 1], [], []>} : vector<8x32xf32>, vector<32x16xf32>, vector<8x16xf32> -> vector<8x16xf32>
    %c0_262 = arith.constant 0 : index
    %c0_263 = arith.constant 0 : index
    %487 = vector.load %arg9[%c0_262, %c0_263] : memref<1x16xf32, #tpu.memory_space<vmem>>, vector<1x16xf32>
    %488 = vector.broadcast %487 : vector<1x16xf32> to vector<8x16xf32>
    %489 = arith.addf %486, %488 : vector<8x16xf32>
    %490 = math.tanh %489 : vector<8x16xf32>
    %c0_264 = arith.constant 0 : index
    %c0_265 = arith.constant 0 : index
    %491 = vector.load %arg10[%c0_264, %c0_265] : memref<16x8xf32, #tpu.memory_space<vmem>>, vector<16x8xf32>
    %cst_266 = arith.constant dense<0.000000e+00> : vector<8x8xf32>
    %492 = tpu.matmul %490, %491, %cst_266 {dimension_numbers = #tpu.dot_dimension_numbers<[1], [0], [0], [1], [0, 0, 1, 1], [], []>} : vector<8x16xf32>, vector<16x8xf32>, vector<8x8xf32> -> vector<8x8xf32>
    %c0_267 = arith.constant 0 : index
    %c0_268 = arith.constant 0 : index
    %493 = vector.load %arg11[%c0_267, %c0_268] : memref<1x8xf32, #tpu.memory_space<vmem>>, vector<1x8xf32>
    %494 = vector.broadcast %493 : vector<1x8xf32> to vector<8x8xf32>
    %495 = arith.addf %492, %494 : vector<8x8xf32>
    %496 = vector.extract_strided_slice %495 {offsets = [0, 0], sizes = [8, 4], strides = [1, 1]} : vector<8x8xf32> to vector<8x4xf32>
    %497 = vector.extract_strided_slice %495 {offsets = [0, 4], sizes = [8, 4], strides = [1, 1]} : vector<8x8xf32> to vector<8x4xf32>
    %498 = arith.subf %387, %496 : vector<8x4xf32>
    %499 = arith.mulf %389, %498 : vector<8x4xf32>
    %cst_269 = arith.constant 0.000000e+00 : f32
    %500 = vector.broadcast %cst_269 : f32 to vector<8x4xf32>
    %501 = arith.subf %500, %497 : vector<8x4xf32>
    %502 = math.exp %501 : vector<8x4xf32>
    %503 = arith.mulf %499, %502 : vector<8x4xf32>
    %504 = tpu.concatenate %496, %497, %499, %503 in 1 : vector<8x4xf32>, vector<8x4xf32>, vector<8x4xf32>, vector<8x4xf32> -> vector<8x16xf32>
    %c3_270 = arith.constant 3 : index
    %c0_271 = arith.constant 0 : index
    %c0_272 = arith.constant 0 : index
    %505 = vector.load %arg22[%c3_270, %c0_271, %c0_272] : memref<5x8x16xf32, #tpu.memory_space<vmem>>, vector<1x8x16xf32>
    %506 = vector.shape_cast %505 : vector<1x8x16xf32> to vector<8x16xf32>
    %507 = vector.shape_cast %504 : vector<8x16xf32> to vector<1x8x16xf32>
    tpu.vector_store %arg22[%c3_270, %c0_271, %c0_272], %507 {strides = array<i32>} : memref<5x8x16xf32, #tpu.memory_space<vmem>>, vector<1x8x16xf32>,
    %c4 = arith.constant 4 : index
    %c0_273 = arith.constant 0 : index
    %c0_274 = arith.constant 0 : index
    %508 = vector.load %arg2[%c4, %c0_273, %c0_274] : memref<8x8x4xf32, #tpu.memory_space<vmem>>, vector<1x8x4xf32>
    %509 = vector.shape_cast %508 : vector<1x8x4xf32> to vector<8x4xf32>
    %c4_275 = arith.constant 4 : index
    %c0_276 = arith.constant 0 : index
    %c0_277 = arith.constant 0 : index
    %510 = vector.load %arg3[%c4_275, %c0_276, %c0_277] : memref<8x8x4xf32, #tpu.memory_space<vmem>>, vector<1x8x4xf32>
    %511 = vector.shape_cast %510 : vector<1x8x4xf32> to vector<8x4xf32>
    %c0_278 = arith.constant 0 : index
    %c0_279 = arith.constant 0 : index
    %512 = vector.load %arg13[%c0_278, %c0_279] : memref<32x128xf32, #tpu.memory_space<vmem>>, vector<32x128xf32>
    %cst_280 = arith.constant dense<0.000000e+00> : vector<8x128xf32>
    %513 = tpu.matmul %484, %512, %cst_280 {dimension_numbers = #tpu.dot_dimension_numbers<[1], [0], [0], [1], [0, 0, 1, 1], [], []>} : vector<8x32xf32>, vector<32x128xf32>, vector<8x128xf32> -> vector<8x128xf32>
    %c0_281 = arith.constant 0 : index
    %c0_282 = arith.constant 0 : index
    %514 = vector.load %arg14[%c0_281, %c0_282] : memref<1x128xf32, #tpu.memory_space<vmem>>, vector<1x128xf32>
    %515 = vector.broadcast %514 : vector<1x128xf32> to vector<8x128xf32>
    %516 = arith.addf %513, %515 : vector<8x128xf32>
    %c0_283 = arith.constant 0 : index
    %c0_284 = arith.constant 0 : index
    %517 = vector.load %arg12[%c0_283, %c0_284] : memref<16x128xf32, #tpu.memory_space<vmem>>, vector<16x128xf32>
    %cst_285 = arith.constant dense<0.000000e+00> : vector<8x128xf32>
    %518 = tpu.matmul %490, %517, %cst_285 {dimension_numbers = #tpu.dot_dimension_numbers<[1], [0], [0], [1], [0, 0, 1, 1], [], []>} : vector<8x16xf32>, vector<16x128xf32>, vector<8x128xf32> -> vector<8x128xf32>
    %519 = arith.addf %516, %518 : vector<8x128xf32>
    %520 = vector.extract_strided_slice %519 {offsets = [0, 0], sizes = [8, 32], strides = [1, 1]} : vector<8x128xf32> to vector<8x32xf32>
    %521 = arith.negf %520 : vector<8x32xf32>
    %522 = math.exp %521 : vector<8x32xf32>
    %cst_286 = arith.constant 1.000000e+00 : f32
    %523 = vector.broadcast %cst_286 : f32 to vector<8x32xf32>
    %524 = arith.addf %523, %522 : vector<8x32xf32>
    %525 = arith.divf %523, %524 : vector<8x32xf32>
    %526 = vector.extract_strided_slice %519 {offsets = [0, 32], sizes = [8, 32], strides = [1, 1]} : vector<8x128xf32> to vector<8x32xf32>
    %527 = arith.negf %526 : vector<8x32xf32>
    %528 = math.exp %527 : vector<8x32xf32>
    %cst_287 = arith.constant 1.000000e+00 : f32
    %529 = vector.broadcast %cst_287 : f32 to vector<8x32xf32>
    %530 = arith.addf %529, %528 : vector<8x32xf32>
    %531 = arith.divf %529, %530 : vector<8x32xf32>
    %532 = vector.extract_strided_slice %519 {offsets = [0, 64], sizes = [8, 32], strides = [1, 1]} : vector<8x128xf32> to vector<8x32xf32>
    %533 = vector.extract_strided_slice %519 {offsets = [0, 96], sizes = [8, 32], strides = [1, 1]} : vector<8x128xf32> to vector<8x32xf32>
    %534 = arith.mulf %525, %533 : vector<8x32xf32>
    %535 = arith.addf %532, %534 : vector<8x32xf32>
    %536 = math.tanh %535 : vector<8x32xf32>
    %cst_288 = arith.constant 1.000000e+00 : f32
    %537 = vector.broadcast %cst_288 : f32 to vector<8x32xf32>
    %538 = arith.subf %537, %531 : vector<8x32xf32>
    %539 = arith.mulf %538, %536 : vector<8x32xf32>
    %540 = arith.mulf %531, %484 : vector<8x32xf32>
    %541 = arith.addf %539, %540 : vector<8x32xf32>
    %c0_289 = arith.constant 0 : index
    %c0_290 = arith.constant 0 : index
    %542 = vector.load %arg8[%c0_289, %c0_290] : memref<32x16xf32, #tpu.memory_space<vmem>>, vector<32x16xf32>
    %cst_291 = arith.constant dense<0.000000e+00> : vector<8x16xf32>
    %543 = tpu.matmul %541, %542, %cst_291 {dimension_numbers = #tpu.dot_dimension_numbers<[1], [0], [0], [1], [0, 0, 1, 1], [], []>} : vector<8x32xf32>, vector<32x16xf32>, vector<8x16xf32> -> vector<8x16xf32>
    %c0_292 = arith.constant 0 : index
    %c0_293 = arith.constant 0 : index
    %544 = vector.load %arg9[%c0_292, %c0_293] : memref<1x16xf32, #tpu.memory_space<vmem>>, vector<1x16xf32>
    %545 = vector.broadcast %544 : vector<1x16xf32> to vector<8x16xf32>
    %546 = arith.addf %543, %545 : vector<8x16xf32>
    %547 = math.tanh %546 : vector<8x16xf32>
    %c0_294 = arith.constant 0 : index
    %c0_295 = arith.constant 0 : index
    %548 = vector.load %arg10[%c0_294, %c0_295] : memref<16x8xf32, #tpu.memory_space<vmem>>, vector<16x8xf32>
    %cst_296 = arith.constant dense<0.000000e+00> : vector<8x8xf32>
    %549 = tpu.matmul %547, %548, %cst_296 {dimension_numbers = #tpu.dot_dimension_numbers<[1], [0], [0], [1], [0, 0, 1, 1], [], []>} : vector<8x16xf32>, vector<16x8xf32>, vector<8x8xf32> -> vector<8x8xf32>
    %c0_297 = arith.constant 0 : index
    %c0_298 = arith.constant 0 : index
    %550 = vector.load %arg11[%c0_297, %c0_298] : memref<1x8xf32, #tpu.memory_space<vmem>>, vector<1x8xf32>
    %551 = vector.broadcast %550 : vector<1x8xf32> to vector<8x8xf32>
    %552 = arith.addf %549, %551 : vector<8x8xf32>
    %553 = vector.extract_strided_slice %552 {offsets = [0, 0], sizes = [8, 4], strides = [1, 1]} : vector<8x8xf32> to vector<8x4xf32>
    %554 = vector.extract_strided_slice %552 {offsets = [0, 4], sizes = [8, 4], strides = [1, 1]} : vector<8x8xf32> to vector<8x4xf32>
    %555 = arith.subf %509, %553 : vector<8x4xf32>
    %556 = arith.mulf %511, %555 : vector<8x4xf32>
    %cst_299 = arith.constant 0.000000e+00 : f32
    %557 = vector.broadcast %cst_299 : f32 to vector<8x4xf32>
    %558 = arith.subf %557, %554 : vector<8x4xf32>
    %559 = math.exp %558 : vector<8x4xf32>
    %560 = arith.mulf %556, %559 : vector<8x4xf32>
    %561 = tpu.concatenate %553, %554, %556, %560 in 1 : vector<8x4xf32>, vector<8x4xf32>, vector<8x4xf32>, vector<8x4xf32> -> vector<8x16xf32>
    %c4_300 = arith.constant 4 : index
    %c0_301 = arith.constant 0 : index
    %c0_302 = arith.constant 0 : index
    %562 = vector.load %arg21[%c4_300, %c0_301, %c0_302] : memref<8x8x16xf32, #tpu.memory_space<vmem>>, vector<1x8x16xf32>
    %563 = vector.shape_cast %562 : vector<1x8x16xf32> to vector<8x16xf32>
    %564 = vector.shape_cast %561 : vector<8x16xf32> to vector<1x8x16xf32>
    tpu.vector_store %arg21[%c4_300, %c0_301, %c0_302], %564 {strides = array<i32>} : memref<8x8x16xf32, #tpu.memory_space<vmem>>, vector<1x8x16xf32>,
    %c0_303 = arith.constant 0 : index
    %c0_304 = arith.constant 0 : index
    %565 = vector.load %arg15[%c0_303, %c0_304] : memref<16x12xf32, #tpu.memory_space<vmem>>, vector<16x12xf32>
    %cst_305 = arith.constant dense<0.000000e+00> : vector<8x12xf32>
    %566 = tpu.matmul %561, %565, %cst_305 {dimension_numbers = #tpu.dot_dimension_numbers<[1], [0], [0], [1], [0, 0, 1, 1], [], []>} : vector<8x16xf32>, vector<16x12xf32>, vector<8x12xf32> -> vector<8x12xf32>
    %c0_306 = arith.constant 0 : index
    %c0_307 = arith.constant 0 : index
    %567 = vector.load %arg16[%c0_306, %c0_307] : memref<1x12xf32, #tpu.memory_space<vmem>>, vector<1x12xf32>
    %568 = vector.broadcast %567 : vector<1x12xf32> to vector<8x12xf32>
    %569 = arith.addf %566, %568 : vector<8x12xf32>
    %cst_308 = arith.constant 0.000000e+00 : f32
    %570 = vector.broadcast %cst_308 : f32 to vector<8x12xf32>
    %571 = arith.maximumf %569, %570 : vector<8x12xf32>
    %572 = tpu.concatenate %511, %511, %511 in 1 : vector<8x4xf32>, vector<8x4xf32>, vector<8x4xf32> -> vector<8x12xf32>
    %573 = arith.mulf %571, %572 : vector<8x12xf32>
    %c0_309 = arith.constant 0 : index
    %c0_310 = arith.constant 0 : index
    %574 = vector.load %arg17[%c0_309, %c0_310] : memref<12x128xf32, #tpu.memory_space<vmem>>, vector<12x128xf32>
    %cst_311 = arith.constant dense<0.000000e+00> : vector<8x128xf32>
    %575 = tpu.matmul %573, %574, %cst_311 {dimension_numbers = #tpu.dot_dimension_numbers<[1], [0], [0], [1], [0, 0, 1, 1], [], []>} : vector<8x12xf32>, vector<12x128xf32>, vector<8x128xf32> -> vector<8x128xf32>
    %c0_312 = arith.constant 0 : index
    %c0_313 = arith.constant 0 : index
    %576 = vector.load %arg18[%c0_312, %c0_313] : memref<4x128xf32, #tpu.memory_space<vmem>>, vector<4x128xf32>
    %cst_314 = arith.constant dense<0.000000e+00> : vector<8x128xf32>
    %577 = tpu.matmul %511, %576, %cst_314 {dimension_numbers = #tpu.dot_dimension_numbers<[1], [0], [0], [1], [0, 0, 1, 1], [], []>} : vector<8x4xf32>, vector<4x128xf32>, vector<8x128xf32> -> vector<8x128xf32>
    %578 = arith.addf %575, %577 : vector<8x128xf32>
    %c0_315 = arith.constant 0 : index
    %c0_316 = arith.constant 0 : index
    %579 = vector.load %arg19[%c0_315, %c0_316] : memref<32x128xf32, #tpu.memory_space<vmem>>, vector<32x128xf32>
    %cst_317 = arith.constant dense<0.000000e+00> : vector<8x128xf32>
    %580 = tpu.matmul %541, %579, %cst_317 {dimension_numbers = #tpu.dot_dimension_numbers<[1], [0], [0], [1], [0, 0, 1, 1], [], []>} : vector<8x32xf32>, vector<32x128xf32>, vector<8x128xf32> -> vector<8x128xf32>
    %581 = arith.addf %578, %580 : vector<8x128xf32>
    %c0_318 = arith.constant 0 : index
    %c0_319 = arith.constant 0 : index
    %582 = vector.load %arg20[%c0_318, %c0_319] : memref<1x128xf32, #tpu.memory_space<vmem>>, vector<1x128xf32>
    %583 = vector.broadcast %582 : vector<1x128xf32> to vector<8x128xf32>
    %584 = arith.addf %581, %583 : vector<8x128xf32>
    %585 = vector.extract_strided_slice %584 {offsets = [0, 0], sizes = [8, 32], strides = [1, 1]} : vector<8x128xf32> to vector<8x32xf32>
    %586 = arith.negf %585 : vector<8x32xf32>
    %587 = math.exp %586 : vector<8x32xf32>
    %cst_320 = arith.constant 1.000000e+00 : f32
    %588 = vector.broadcast %cst_320 : f32 to vector<8x32xf32>
    %589 = arith.addf %588, %587 : vector<8x32xf32>
    %590 = arith.divf %588, %589 : vector<8x32xf32>
    %591 = vector.extract_strided_slice %584 {offsets = [0, 32], sizes = [8, 32], strides = [1, 1]} : vector<8x128xf32> to vector<8x32xf32>
    %592 = arith.negf %591 : vector<8x32xf32>
    %593 = math.exp %592 : vector<8x32xf32>
    %cst_321 = arith.constant 1.000000e+00 : f32
    %594 = vector.broadcast %cst_321 : f32 to vector<8x32xf32>
    %595 = arith.addf %594, %593 : vector<8x32xf32>
    %596 = arith.divf %594, %595 : vector<8x32xf32>
    %597 = vector.extract_strided_slice %584 {offsets = [0, 64], sizes = [8, 32], strides = [1, 1]} : vector<8x128xf32> to vector<8x32xf32>
    %598 = vector.extract_strided_slice %584 {offsets = [0, 96], sizes = [8, 32], strides = [1, 1]} : vector<8x128xf32> to vector<8x32xf32>
    %599 = arith.mulf %590, %598 : vector<8x32xf32>
    %600 = arith.addf %597, %599 : vector<8x32xf32>
    %601 = math.tanh %600 : vector<8x32xf32>
    %cst_322 = arith.constant 1.000000e+00 : f32
    %602 = vector.broadcast %cst_322 : f32 to vector<8x32xf32>
    %603 = arith.subf %602, %596 : vector<8x32xf32>
    %604 = arith.mulf %603, %601 : vector<8x32xf32>
    %605 = arith.mulf %596, %541 : vector<8x32xf32>
    %606 = arith.addf %604, %605 : vector<8x32xf32>
    %c0_323 = arith.constant 0 : index
    %c0_324 = arith.constant 0 : index
    %607 = vector.load %arg8[%c0_323, %c0_324] : memref<32x16xf32, #tpu.memory_space<vmem>>, vector<32x16xf32>
    %cst_325 = arith.constant dense<0.000000e+00> : vector<8x16xf32>
    %608 = tpu.matmul %606, %607, %cst_325 {dimension_numbers = #tpu.dot_dimension_numbers<[1], [0], [0], [1], [0, 0, 1, 1], [], []>} : vector<8x32xf32>, vector<32x16xf32>, vector<8x16xf32> -> vector<8x16xf32>
    %c0_326 = arith.constant 0 : index
    %c0_327 = arith.constant 0 : index
    %609 = vector.load %arg9[%c0_326, %c0_327] : memref<1x16xf32, #tpu.memory_space<vmem>>, vector<1x16xf32>
    %610 = vector.broadcast %609 : vector<1x16xf32> to vector<8x16xf32>
    %611 = arith.addf %608, %610 : vector<8x16xf32>
    %612 = math.tanh %611 : vector<8x16xf32>
    %c0_328 = arith.constant 0 : index
    %c0_329 = arith.constant 0 : index
    %613 = vector.load %arg10[%c0_328, %c0_329] : memref<16x8xf32, #tpu.memory_space<vmem>>, vector<16x8xf32>
    %cst_330 = arith.constant dense<0.000000e+00> : vector<8x8xf32>
    %614 = tpu.matmul %612, %613, %cst_330 {dimension_numbers = #tpu.dot_dimension_numbers<[1], [0], [0], [1], [0, 0, 1, 1], [], []>} : vector<8x16xf32>, vector<16x8xf32>, vector<8x8xf32> -> vector<8x8xf32>
    %c0_331 = arith.constant 0 : index
    %c0_332 = arith.constant 0 : index
    %615 = vector.load %arg11[%c0_331, %c0_332] : memref<1x8xf32, #tpu.memory_space<vmem>>, vector<1x8xf32>
    %616 = vector.broadcast %615 : vector<1x8xf32> to vector<8x8xf32>
    %617 = arith.addf %614, %616 : vector<8x8xf32>
    %618 = vector.extract_strided_slice %617 {offsets = [0, 0], sizes = [8, 4], strides = [1, 1]} : vector<8x8xf32> to vector<8x4xf32>
    %619 = vector.extract_strided_slice %617 {offsets = [0, 4], sizes = [8, 4], strides = [1, 1]} : vector<8x8xf32> to vector<8x4xf32>
    %620 = arith.subf %509, %618 : vector<8x4xf32>
    %621 = arith.mulf %511, %620 : vector<8x4xf32>
    %cst_333 = arith.constant 0.000000e+00 : f32
    %622 = vector.broadcast %cst_333 : f32 to vector<8x4xf32>
    %623 = arith.subf %622, %619 : vector<8x4xf32>
    %624 = math.exp %623 : vector<8x4xf32>
    %625 = arith.mulf %621, %624 : vector<8x4xf32>
    %626 = tpu.concatenate %618, %619, %621, %625 in 1 : vector<8x4xf32>, vector<8x4xf32>, vector<8x4xf32>, vector<8x4xf32> -> vector<8x16xf32>
    %c4_334 = arith.constant 4 : index
    %c0_335 = arith.constant 0 : index
    %c0_336 = arith.constant 0 : index
    %627 = vector.load %arg22[%c4_334, %c0_335, %c0_336] : memref<5x8x16xf32, #tpu.memory_space<vmem>>, vector<1x8x16xf32>
    %628 = vector.shape_cast %627 : vector<1x8x16xf32> to vector<8x16xf32>
    %629 = vector.shape_cast %626 : vector<8x16xf32> to vector<1x8x16xf32>
    tpu.vector_store %arg22[%c4_334, %c0_335, %c0_336], %629 {strides = array<i32>} : memref<5x8x16xf32, #tpu.memory_space<vmem>>, vector<1x8x16xf32>,
    %c5 = arith.constant 5 : index
    %c0_337 = arith.constant 0 : index
    %c0_338 = arith.constant 0 : index
    %630 = vector.load %arg2[%c5, %c0_337, %c0_338] : memref<8x8x4xf32, #tpu.memory_space<vmem>>, vector<1x8x4xf32>
    %631 = vector.shape_cast %630 : vector<1x8x4xf32> to vector<8x4xf32>
    %c5_339 = arith.constant 5 : index
    %c0_340 = arith.constant 0 : index
    %c0_341 = arith.constant 0 : index
    %632 = vector.load %arg3[%c5_339, %c0_340, %c0_341] : memref<8x8x4xf32, #tpu.memory_space<vmem>>, vector<1x8x4xf32>
    %633 = vector.shape_cast %632 : vector<1x8x4xf32> to vector<8x4xf32>
    %c0_342 = arith.constant 0 : index
    %c0_343 = arith.constant 0 : index
    %634 = vector.load %arg13[%c0_342, %c0_343] : memref<32x128xf32, #tpu.memory_space<vmem>>, vector<32x128xf32>
    %cst_344 = arith.constant dense<0.000000e+00> : vector<8x128xf32>
    %635 = tpu.matmul %606, %634, %cst_344 {dimension_numbers = #tpu.dot_dimension_numbers<[1], [0], [0], [1], [0, 0, 1, 1], [], []>} : vector<8x32xf32>, vector<32x128xf32>, vector<8x128xf32> -> vector<8x128xf32>
    %c0_345 = arith.constant 0 : index
    %c0_346 = arith.constant 0 : index
    %636 = vector.load %arg14[%c0_345, %c0_346] : memref<1x128xf32, #tpu.memory_space<vmem>>, vector<1x128xf32>
    %637 = vector.broadcast %636 : vector<1x128xf32> to vector<8x128xf32>
    %638 = arith.addf %635, %637 : vector<8x128xf32>
    %c0_347 = arith.constant 0 : index
    %c0_348 = arith.constant 0 : index
    %639 = vector.load %arg12[%c0_347, %c0_348] : memref<16x128xf32, #tpu.memory_space<vmem>>, vector<16x128xf32>
    %cst_349 = arith.constant dense<0.000000e+00> : vector<8x128xf32>
    %640 = tpu.matmul %612, %639, %cst_349 {dimension_numbers = #tpu.dot_dimension_numbers<[1], [0], [0], [1], [0, 0, 1, 1], [], []>} : vector<8x16xf32>, vector<16x128xf32>, vector<8x128xf32> -> vector<8x128xf32>
    %641 = arith.addf %638, %640 : vector<8x128xf32>
    %642 = vector.extract_strided_slice %641 {offsets = [0, 0], sizes = [8, 32], strides = [1, 1]} : vector<8x128xf32> to vector<8x32xf32>
    %643 = arith.negf %642 : vector<8x32xf32>
    %644 = math.exp %643 : vector<8x32xf32>
    %cst_350 = arith.constant 1.000000e+00 : f32
    %645 = vector.broadcast %cst_350 : f32 to vector<8x32xf32>
    %646 = arith.addf %645, %644 : vector<8x32xf32>
    %647 = arith.divf %645, %646 : vector<8x32xf32>
    %648 = vector.extract_strided_slice %641 {offsets = [0, 32], sizes = [8, 32], strides = [1, 1]} : vector<8x128xf32> to vector<8x32xf32>
    %649 = arith.negf %648 : vector<8x32xf32>
    %650 = math.exp %649 : vector<8x32xf32>
    %cst_351 = arith.constant 1.000000e+00 : f32
    %651 = vector.broadcast %cst_351 : f32 to vector<8x32xf32>
    %652 = arith.addf %651, %650 : vector<8x32xf32>
    %653 = arith.divf %651, %652 : vector<8x32xf32>
    %654 = vector.extract_strided_slice %641 {offsets = [0, 64], sizes = [8, 32], strides = [1, 1]} : vector<8x128xf32> to vector<8x32xf32>
    %655 = vector.extract_strided_slice %641 {offsets = [0, 96], sizes = [8, 32], strides = [1, 1]} : vector<8x128xf32> to vector<8x32xf32>
    %656 = arith.mulf %647, %655 : vector<8x32xf32>
    %657 = arith.addf %654, %656 : vector<8x32xf32>
    %658 = math.tanh %657 : vector<8x32xf32>
    %cst_352 = arith.constant 1.000000e+00 : f32
    %659 = vector.broadcast %cst_352 : f32 to vector<8x32xf32>
    %660 = arith.subf %659, %653 : vector<8x32xf32>
    %661 = arith.mulf %660, %658 : vector<8x32xf32>
    %662 = arith.mulf %653, %606 : vector<8x32xf32>
    %663 = arith.addf %661, %662 : vector<8x32xf32>
    %c0_353 = arith.constant 0 : index
    %c0_354 = arith.constant 0 : index
    %664 = vector.load %arg8[%c0_353, %c0_354] : memref<32x16xf32, #tpu.memory_space<vmem>>, vector<32x16xf32>
    %cst_355 = arith.constant dense<0.000000e+00> : vector<8x16xf32>
    %665 = tpu.matmul %663, %664, %cst_355 {dimension_numbers = #tpu.dot_dimension_numbers<[1], [0], [0], [1], [0, 0, 1, 1], [], []>} : vector<8x32xf32>, vector<32x16xf32>, vector<8x16xf32> -> vector<8x16xf32>
    %c0_356 = arith.constant 0 : index
    %c0_357 = arith.constant 0 : index
    %666 = vector.load %arg9[%c0_356, %c0_357] : memref<1x16xf32, #tpu.memory_space<vmem>>, vector<1x16xf32>
    %667 = vector.broadcast %666 : vector<1x16xf32> to vector<8x16xf32>
    %668 = arith.addf %665, %667 : vector<8x16xf32>
    %669 = math.tanh %668 : vector<8x16xf32>
    %c0_358 = arith.constant 0 : index
    %c0_359 = arith.constant 0 : index
    %670 = vector.load %arg10[%c0_358, %c0_359] : memref<16x8xf32, #tpu.memory_space<vmem>>, vector<16x8xf32>
    %cst_360 = arith.constant dense<0.000000e+00> : vector<8x8xf32>
    %671 = tpu.matmul %669, %670, %cst_360 {dimension_numbers = #tpu.dot_dimension_numbers<[1], [0], [0], [1], [0, 0, 1, 1], [], []>} : vector<8x16xf32>, vector<16x8xf32>, vector<8x8xf32> -> vector<8x8xf32>
    %c0_361 = arith.constant 0 : index
    %c0_362 = arith.constant 0 : index
    %672 = vector.load %arg11[%c0_361, %c0_362] : memref<1x8xf32, #tpu.memory_space<vmem>>, vector<1x8xf32>
    %673 = vector.broadcast %672 : vector<1x8xf32> to vector<8x8xf32>
    %674 = arith.addf %671, %673 : vector<8x8xf32>
    %675 = vector.extract_strided_slice %674 {offsets = [0, 0], sizes = [8, 4], strides = [1, 1]} : vector<8x8xf32> to vector<8x4xf32>
    %676 = vector.extract_strided_slice %674 {offsets = [0, 4], sizes = [8, 4], strides = [1, 1]} : vector<8x8xf32> to vector<8x4xf32>
    %677 = arith.subf %631, %675 : vector<8x4xf32>
    %678 = arith.mulf %633, %677 : vector<8x4xf32>
    %cst_363 = arith.constant 0.000000e+00 : f32
    %679 = vector.broadcast %cst_363 : f32 to vector<8x4xf32>
    %680 = arith.subf %679, %676 : vector<8x4xf32>
    %681 = math.exp %680 : vector<8x4xf32>
    %682 = arith.mulf %678, %681 : vector<8x4xf32>
    %683 = tpu.concatenate %675, %676, %678, %682 in 1 : vector<8x4xf32>, vector<8x4xf32>, vector<8x4xf32>, vector<8x4xf32> -> vector<8x16xf32>
    %c5_364 = arith.constant 5 : index
    %c0_365 = arith.constant 0 : index
    %c0_366 = arith.constant 0 : index
    %684 = vector.load %arg21[%c5_364, %c0_365, %c0_366] : memref<8x8x16xf32, #tpu.memory_space<vmem>>, vector<1x8x16xf32>
    %685 = vector.shape_cast %684 : vector<1x8x16xf32> to vector<8x16xf32>
    %686 = vector.shape_cast %683 : vector<8x16xf32> to vector<1x8x16xf32>
    tpu.vector_store %arg21[%c5_364, %c0_365, %c0_366], %686 {strides = array<i32>} : memref<8x8x16xf32, #tpu.memory_space<vmem>>, vector<1x8x16xf32>,
    %c6 = arith.constant 6 : index
    %c0_367 = arith.constant 0 : index
    %c0_368 = arith.constant 0 : index
    %687 = vector.load %arg2[%c6, %c0_367, %c0_368] : memref<8x8x4xf32, #tpu.memory_space<vmem>>, vector<1x8x4xf32>
    %688 = vector.shape_cast %687 : vector<1x8x4xf32> to vector<8x4xf32>
    %c6_369 = arith.constant 6 : index
    %c0_370 = arith.constant 0 : index
    %c0_371 = arith.constant 0 : index
    %689 = vector.load %arg3[%c6_369, %c0_370, %c0_371] : memref<8x8x4xf32, #tpu.memory_space<vmem>>, vector<1x8x4xf32>
    %690 = vector.shape_cast %689 : vector<1x8x4xf32> to vector<8x4xf32>
    %c0_372 = arith.constant 0 : index
    %c0_373 = arith.constant 0 : index
    %691 = vector.load %arg13[%c0_372, %c0_373] : memref<32x128xf32, #tpu.memory_space<vmem>>, vector<32x128xf32>
    %cst_374 = arith.constant dense<0.000000e+00> : vector<8x128xf32>
    %692 = tpu.matmul %663, %691, %cst_374 {dimension_numbers = #tpu.dot_dimension_numbers<[1], [0], [0], [1], [0, 0, 1, 1], [], []>} : vector<8x32xf32>, vector<32x128xf32>, vector<8x128xf32> -> vector<8x128xf32>
    %c0_375 = arith.constant 0 : index
    %c0_376 = arith.constant 0 : index
    %693 = vector.load %arg14[%c0_375, %c0_376] : memref<1x128xf32, #tpu.memory_space<vmem>>, vector<1x128xf32>
    %694 = vector.broadcast %693 : vector<1x128xf32> to vector<8x128xf32>
    %695 = arith.addf %692, %694 : vector<8x128xf32>
    %c0_377 = arith.constant 0 : index
    %c0_378 = arith.constant 0 : index
    %696 = vector.load %arg12[%c0_377, %c0_378] : memref<16x128xf32, #tpu.memory_space<vmem>>, vector<16x128xf32>
    %cst_379 = arith.constant dense<0.000000e+00> : vector<8x128xf32>
    %697 = tpu.matmul %669, %696, %cst_379 {dimension_numbers = #tpu.dot_dimension_numbers<[1], [0], [0], [1], [0, 0, 1, 1], [], []>} : vector<8x16xf32>, vector<16x128xf32>, vector<8x128xf32> -> vector<8x128xf32>
    %698 = arith.addf %695, %697 : vector<8x128xf32>
    %699 = vector.extract_strided_slice %698 {offsets = [0, 0], sizes = [8, 32], strides = [1, 1]} : vector<8x128xf32> to vector<8x32xf32>
    %700 = arith.negf %699 : vector<8x32xf32>
    %701 = math.exp %700 : vector<8x32xf32>
    %cst_380 = arith.constant 1.000000e+00 : f32
    %702 = vector.broadcast %cst_380 : f32 to vector<8x32xf32>
    %703 = arith.addf %702, %701 : vector<8x32xf32>
    %704 = arith.divf %702, %703 : vector<8x32xf32>
    %705 = vector.extract_strided_slice %698 {offsets = [0, 32], sizes = [8, 32], strides = [1, 1]} : vector<8x128xf32> to vector<8x32xf32>
    %706 = arith.negf %705 : vector<8x32xf32>
    %707 = math.exp %706 : vector<8x32xf32>
    %cst_381 = arith.constant 1.000000e+00 : f32
    %708 = vector.broadcast %cst_381 : f32 to vector<8x32xf32>
    %709 = arith.addf %708, %707 : vector<8x32xf32>
    %710 = arith.divf %708, %709 : vector<8x32xf32>
    %711 = vector.extract_strided_slice %698 {offsets = [0, 64], sizes = [8, 32], strides = [1, 1]} : vector<8x128xf32> to vector<8x32xf32>
    %712 = vector.extract_strided_slice %698 {offsets = [0, 96], sizes = [8, 32], strides = [1, 1]} : vector<8x128xf32> to vector<8x32xf32>
    %713 = arith.mulf %704, %712 : vector<8x32xf32>
    %714 = arith.addf %711, %713 : vector<8x32xf32>
    %715 = math.tanh %714 : vector<8x32xf32>
    %cst_382 = arith.constant 1.000000e+00 : f32
    %716 = vector.broadcast %cst_382 : f32 to vector<8x32xf32>
    %717 = arith.subf %716, %710 : vector<8x32xf32>
    %718 = arith.mulf %717, %715 : vector<8x32xf32>
    %719 = arith.mulf %710, %663 : vector<8x32xf32>
    %720 = arith.addf %718, %719 : vector<8x32xf32>
    %c0_383 = arith.constant 0 : index
    %c0_384 = arith.constant 0 : index
    %721 = vector.load %arg8[%c0_383, %c0_384] : memref<32x16xf32, #tpu.memory_space<vmem>>, vector<32x16xf32>
    %cst_385 = arith.constant dense<0.000000e+00> : vector<8x16xf32>
    %722 = tpu.matmul %720, %721, %cst_385 {dimension_numbers = #tpu.dot_dimension_numbers<[1], [0], [0], [1], [0, 0, 1, 1], [], []>} : vector<8x32xf32>, vector<32x16xf32>, vector<8x16xf32> -> vector<8x16xf32>
    %c0_386 = arith.constant 0 : index
    %c0_387 = arith.constant 0 : index
    %723 = vector.load %arg9[%c0_386, %c0_387] : memref<1x16xf32, #tpu.memory_space<vmem>>, vector<1x16xf32>
    %724 = vector.broadcast %723 : vector<1x16xf32> to vector<8x16xf32>
    %725 = arith.addf %722, %724 : vector<8x16xf32>
    %726 = math.tanh %725 : vector<8x16xf32>
    %c0_388 = arith.constant 0 : index
    %c0_389 = arith.constant 0 : index
    %727 = vector.load %arg10[%c0_388, %c0_389] : memref<16x8xf32, #tpu.memory_space<vmem>>, vector<16x8xf32>
    %cst_390 = arith.constant dense<0.000000e+00> : vector<8x8xf32>
    %728 = tpu.matmul %726, %727, %cst_390 {dimension_numbers = #tpu.dot_dimension_numbers<[1], [0], [0], [1], [0, 0, 1, 1], [], []>} : vector<8x16xf32>, vector<16x8xf32>, vector<8x8xf32> -> vector<8x8xf32>
    %c0_391 = arith.constant 0 : index
    %c0_392 = arith.constant 0 : index
    %729 = vector.load %arg11[%c0_391, %c0_392] : memref<1x8xf32, #tpu.memory_space<vmem>>, vector<1x8xf32>
    %730 = vector.broadcast %729 : vector<1x8xf32> to vector<8x8xf32>
    %731 = arith.addf %728, %730 : vector<8x8xf32>
    %732 = vector.extract_strided_slice %731 {offsets = [0, 0], sizes = [8, 4], strides = [1, 1]} : vector<8x8xf32> to vector<8x4xf32>
    %733 = vector.extract_strided_slice %731 {offsets = [0, 4], sizes = [8, 4], strides = [1, 1]} : vector<8x8xf32> to vector<8x4xf32>
    %734 = arith.subf %688, %732 : vector<8x4xf32>
    %735 = arith.mulf %690, %734 : vector<8x4xf32>
    %cst_393 = arith.constant 0.000000e+00 : f32
    %736 = vector.broadcast %cst_393 : f32 to vector<8x4xf32>
    %737 = arith.subf %736, %733 : vector<8x4xf32>
    %738 = math.exp %737 : vector<8x4xf32>
    %739 = arith.mulf %735, %738 : vector<8x4xf32>
    %740 = tpu.concatenate %732, %733, %735, %739 in 1 : vector<8x4xf32>, vector<8x4xf32>, vector<8x4xf32>, vector<8x4xf32> -> vector<8x16xf32>
    %c6_394 = arith.constant 6 : index
    %c0_395 = arith.constant 0 : index
    %c0_396 = arith.constant 0 : index
    %741 = vector.load %arg21[%c6_394, %c0_395, %c0_396] : memref<8x8x16xf32, #tpu.memory_space<vmem>>, vector<1x8x16xf32>
    %742 = vector.shape_cast %741 : vector<1x8x16xf32> to vector<8x16xf32>
    %743 = vector.shape_cast %740 : vector<8x16xf32> to vector<1x8x16xf32>
    tpu.vector_store %arg21[%c6_394, %c0_395, %c0_396], %743 {strides = array<i32>} : memref<8x8x16xf32, #tpu.memory_space<vmem>>, vector<1x8x16xf32>,
    %c7 = arith.constant 7 : index
    %c0_397 = arith.constant 0 : index
    %c0_398 = arith.constant 0 : index
    %744 = vector.load %arg2[%c7, %c0_397, %c0_398] : memref<8x8x4xf32, #tpu.memory_space<vmem>>, vector<1x8x4xf32>
    %745 = vector.shape_cast %744 : vector<1x8x4xf32> to vector<8x4xf32>
    %c7_399 = arith.constant 7 : index
    %c0_400 = arith.constant 0 : index
    %c0_401 = arith.constant 0 : index
    %746 = vector.load %arg3[%c7_399, %c0_400, %c0_401] : memref<8x8x4xf32, #tpu.memory_space<vmem>>, vector<1x8x4xf32>
    %747 = vector.shape_cast %746 : vector<1x8x4xf32> to vector<8x4xf32>
    %c0_402 = arith.constant 0 : index
    %c0_403 = arith.constant 0 : index
    %748 = vector.load %arg13[%c0_402, %c0_403] : memref<32x128xf32, #tpu.memory_space<vmem>>, vector<32x128xf32>
    %cst_404 = arith.constant dense<0.000000e+00> : vector<8x128xf32>
    %749 = tpu.matmul %720, %748, %cst_404 {dimension_numbers = #tpu.dot_dimension_numbers<[1], [0], [0], [1], [0, 0, 1, 1], [], []>} : vector<8x32xf32>, vector<32x128xf32>, vector<8x128xf32> -> vector<8x128xf32>
    %c0_405 = arith.constant 0 : index
    %c0_406 = arith.constant 0 : index
    %750 = vector.load %arg14[%c0_405, %c0_406] : memref<1x128xf32, #tpu.memory_space<vmem>>, vector<1x128xf32>
    %751 = vector.broadcast %750 : vector<1x128xf32> to vector<8x128xf32>
    %752 = arith.addf %749, %751 : vector<8x128xf32>
    %c0_407 = arith.constant 0 : index
    %c0_408 = arith.constant 0 : index
    %753 = vector.load %arg12[%c0_407, %c0_408] : memref<16x128xf32, #tpu.memory_space<vmem>>, vector<16x128xf32>
    %cst_409 = arith.constant dense<0.000000e+00> : vector<8x128xf32>
    %754 = tpu.matmul %726, %753, %cst_409 {dimension_numbers = #tpu.dot_dimension_numbers<[1], [0], [0], [1], [0, 0, 1, 1], [], []>} : vector<8x16xf32>, vector<16x128xf32>, vector<8x128xf32> -> vector<8x128xf32>
    %755 = arith.addf %752, %754 : vector<8x128xf32>
    %756 = vector.extract_strided_slice %755 {offsets = [0, 0], sizes = [8, 32], strides = [1, 1]} : vector<8x128xf32> to vector<8x32xf32>
    %757 = arith.negf %756 : vector<8x32xf32>
    %758 = math.exp %757 : vector<8x32xf32>
    %cst_410 = arith.constant 1.000000e+00 : f32
    %759 = vector.broadcast %cst_410 : f32 to vector<8x32xf32>
    %760 = arith.addf %759, %758 : vector<8x32xf32>
    %761 = arith.divf %759, %760 : vector<8x32xf32>
    %762 = vector.extract_strided_slice %755 {offsets = [0, 32], sizes = [8, 32], strides = [1, 1]} : vector<8x128xf32> to vector<8x32xf32>
    %763 = arith.negf %762 : vector<8x32xf32>
    %764 = math.exp %763 : vector<8x32xf32>
    %cst_411 = arith.constant 1.000000e+00 : f32
    %765 = vector.broadcast %cst_411 : f32 to vector<8x32xf32>
    %766 = arith.addf %765, %764 : vector<8x32xf32>
    %767 = arith.divf %765, %766 : vector<8x32xf32>
    %768 = vector.extract_strided_slice %755 {offsets = [0, 64], sizes = [8, 32], strides = [1, 1]} : vector<8x128xf32> to vector<8x32xf32>
    %769 = vector.extract_strided_slice %755 {offsets = [0, 96], sizes = [8, 32], strides = [1, 1]} : vector<8x128xf32> to vector<8x32xf32>
    %770 = arith.mulf %761, %769 : vector<8x32xf32>
    %771 = arith.addf %768, %770 : vector<8x32xf32>
    %772 = math.tanh %771 : vector<8x32xf32>
    %cst_412 = arith.constant 1.000000e+00 : f32
    %773 = vector.broadcast %cst_412 : f32 to vector<8x32xf32>
    %774 = arith.subf %773, %767 : vector<8x32xf32>
    %775 = arith.mulf %774, %772 : vector<8x32xf32>
    %776 = arith.mulf %767, %720 : vector<8x32xf32>
    %777 = arith.addf %775, %776 : vector<8x32xf32>
    %c0_413 = arith.constant 0 : index
    %c0_414 = arith.constant 0 : index
    %778 = vector.load %arg8[%c0_413, %c0_414] : memref<32x16xf32, #tpu.memory_space<vmem>>, vector<32x16xf32>
    %cst_415 = arith.constant dense<0.000000e+00> : vector<8x16xf32>
    %779 = tpu.matmul %777, %778, %cst_415 {dimension_numbers = #tpu.dot_dimension_numbers<[1], [0], [0], [1], [0, 0, 1, 1], [], []>} : vector<8x32xf32>, vector<32x16xf32>, vector<8x16xf32> -> vector<8x16xf32>
    %c0_416 = arith.constant 0 : index
    %c0_417 = arith.constant 0 : index
    %780 = vector.load %arg9[%c0_416, %c0_417] : memref<1x16xf32, #tpu.memory_space<vmem>>, vector<1x16xf32>
    %781 = vector.broadcast %780 : vector<1x16xf32> to vector<8x16xf32>
    %782 = arith.addf %779, %781 : vector<8x16xf32>
    %783 = math.tanh %782 : vector<8x16xf32>
    %c0_418 = arith.constant 0 : index
    %c0_419 = arith.constant 0 : index
    %784 = vector.load %arg10[%c0_418, %c0_419] : memref<16x8xf32, #tpu.memory_space<vmem>>, vector<16x8xf32>
    %cst_420 = arith.constant dense<0.000000e+00> : vector<8x8xf32>
    %785 = tpu.matmul %783, %784, %cst_420 {dimension_numbers = #tpu.dot_dimension_numbers<[1], [0], [0], [1], [0, 0, 1, 1], [], []>} : vector<8x16xf32>, vector<16x8xf32>, vector<8x8xf32> -> vector<8x8xf32>
    %c0_421 = arith.constant 0 : index
    %c0_422 = arith.constant 0 : index
    %786 = vector.load %arg11[%c0_421, %c0_422] : memref<1x8xf32, #tpu.memory_space<vmem>>, vector<1x8xf32>
    %787 = vector.broadcast %786 : vector<1x8xf32> to vector<8x8xf32>
    %788 = arith.addf %785, %787 : vector<8x8xf32>
    %789 = vector.extract_strided_slice %788 {offsets = [0, 0], sizes = [8, 4], strides = [1, 1]} : vector<8x8xf32> to vector<8x4xf32>
    %790 = vector.extract_strided_slice %788 {offsets = [0, 4], sizes = [8, 4], strides = [1, 1]} : vector<8x8xf32> to vector<8x4xf32>
    %791 = arith.subf %745, %789 : vector<8x4xf32>
    %792 = arith.mulf %747, %791 : vector<8x4xf32>
    %cst_423 = arith.constant 0.000000e+00 : f32
    %793 = vector.broadcast %cst_423 : f32 to vector<8x4xf32>
    %794 = arith.subf %793, %790 : vector<8x4xf32>
    %795 = math.exp %794 : vector<8x4xf32>
    %796 = arith.mulf %792, %795 : vector<8x4xf32>
    %797 = tpu.concatenate %789, %790, %792, %796 in 1 : vector<8x4xf32>, vector<8x4xf32>, vector<8x4xf32>, vector<8x4xf32> -> vector<8x16xf32>
    %c7_424 = arith.constant 7 : index
    %c0_425 = arith.constant 0 : index
    %c0_426 = arith.constant 0 : index
    %798 = vector.load %arg21[%c7_424, %c0_425, %c0_426] : memref<8x8x16xf32, #tpu.memory_space<vmem>>, vector<1x8x16xf32>
    %799 = vector.shape_cast %798 : vector<1x8x16xf32> to vector<8x16xf32>
    %800 = vector.shape_cast %797 : vector<8x16xf32> to vector<1x8x16xf32>
    tpu.vector_store %arg21[%c7_424, %c0_425, %c0_426], %800 {strides = array<i32>} : memref<8x8x16xf32, #tpu.memory_space<vmem>>, vector<1x8x16xf32>,
    return
  }
  func.func @transform_0(%arg0: i32) -> (i32, i32) {
    %c0_i32 = arith.constant 0 : i32
    %c0_i32_0 = arith.constant 0 : i32
    return %arg0, %c0_i32 : i32, i32
  }
  func.func @transform_1(%arg0: i32) -> (i32, i32, i32) {
    %c0_i32 = arith.constant 0 : i32
    %c0_i32_0 = arith.constant 0 : i32
    %c0_i32_1 = arith.constant 0 : i32
    return %c0_i32, %arg0, %c0_i32_0 : i32, i32, i32
  }
  func.func @transform_2(%arg0: i32) -> (i32, i32, i32) {
    %c0_i32 = arith.constant 0 : i32
    %c0_i32_0 = arith.constant 0 : i32
    %c0_i32_1 = arith.constant 0 : i32
    return %c0_i32, %arg0, %c0_i32_0 : i32, i32, i32
  }
  func.func @transform_3(%arg0: i32) -> (i32, i32) {
    %c0_i32 = arith.constant 0 : i32
    %c0_i32_0 = arith.constant 0 : i32
    %c0_i32_1 = arith.constant 0 : i32
    return %c0_i32, %c0_i32_0 : i32, i32
  }
  func.func @transform_4(%arg0: i32) -> (i32, i32) {
    %c0_i32 = arith.constant 0 : i32
    %c0_i32_0 = arith.constant 0 : i32
    %c0_i32_1 = arith.constant 0 : i32
    return %c0_i32, %c0_i32_0 : i32, i32
  }
  func.func @transform_5(%arg0: i32) -> (i32, i32) {
    %c0_i32 = arith.constant 0 : i32
    %c0_i32_0 = arith.constant 0 : i32
    %c0_i32_1 = arith.constant 0 : i32
    return %c0_i32, %c0_i32_0 : i32, i32
  }
  func.func @transform_6(%arg0: i32) -> (i32, i32) {
    %c0_i32 = arith.constant 0 : i32
    %c0_i32_0 = arith.constant 0 : i32
    %c0_i32_1 = arith.constant 0 : i32
    return %c0_i32, %c0_i32_0 : i32, i32
  }
  func.func @transform_7(%arg0: i32) -> (i32, i32) {
    %c0_i32 = arith.constant 0 : i32
    %c0_i32_0 = arith.constant 0 : i32
    %c0_i32_1 = arith.constant 0 : i32
    return %c0_i32, %c0_i32_0 : i32, i32
  }
  func.func @transform_8(%arg0: i32) -> (i32, i32) {
    %c0_i32 = arith.constant 0 : i32
    %c0_i32_0 = arith.constant 0 : i32
    %c0_i32_1 = arith.constant 0 : i32
    return %c0_i32, %c0_i32_0 : i32, i32
  }
  func.func @transform_9(%arg0: i32) -> (i32, i32) {
    %c0_i32 = arith.constant 0 : i32
    %c0_i32_0 = arith.constant 0 : i32
    %c0_i32_1 = arith.constant 0 : i32
    return %c0_i32, %c0_i32_0 : i32, i32
  }
  func.func @transform_10(%arg0: i32) -> (i32, i32) {
    %c0_i32 = arith.constant 0 : i32
    %c0_i32_0 = arith.constant 0 : i32
    %c0_i32_1 = arith.constant 0 : i32
    return %c0_i32, %c0_i32_0 : i32, i32
  }
  func.func @transform_11(%arg0: i32) -> (i32, i32) {
    %c0_i32 = arith.constant 0 : i32
    %c0_i32_0 = arith.constant 0 : i32
    %c0_i32_1 = arith.constant 0 : i32
    return %c0_i32, %c0_i32_0 : i32, i32
  }
  func.func @transform_12(%arg0: i32) -> (i32, i32) {
    %c0_i32 = arith.constant 0 : i32
    %c0_i32_0 = arith.constant 0 : i32
    %c0_i32_1 = arith.constant 0 : i32
    return %c0_i32, %c0_i32_0 : i32, i32
  }
  func.func @transform_13(%arg0: i32) -> (i32, i32) {
    %c0_i32 = arith.constant 0 : i32
    %c0_i32_0 = arith.constant 0 : i32
    %c0_i32_1 = arith.constant 0 : i32
    return %c0_i32, %c0_i32_0 : i32, i32
  }
  func.func @transform_14(%arg0: i32) -> (i32, i32) {
    %c0_i32 = arith.constant 0 : i32
    %c0_i32_0 = arith.constant 0 : i32
    %c0_i32_1 = arith.constant 0 : i32
    return %c0_i32, %c0_i32_0 : i32, i32
  }
  func.func @transform_15(%arg0: i32) -> (i32, i32) {
    %c0_i32 = arith.constant 0 : i32
    %c0_i32_0 = arith.constant 0 : i32
    %c0_i32_1 = arith.constant 0 : i32
    return %c0_i32, %c0_i32_0 : i32, i32
  }
  func.func @transform_16(%arg0: i32) -> (i32, i32) {
    %c0_i32 = arith.constant 0 : i32
    %c0_i32_0 = arith.constant 0 : i32
    %c0_i32_1 = arith.constant 0 : i32
    return %c0_i32, %c0_i32_0 : i32, i32
  }
  func.func @transform_17(%arg0: i32) -> (i32, i32) {
    %c0_i32 = arith.constant 0 : i32
    %c0_i32_0 = arith.constant 0 : i32
    %c0_i32_1 = arith.constant 0 : i32
    return %c0_i32, %c0_i32_0 : i32, i32
  }
  func.func @transform_18(%arg0: i32) -> (i32, i32) {
    %c0_i32 = arith.constant 0 : i32
    %c0_i32_0 = arith.constant 0 : i32
    %c0_i32_1 = arith.constant 0 : i32
    return %c0_i32, %c0_i32_0 : i32, i32
  }
  func.func @transform_19(%arg0: i32) -> (i32, i32) {
    %c0_i32 = arith.constant 0 : i32
    %c0_i32_0 = arith.constant 0 : i32
    %c0_i32_1 = arith.constant 0 : i32
    return %c0_i32, %c0_i32_0 : i32, i32
  }
  func.func @transform_20(%arg0: i32) -> (i32, i32, i32) {
    %c0_i32 = arith.constant 0 : i32
    %c0_i32_0 = arith.constant 0 : i32
    %c0_i32_1 = arith.constant 0 : i32
    return %c0_i32, %arg0, %c0_i32_0 : i32, i32, i32
  }
  func.func @transform_21(%arg0: i32) -> (i32, i32, i32) {
    %c0_i32 = arith.constant 0 : i32
    %c0_i32_0 = arith.constant 0 : i32
    %c0_i32_1 = arith.constant 0 : i32
    return %c0_i32, %arg0, %c0_i32_0 : i32, i32, i32
  }
}

</mosaic_0001>

<bundles_post_ra>
// kernel: tpu_custom_call.1
= control target key start
LH: loop header
LB: loop body
LE: loop exit
PB: predicated region body
PF: predicated region fallthrough
CT: control target
= control target key end

     0   :  { %s4280_s0 = inlined_call_operand.vmem [shape: f32[8,5], index: 0, kind: input, shape index: {}]   ;;  %s4281_s1 = inlined_call_operand.vmem [shape: f32[8,8,4], index: 1, kind: input, shape index: {}]   ;;  %s4282_s2 = inlined_call_operand.vmem [shape: f32[8,8,4], index: 2, kind: input, shape index: {}]   ;;  %s4283_s3 = inlined_call_operand.vmem [shape: f32[5,8], index: 3, kind: input, shape index: {}]   ;;  %s4284_s4 = inlined_call_operand.vmem [shape: f32[1,8], index: 4, kind: input, shape index: {}]   ;;  %s4285_s5 = inlined_call_operand.vmem [shape: f32[8,32], index: 5, kind: input, shape index: {}]   ;;  %s4286_s6 = inlined_call_operand.vmem [shape: f32[1,32], index: 6, kind: input, shape index: {}]   ;;  %s4287_s7 = inlined_call_operand.vmem [shape: f32[32,16], index: 7, kind: input, shape index: {}]   ;;  %s4288_s8 = inlined_call_operand.vmem [shape: f32[1,16], index: 8, kind: input, shape index: {}]   ;;  %s4289_s9 = inlined_call_operand.vmem [shape: f32[16,8], index: 9, kind: input, shape index: {}]   ;;  %s4290_s10 = inlined_call_operand.vmem [shape: f32[1,8], index: 10, kind: input, shape index: {}]   ;;  %s4291_s11 = inlined_call_operand.vmem [shape: f32[16,128], index: 11, kind: input, shape index: {}]   ;;  %s4292_s12 = inlined_call_operand.vmem [shape: f32[32,128], index: 12, kind: input, shape index: {}]   ;;  %s4293_s13 = inlined_call_operand.vmem [shape: f32[1,128], index: 13, kind: input, shape index: {}]   ;;  %s4294_s14 = inlined_call_operand.vmem [shape: f32[16,12], index: 14, kind: input, shape index: {}]   ;;  %s4295_s15 = inlined_call_operand.vmem [shape: f32[1,12], index: 15, kind: input, shape index: {}]   ;;  %s4296_s16 = inlined_call_operand.vmem [shape: f32[12,128], index: 16, kind: input, shape index: {}]   ;;  %s4297_s17 = inlined_call_operand.vmem [shape: f32[4,128], index: 17, kind: input, shape index: {}]   ;;  %s4298_s18 = inlined_call_operand.vmem [shape: f32[32,128], index: 18, kind: input, shape index: {}]   ;;  %s4299_s19 = inlined_call_operand.vmem [shape: f32[1,128], index: 19, kind: input, shape index: {}]   ;;  %s4300_s20 = inlined_call_operand.hbm [shape: f32[8,8,16], index: 20, kind: output, shape index: {0}]   ;;  %s4301_s21 = inlined_call_operand.hbm [shape: f32[5,8,16], index: 21, kind: output, shape index: {1}]  }
   0x1   :  { %4306 = sst [smem:[#allocation8_spill]] %s4280_s0 }
   0x2   :  { %4307 = sst [smem:[#allocation9_spill]] %s4281_s1 }
   0x3   :  { %4308 = sst [smem:[#allocation10_spill]] %s4282_s2 }
   0x4   :  { %4309 = sst [smem:[#allocation11_spill]] %s4283_s3 }
   0x5   :  { %4310 = sst [smem:[#allocation12_spill]] %s4284_s4 }
   0x6   :  { %4311 = sst [smem:[#allocation13_spill]] %s4285_s5 }
   0x7   :  { %27 = vsyncpa [#allocation3], 0  ;;  %s4312_s26 = sld [smem:[#allocation11_spill]]  ;;  %vm79_vm0 = vcmask 1044480   ;;  %vm75_vm1 = vcmask 39936  }
   0x8   :  { %s4313_s28 = sld [smem:[#allocation8_spill]] }
   0xd   :  { %v70_v0 = vld [vmem:[%s4312_s26] sm:$0x1f] }
   0xe   :  { %v69_v1 = vld [vmem:[%s4313_s28] sm:$0xff]  ;;  %2860 = vmatpush.msk.msra.mxu0 %vm79_vm0, %v70_v0 }
   0xf   :  { %2861 = vmatmul.msk.f32.vlgmr.msra.gmra.mxu0 %vm75_vm1, %v69_v1 }
  0x10   :  { %28 = vsyncpa [#allocation5], 0  ;;  %s4314_s4 = sld [smem:[#allocation13_spill]]  ;;  %vm109_vm2 = vcmask 64512   ;;  %v3347_v7 = vld [vmem:[%s4287_s7 + $0x18] sm:$0xff]  ;;  %v3359_v9 = vld [vmem:[%s4287_s7 + $0x10] sm:$0xff] }
  0x11   :  { %s4315_s22 = sld [smem:[#allocation12_spill]]  ;;  %v3352_v8 = vld [vmem:[%s4292_s12 + $0x18] sm:$0xff]  ;;  %158 = vmatpush.msra.mxu2 %v3347_v7  ;;  %v3364_v10 = vld [vmem:[%s4292_s12 + $0x10] sm:$0xff]  ;;  %v3369_v11 = vld [vmem:[%s4287_s7 + $0x8] sm:$0xff]  ;;  %vm142_vm3 = vcmask 261120   ;;  %vm199_vm4 = vcmask 130048  }
  0x12   :  { %189 = vmatpush.msra.mxu3 %v3352_v8  ;;  %v3374_v12 = vld [vmem:[%s4292_s12 + $0x8] sm:$0xff]  ;;  %v3382_v13 = vld [vmem:[%s4287_s7] sm:$0xff]  ;;  %s3211_s0 = smov 32   ;;  %s3213_s30 = smov 96   ;;  %v3447_v57 = vld [vmem:[%s4298_s18 + $0x18] sm:$0xff]  ;;  %vm388_vm9 = vcmask 1043456  }
  0x13   :  { %159 = vmatpush.msra.mxu2 %v3359_v9  ;;  %v3387_v14 = vld [vmem:[%s4292_s12] sm:$0xff]  ;;  %v3404_v19 = vld [vmem:[%s4291_s11 + $0x8] sm:$0xff]  ;;  %v3452_v58 = vld [vmem:[%s4298_s18 + $0x10] sm:$0xff]  ;;  %s4316_s1 = sld [smem:[#allocation9_spill]]  ;;  %s3214_s26 = smov 8   ;;  %vm339_vm10 = vcmask 97280  }
  0x14   :  { %190 = vmatpush.msra.mxu3 %v3364_v10  ;;  %v2974_v15 = vld [vmem:[%s4286_s6] ss:$0 sm:$0xff]  ;;  %217 = vmatpush.msrb.mxu0 %v3404_v19  ;;  %v3435_v55 = vld [vmem:[%s4289_s9 + $0x8] sm:$0xff]  ;;  %s4317_s25 = sld [smem:[#allocation10_spill]]  ;;  %s3215_s27 = smov 124   ;;  %vm379_vm11 = vcmask 31744  }
  0x15   :  { %160 = vmatpush.msra.mxu2 %v3369_v11  ;;  %v3409_v20 = vld [vmem:[%s4291_s11] sm:$0xff]  ;;  %v3458_v59 = vld [vmem:[%s4298_s18 + $0x8] sm:$0xff]  ;;  %s3216_s5 = smov 4  }
  0x16   :  { %v104_v2 = vld [vmem:[%s4314_s4] sm:$0xff]  ;;  %191 = vmatpush.msra.mxu3 %v3374_v12  ;;  %218 = vmatpush.msrb.mxu0 %v3409_v20  ;;  %s3212_s4 = smov 64  }
  0x17   :  { %128 = vmatpush.msra.mxu1 %v104_v2  ;;  %v2973_v3 = vld [vmem:[%s4315_s22] ss:$0 sm:$0xff]  ;;  %161 = vmatpush.msra.mxu2 %v3382_v13  ;;  %s4304_s22 = smov 12  }
  0x18   :  { %192 = vmatpush.msra.mxu3 %v3387_v14  ;;  %v3416_v21 = vld [vmem:[%s4288_s8] ss:$0 sm:$0xff] }
  0x19   :  { %282 = vmatpush.msrb.mxu1 %v3347_v7  ;;  %v2976_v25 = vld [vmem:[%s4293_s13] ss:$0 sm:$0xff]  ;;  %314 = vmatpush.msrb.mxu2 %v3435_v55 }
  0x1a   :  { %v3440_v56 = vld [vmem:[%s4289_s9] sm:$0xff] }
  0x1b   :  { %283 = vmatpush.msrb.mxu1 %v3359_v9  ;;  %315 = vmatpush.msrb.mxu2 %v3440_v56  ;;  %v3464_v60 = vld [vmem:[%s4298_s18] sm:$0xff] }
  0x1c   :  { %v2977_v0 = vld [vmem:[%s4290_s10] ss:$0 sm:$0xff] }
  0x1d   :  { %284 = vmatpush.msrb.mxu1 %v3369_v11  ;;  %v167_v1 = vld [vmem:[%s4316_s1] sm:$0xff] }
  0x1f   :  { %285 = vmatpush.msrb.mxu1 %v3382_v13 }
  0x8c   :  { %v100_v4 = vpop.f32.mrf.mxu0 }
  0x8d   :  { %v101_v5 = vadd.f32 %v2973_v3, %v100_v4  ;;  %v168_v4 = vld [vmem:[%s4317_s25] sm:$0xff] }
  0x8f   :  { %v103_v6 = vmax.f32 %v101_v5, 0.0 }
  0x91   :  { %2862 = vmatmul.msk.f32.vlgmr.msra.gmra.mxu1 %vm109_vm2, %v103_v6 }
 0x10e   :  { %v130_v16 = vpop.f32.mrf.mxu1 }
 0x10f   :  { %v131_v17 = vadd.f32 %v2974_v15, %v130_v16 }
 0x111   :  { %3019 = vtanh.f32 %v131_v17 }
 0x117   :  { %v3020_v18 = vpop.eup %3019 }
 0x118   :  { %2863 = vmatmul.msk.f32.vlgmr.msra.gmra.mxu2 %vm142_vm3, %v3020_v18  ;;  %2864 = vmatmul.msk.f32.vlgmr.msra.gmra.mxu3 %vm142_vm3, %v3020_v18 }
 0x119   :  { %454 = vmatpush.msra.mxu2 %v3447_v57 }
 0x11b   :  { %455 = vmatpush.msra.mxu2 %v3452_v58 }
 0x11d   :  { %456 = vmatpush.msra.mxu2 %v3458_v59 }
 0x11f   :  { %457 = vmatpush.msra.mxu2 %v3464_v60 }
 0x19b   :  { %v163_v22 = vpop.f32.mrf.mxu2  ;;  %v194_v26 = vpop.f32.mrf.mxu3 }
 0x19c   :  { %v164_v23 = vadd.f32 %v3416_v21, %v163_v22  ;;  %v195_v27 = vadd.f32 %v2976_v25, %v194_v26  ;;  %v384_v25 = vld [vmem:[%s4296_s16 + $0x8] sm:$0xf] }
 0x19d   :  { %2872 = vmatpush.msk.msra.mxu1 %vm388_vm9, %v384_v25 }
 0x19e   :  { %3021 = vtanh.f32 %v164_v23 }
 0x1a4   :  { %v3022_v24 = vpop.eup %3021 }
 0x1a5   :  { %2865 = vmatmul.msk.f32.vlgmr.msrb.gmra.mxu0 %vm199_vm4, %v3022_v24  ;;  %v385_v24 = vld [vmem:[%s4297_s17] sm:$0xf] }
 0x1a6   :  { %2870 = vmatpush.msk.msra.mxu0 %vm388_vm9, %v385_v24 }
 0x1a8   :  { %563 = vmatpush.msrb.mxu0 %v3435_v55 }
 0x1aa   :  { %564 = vmatpush.msrb.mxu0 %v3440_v56 }
 0x1ad   :  { %2871 = vmatmul.msk.f32.vlgmr.msra.gmra.mxu0 %vm379_vm11, %v168_v4 }
 0x1ae   :  { %740 = vmatpush.msra.mxu0 %v3435_v55 }
 0x1b0   :  { %741 = vmatpush.msra.mxu0 %v3440_v56 }
 0x222   :  { %v220_v28 = vpop.f32.mrf.mxu0 }
 0x223   :  { %v223_v29 = vadd.f32 %v220_v28, %v195_v27 }
 0x225   :  { %244 = vrot.lane.b32.xlu0 %v223_v29, %s3211_s0  ;;  %v2866_v30 = vmul.f32 -1.442695, %v223_v29 }
 0x227   :  { %3023 = vpow2.f32 %v2866_v30  ;;  %v3524_v30 = vld [vmem:[%s4296_s16] sm:$0xff] }
 0x228   :  { %433 = vmatpush.msra.mxu1 %v3524_v30 }
 0x22d   :  { %v3024_v31 = vpop.eup %3023 }
 0x22e   :  { %v227_v32 = vadd.f32 1.0, %v3024_v31 }
 0x230   :  { %3025 = vrcp.f32 %v227_v32  ;;  %v239_v38 = vand.u32 2147483648, %v227_v32  ;;  %vm233_vm6 = vweird.f32 %v227_v32  ;;  %v237_v39 = vand.u32 2147483647, %v227_v32 }
 0x232   :  { %v240_v41 = vor.u32 1.1754944e-38, %v239_v38  ;;  %vm238_vm8 = vcmp.eq.f32.partialorder %v237_v39, 8.507059e+37 }
 0x236   :  { %v3026_v33 = vpop.eup %3025 }
 0x237   :  { %v229_v34 = vmul.f32 %v3026_v33, %v227_v32  ;;  %vm234_vm5 = vweird.f32 %v3026_v33  ;;  %v2978_v32 = vld [vmem:[%s4295_s15] ss:$0 sm:$0xff] }
 0x238   :  { %vm235_vm7 = vmor %vm233_vm6, %vm234_vm5 }
 0x239   :  { %v230_v35 = vsub.f32 1.0, %v229_v34 }
 0x23b   :  { %v231_v36 = vmul.f32 %v3026_v33, %v230_v35 }
 0x23d   :  { %v232_v37 = vadd.f32 %v3026_v33, %v231_v36 }
 0x23f   :  { %v236_v40 = vsel %vm235_vm7, %v3026_v33, %v232_v37 }
 0x240   :  { %v241_v43 = vsel %vm238_vm8, %v240_v41, %v236_v40  ;;  %v409_v40 = vpop.f32.mrf.mxu0 }
 0x241   :  { %v254_v49 = vsub.f32 1.0, %v241_v43 }
 0x297   :  { %v245_v42 = vpop.permute.xlu0 %244 }
 0x298   :  { %v247_v44 = vmul.f32 %v245_v42, %v241_v43 }
 0x29a   :  { %249 = vrot.lane.b32.xlu0 %v247_v44, %s3212_s4 }
 0x30c   :  { %v250_v45 = vpop.permute.xlu0 %249 }
 0x30d   :  { %v252_v46 = vadd.f32 %v250_v45, %v223_v29 }
 0x30f   :  { %3027 = vtanh.f32 %v252_v46 }
 0x315   :  { %v3028_v47 = vpop.eup %3027 }
 0x316   :  { %256 = vrot.lane.b32.xlu1 %v3028_v47, %s3213_s30 }
 0x31e   :  { %260 = vrot.lane.b32.xlu1 %v3020_v18, %s3211_s0  ;;  %v3488_v18 = vld [vmem:[%s4294_s14 + $0x8] sm:$0xff] }
 0x31f   :  { %365 = vmatpush.msrb.mxu3 %v3488_v18 }
 0x388   :  { %v257_v48 = vpop.permute.xlu1 %256 }
 0x389   :  { %v259_v51 = vmul.f32 %v257_v48, %v254_v49 }
 0x390   :  { %v261_v50 = vpop.permute.xlu1 %260 }
 0x391   :  { %v263_v52 = vmul.f32 %v261_v50, %v241_v43  ;;  %v2979_v43 = vld [vmem:[%s4299_s19] ss:$0 sm:$0xff] }
 0x393   :  { %v3427_v53 = vadd.f32 %v263_v52, %v259_v51 }
 0x395   :  { %266 = vrot.lane.b32.xlu2 %v3427_v53, %s3213_s30 }
 0x3ef   :  { %v267_v54 = vpop.permute.xlu2 %266 }
 0x3f0   :  { %2867 = vmatmul.msk.f32.vlgmr.msrb.gmra.mxu1 %vm142_vm3, %v267_v54 }
 0x3f1   :  { %614 = vmatpush.msrb.mxu1 %v3352_v8 }
 0x3f3   :  { %615 = vmatpush.msrb.mxu1 %v3364_v10 }
 0x3f5   :  { %616 = vmatpush.msrb.mxu1 %v3374_v12 }
 0x3f7   :  { %617 = vmatpush.msrb.mxu1 %v3387_v14 }
 0x46d   :  { %v287_v61 = vpop.f32.mrf.mxu1 }
 0x46e   :  { %v288_v62 = vadd.f32 %v3416_v21, %v287_v61  ;;  %v3493_v21 = vld [vmem:[%s4294_s14] sm:$0xff] }
 0x46f   :  { %366 = vmatpush.msrb.mxu3 %v3493_v21 }
 0x470   :  { %3029 = vtanh.f32 %v288_v62 }
 0x471   :  { %531 = vmatpush.msra.mxu3 %v3347_v7 }
 0x473   :  { %532 = vmatpush.msra.mxu3 %v3359_v9 }
 0x475   :  { %533 = vmatpush.msra.mxu3 %v3369_v11 }
 0x476   :  { %v3030_v63 = vpop.eup %3029 }
 0x477   :  { %2868 = vmatmul.msk.f32.vlgmr.msrb.gmra.mxu2 %vm199_vm4, %v3030_v63  ;;  %534 = vmatpush.msra.mxu3 %v3382_v13 }
 0x478   :  { %638 = vmatpush.msrb.mxu2 %v3404_v19 }
 0x47a   :  { %639 = vmatpush.msrb.mxu2 %v3409_v20 }
 0x47f   :  { %2874 = vmatmul.msk.f32.vlgmr.msra.gmra.mxu2 %vm142_vm3, %v267_v54 }
 0x4fa   :  { %v317_v2 = vpop.f32.mrf.mxu2 }
 0x4fb   :  { %v318_v3 = vadd.f32 %v2977_v0, %v317_v2 }
 0x4fd   :  { %v320_v5 = vsub.f32 %v167_v1, %v318_v3  ;;  %v322_v6 = vsub.f32 0.0, %v318_v3 }
 0x4ff   :  { %v323_v15 = vmul.f32 1.442695, %v322_v6  ;;  %v321_v16 = vmul.f32 %v320_v5, %v168_v4 }
 0x501   :  { %3031 = vpow2.f32 %v323_v15  ;;  %331 = vrot.lane.b32.xlu0 %v321_v16, %s3214_s26 }
 0x502   :  { %v459_v44 = vpop.f32.mrf.mxu2 }
 0x507   :  { %v3032_v17 = vpop.eup %3031 }
 0x508   :  { %326 = vrot.lane.b32.xlu2 %v3032_v17, %s3215_s27 }
 0x509   :  { %376 = vrot.lane.b32.xlu0 %v168_v4, %s3214_s26 }
 0x510   :  { %373 = vrot.lane.b32.xlu2 %v168_v4, %s3216_s5 }
 0x562   :  { %v327_v22 = vpop.permute.xlu2 %326 }
 0x563   :  { %v329_v23 = vmul.f32 %v327_v22, %v321_v16 }
 0x565   :  { %335 = vrot.lane.b32.xlu1 %v329_v23, %s4304_s22 }
 0x56a   :  { %v374_v31 = vpop.permute.xlu2 %373 }
 0x56b   :  { %v380_v33 = vsel %vm379_vm11, %v168_v4, %v374_v31 }
 0x573   :  { %v332_v26 = vpop.permute.xlu0 %331 }
 0x574   :  { %v338_v27 = vsel %vm109_vm2, %v318_v3, %v332_v26 }
 0x57b   :  { %v377_v34 = vpop.permute.xlu0 %376 }
 0x57c   :  { %v381_v37 = vsel %vm109_vm2, %v380_v33, %v377_v34 }
 0x5d7   :  { %v336_v28 = vpop.permute.xlu1 %335 }
 0x5d8   :  { %v340_v29 = vsel %vm339_vm10, %v338_v27, %v336_v28 }
 0x5d9   :  { %341 = vst.msk [vmem:[#allocation2] sm:$0xff] %vm199_vm4, %v340_v29  ;;  %2869 = vmatmul.msk.f32.vlgmr.msrb.gmra.mxu3 %vm199_vm4, %v340_v29  ;;  %v2980_v29 = vld [vmem:[%s4293_s13] ss:$0 sm:$0xff] }
 0x5da   :  { %708 = vmatpush.msrb.mxu3 %v3347_v7 }
 0x5dc   :  { %709 = vmatpush.msrb.mxu3 %v3359_v9 }
 0x5de   :  { %710 = vmatpush.msrb.mxu3 %v3369_v11 }
 0x5e0   :  { %711 = vmatpush.msrb.mxu3 %v3382_v13 }
 0x65c   :  { %v368_v35 = vpop.f32.mrf.mxu3 }
 0x65d   :  { %v369_v36 = vadd.f32 %v2978_v32, %v368_v35 }
 0x65f   :  { %v371_v38 = vmax.f32 %v369_v36, 0.0 }
 0x661   :  { %v382_v39 = vmul.f32 %v381_v37, %v371_v38 }
 0x663   :  { %2873 = vmatmul.msk.f32.vlgmr.msra.gmra.mxu1 %vm339_vm10, %v382_v39 }
 0x664   :  { %791 = vmatpush.msra.mxu1 %v3488_v18 }
 0x666   :  { %792 = vmatpush.msra.mxu1 %v3493_v21 }
 0x6e0   :  { %v435_v41 = vpop.f32.mrf.mxu1 }
 0x6e1   :  { %v436_v42 = vadd.f32 %v435_v41, %v409_v40 }
 0x6e3   :  { %v462_v45 = vadd.f32 %v459_v44, %v436_v42 }
 0x6e5   :  { %v467_v46 = vadd.f32 %v2979_v43, %v462_v45 }
 0x6e7   :  { %488 = vrot.lane.b32.xlu1 %v467_v46, %s3211_s0  ;;  %v2875_v47 = vmul.f32 -1.442695, %v467_v46 }
 0x6e9   :  { %3033 = vpow2.f32 %v2875_v47 }
 0x6ef   :  { %v3034_v48 = vpop.eup %3033 }
 0x6f0   :  { %v471_v49 = vadd.f32 1.0, %v3034_v48 }
 0x6f2   :  { %3035 = vrcp.f32 %v471_v49  ;;  %v483_v62 = vand.u32 2147483648, %v471_v49  ;;  %vm477_vm13 = vweird.f32 %v471_v49  ;;  %v481_v63 = vand.u32 2147483647, %v471_v49 }
 0x6f4   :  { %v484_v1 = vor.u32 1.1754944e-38, %v483_v62  ;;  %vm482_vm15 = vcmp.eq.f32.partialorder %v481_v63, 8.507059e+37 }
 0x6f8   :  { %v3036_v50 = vpop.eup %3035 }
 0x6f9   :  { %v473_v51 = vmul.f32 %v3036_v50, %v471_v49  ;;  %vm478_vm12 = vweird.f32 %v3036_v50 }
 0x6fa   :  { %vm479_vm14 = vmor %vm477_vm13, %vm478_vm12 }
 0x6fb   :  { %v474_v52 = vsub.f32 1.0, %v473_v51 }
 0x6fd   :  { %v475_v54 = vmul.f32 %v3036_v50, %v474_v52 }
 0x6ff   :  { %v476_v61 = vadd.f32 %v3036_v50, %v475_v54 }
 0x701   :  { %v480_v0 = vsel %vm479_vm14, %v3036_v50, %v476_v61 }
 0x702   :  { %v485_v3 = vsel %vm482_vm15, %v484_v1, %v480_v0 }
 0x703   :  { %v498_v16 = vsub.f32 1.0, %v485_v3  ;;  %v504_v22 = vmul.f32 %v485_v3, %v3427_v53  ;;  %v2981_v53 = vld [vmem:[%s4288_s8] ss:$0 sm:$0xff] }
 0x759   :  { %v489_v2 = vpop.permute.xlu1 %488 }
 0x75a   :  { %v491_v4 = vmul.f32 %v489_v2, %v485_v3  ;;  %v2983_v2 = vld [vmem:[%s4288_s8] ss:$0 sm:$0xff] }
 0x75c   :  { %493 = vrot.lane.b32.xlu2 %v491_v4, %s3212_s4 }
 0x7b6   :  { %v494_v5 = vpop.permute.xlu2 %493 }
 0x7b7   :  { %v496_v6 = vadd.f32 %v494_v5, %v467_v46 }
 0x7b9   :  { %3037 = vtanh.f32 %v496_v6 }
 0x7bf   :  { %v3038_v15 = vpop.eup %3037 }
 0x7c0   :  { %500 = vrot.lane.b32.xlu0 %v3038_v15, %s3213_s30  ;;  %v2984_v15 = vld [vmem:[%s4290_s10] ss:$0 sm:$0xff] }
 0x832   :  { %v501_v17 = vpop.permute.xlu0 %500 }
 0x833   :  { %v503_v23 = vmul.f32 %v501_v17, %v498_v16  ;;  %v2878_v16 = vld [vmem:[%s4316_s1 + $0x8] sm:$0xff] }
 0x835   :  { %v505_v24 = vadd.f32 %v504_v22, %v503_v23 }
 0x837   :  { %515 = vrot.lane.b32.xlu1 %v505_v24, %s3213_s30 }
 0x8a9   :  { %v516_v25 = vpop.permute.xlu1 %515 }
 0x8aa   :  { %2876 = vmatmul.msk.f32.vlgmr.msra.gmra.mxu3 %vm142_vm3, %v516_v25  ;;  %2880 = vmatmul.msk.f32.vlgmr.msrb.gmra.mxu1 %vm142_vm3, %v516_v25 }
 0x8ab   :  { %955 = vmatpush.msrb.mxu1 %v3347_v7 }
 0x8ad   :  { %956 = vmatpush.msrb.mxu1 %v3359_v9 }
 0x8af   :  { %957 = vmatpush.msrb.mxu1 %v3369_v11 }
 0x8b1   :  { %958 = vmatpush.msrb.mxu1 %v3382_v13 }
 0x927   :  { %v619_v31 = vpop.f32.mrf.mxu1 }
 0x928   :  { %v620_v32 = vadd.f32 %v2980_v29, %v619_v31  ;;  %v809_v29 = vld [vmem:[%s4296_s16 + $0x8] sm:$0xf] }
 0x929   :  { %2888 = vmatpush.msk.msra.mxu3 %vm388_vm9, %v809_v29 }
 0x92b   :  { %857 = vmatpush.msra.mxu3 %v3524_v30 }
 0x92d   :  { %v536_v26 = vpop.f32.mrf.mxu3 }
 0x92e   :  { %v537_v27 = vadd.f32 %v2981_v53, %v536_v26 }
 0x930   :  { %3039 = vtanh.f32 %v537_v27 }
 0x936   :  { %v3040_v28 = vpop.eup %3039 }
 0x937   :  { %2877 = vmatmul.msk.f32.vlgmr.msrb.gmra.mxu0 %vm199_vm4, %v3040_v28  ;;  %2881 = vmatmul.msk.f32.vlgmr.msrb.gmra.mxu2 %vm199_vm4, %v3040_v28  ;;  %v810_v28 = vld [vmem:[%s4297_s17] sm:$0xf] }
 0x938   :  { %878 = vmatpush.msrb.mxu0 %v3447_v57  ;;  %2886 = vmatpush.msk.msra.mxu2 %vm388_vm9, %v810_v28 }
 0x93a   :  { %879 = vmatpush.msrb.mxu0 %v3452_v58  ;;  %987 = vmatpush.msrb.mxu2 %v3435_v55 }
 0x93c   :  { %880 = vmatpush.msrb.mxu0 %v3458_v59  ;;  %988 = vmatpush.msrb.mxu2 %v3440_v56 }
 0x93e   :  { %881 = vmatpush.msrb.mxu0 %v3464_v60 }
 0x9b4   :  { %v3583_v6 = vpop.f32.mrf.mxu0 }
 0x9ba   :  { %v641_v33 = vpop.f32.mrf.mxu2 }
 0x9bb   :  { %v644_v34 = vadd.f32 %v641_v33, %v620_v32 }
 0x9bd   :  { %665 = vrot.lane.b32.xlu2 %v644_v34, %s3211_s0  ;;  %v2882_v35 = vmul.f32 -1.442695, %v644_v34 }
 0x9bf   :  { %3041 = vpow2.f32 %v2882_v35 }
 0x9c5   :  { %v3042_v36 = vpop.eup %3041 }
 0x9c6   :  { %v648_v37 = vadd.f32 1.0, %v3042_v36 }
 0x9c8   :  { %3043 = vrcp.f32 %v648_v37  ;;  %v660_v43 = vand.u32 2147483648, %v648_v37  ;;  %vm654_vm1 = vweird.f32 %v648_v37  ;;  %v658_v44 = vand.u32 2147483647, %v648_v37 }
 0x9ca   :  { %v661_v46 = vor.u32 1.1754944e-38, %v660_v43  ;;  %vm659_vm6 = vcmp.eq.f32.partialorder %v658_v44, 8.507059e+37 }
 0x9ce   :  { %v3044_v38 = vpop.eup %3043 }
 0x9cf   :  { %v650_v39 = vmul.f32 %v3044_v38, %v648_v37  ;;  %vm655_vm0 = vweird.f32 %v3044_v38  ;;  %v2986_v37 = vld [vmem:[%s4299_s19] ss:$0 sm:$0xff] }
 0x9d0   :  { %vm656_vm5 = vmor %vm654_vm1, %vm655_vm0 }
 0x9d1   :  { %v651_v40 = vsub.f32 1.0, %v650_v39 }
 0x9d3   :  { %v652_v41 = vmul.f32 %v3044_v38, %v651_v40 }
 0x9d5   :  { %v653_v42 = vadd.f32 %v3044_v38, %v652_v41 }
 0x9d7   :  { %v657_v45 = vsel %vm656_vm5, %v3044_v38, %v653_v42 }
 0x9d8   :  { %v662_v48 = vsel %vm659_vm6, %v661_v46, %v657_v45 }
 0x9d9   :  { %v675_v54 = vsub.f32 1.0, %v662_v48  ;;  %v681_v62 = vmul.f32 %v662_v48, %v505_v24 }
 0xa17   :  { %v666_v47 = vpop.permute.xlu2 %665 }
 0xa18   :  { %v668_v49 = vmul.f32 %v666_v47, %v662_v48 }
 0xa1a   :  { %670 = vrot.lane.b32.xlu0 %v668_v49, %s3212_s4 }
 0xa8c   :  { %v671_v50 = vpop.permute.xlu0 %670 }
 0xa8d   :  { %v673_v51 = vadd.f32 %v671_v50, %v644_v34 }
 0xa8f   :  { %3045 = vtanh.f32 %v673_v51 }
 0xa95   :  { %v3046_v52 = vpop.eup %3045 }
 0xa96   :  { %677 = vrot.lane.b32.xlu1 %v3046_v52, %s3213_s30 }
 0xb08   :  { %v678_v61 = vpop.permute.xlu1 %677 }
 0xb09   :  { %v680_v63 = vmul.f32 %v678_v61, %v675_v54 }
 0xb0b   :  { %v3571_v0 = vadd.f32 %v681_v62, %v680_v63 }
 0xb0d   :  { %692 = vrot.lane.b32.xlu2 %v3571_v0, %s3213_s30 }
 0xb67   :  { %v693_v1 = vpop.permute.xlu2 %692 }
 0xb68   :  { %2883 = vmatmul.msk.f32.vlgmr.msrb.gmra.mxu3 %vm142_vm3, %v693_v1 }
 0xb69   :  { %1039 = vmatpush.msrb.mxu3 %v3352_v8 }
 0xb6b   :  { %1040 = vmatpush.msrb.mxu3 %v3364_v10  ;;  %v2985_v10 = vld [vmem:[%s4295_s15] ss:$0 sm:$0xff] }
 0xb6d   :  { %1041 = vmatpush.msrb.mxu3 %v3374_v12 }
 0xb6f   :  { %1042 = vmatpush.msrb.mxu3 %v3387_v14 }
 0xbeb   :  { %v713_v3 = vpop.f32.mrf.mxu3 }
 0xbec   :  { %v714_v4 = vadd.f32 %v2983_v2, %v713_v3 }
 0xbee   :  { %3047 = vtanh.f32 %v714_v4 }
 0xbf4   :  { %v3048_v5 = vpop.eup %3047 }
 0xbf5   :  { %2884 = vmatmul.msk.f32.vlgmr.msra.gmra.mxu0 %vm199_vm4, %v3048_v5 }
 0xbf6   :  { %1063 = vmatpush.msra.mxu0 %v3404_v19  ;;  %v2879_v19 = vld [vmem:[%s4317_s25 + $0x8] sm:$0xff] }
 0xbf7   :  { %2887 = vmatmul.msk.f32.vlgmr.msra.gmra.mxu2 %vm379_vm11, %v2879_v19 }
 0xbf8   :  { %1064 = vmatpush.msra.mxu0 %v3409_v20  ;;  %1165 = vmatpush.msra.mxu2 %v3435_v55 }
 0xbfa   :  { %1166 = vmatpush.msra.mxu2 %v3440_v56 }
 0xbfd   :  { %2890 = vmatmul.msk.f32.vlgmr.msrb.gmra.mxu0 %vm142_vm3, %v693_v1 }
 0xc72   :  { %v743_v17 = vpop.f32.mrf.mxu0 }
 0xc73   :  { %v744_v22 = vadd.f32 %v2984_v15, %v743_v17 }
 0xc75   :  { %v746_v23 = vsub.f32 %v2878_v16, %v744_v22  ;;  %v748_v20 = vsub.f32 0.0, %v744_v22  ;;  %v2987_v16 = vld [vmem:[%s4288_s8] ss:$0 sm:$0xff] }
 0xc77   :  { %v749_v24 = vmul.f32 1.442695, %v748_v20  ;;  %v747_v25 = vmul.f32 %v2879_v19, %v746_v23 }
 0xc79   :  { %3049 = vpow2.f32 %v749_v24  ;;  %757 = vrot.lane.b32.xlu1 %v747_v25, %s3214_s26 }
 0xc7a   :  { %v883_v38 = vpop.f32.mrf.mxu0 }
 0xc7f   :  { %v3050_v53 = vpop.eup %3049 }
 0xc80   :  { %752 = vrot.lane.b32.xlu0 %v3050_v53, %s3215_s27 }
 0xc81   :  { %802 = vrot.lane.b32.xlu1 %v2879_v19, %s3214_s26 }
 0xc88   :  { %799 = vrot.lane.b32.xlu0 %v2879_v19, %s3216_s5 }
 0xceb   :  { %v758_v31 = vpop.permute.xlu1 %757 }
 0xcec   :  { %v764_v32 = vsel %vm109_vm2, %v744_v22, %v758_v31 }
 0xcf2   :  { %v753_v26 = vpop.permute.xlu0 %752 }
 0xcf3   :  { %v755_v27 = vmul.f32 %v753_v26, %v747_v25  ;;  %v803_v14 = vpop.permute.xlu1 %802 }
 0xcf5   :  { %761 = vrot.lane.b32.xlu2 %v755_v27, %s4304_s22 }
 0xcfa   :  { %v800_v8 = vpop.permute.xlu0 %799 }
 0xcfb   :  { %v805_v12 = vsel %vm379_vm11, %v2879_v19, %v800_v8 }
 0xcfc   :  { %v806_v35 = vsel %vm109_vm2, %v805_v12, %v803_v14 }
 0xd4f   :  { %v762_v33 = vpop.permute.xlu2 %761 }
 0xd50   :  { %v765_v34 = vsel %vm339_vm10, %v764_v32, %v762_v33 }
 0xd51   :  { %767 = vst.msk [vmem:[#allocation2 + $0x8] sm:$0xff] %vm199_vm4, %v765_v34  ;;  %2885 = vmatmul.msk.f32.vlgmr.msra.gmra.mxu1 %vm199_vm4, %v765_v34 }
 0xd52   :  { %1133 = vmatpush.msra.mxu1 %v3347_v7 }
 0xd54   :  { %1134 = vmatpush.msra.mxu1 %v3359_v9  ;;  %v833_v9 = vpop.f32.mrf.mxu2 }
 0xd56   :  { %1135 = vmatpush.msra.mxu1 %v3369_v11 }
 0xd58   :  { %1136 = vmatpush.msra.mxu1 %v3382_v13 }
 0xdce   :  { %v794_v55 = vpop.f32.mrf.mxu1 }
 0xdcf   :  { %v795_v56 = vadd.f32 %v2985_v10, %v794_v55 }
 0xdd1   :  { %v797_v36 = vmax.f32 %v795_v56, 0.0 }
 0xdd3   :  { %v807_v7 = vmul.f32 %v806_v35, %v797_v36 }
 0xdd5   :  { %2889 = vmatmul.msk.f32.vlgmr.msra.gmra.mxu3 %vm339_vm10, %v807_v7 }
 0xdd6   :  { %1216 = vmatpush.msra.mxu3 %v3488_v18 }
 0xdd8   :  { %1217 = vmatpush.msra.mxu3 %v3493_v21 }
 0xe58   :  { %v859_v11 = vpop.f32.mrf.mxu3 }
 0xe59   :  { %v860_v13 = vadd.f32 %v859_v11, %v833_v9 }
 0xe5b   :  { %v886_v39 = vadd.f32 %v883_v38, %v860_v13  ;;  %v2990_v13 = vld [vmem:[%s4288_s8] ss:$0 sm:$0xff] }
 0xe5d   :  { %v891_v40 = vadd.f32 %v2986_v37, %v886_v39 }
 0xe5f   :  { %912 = vrot.lane.b32.xlu2 %v891_v40, %s3211_s0  ;;  %v2891_v41 = vmul.f32 -1.442695, %v891_v40 }
 0xe61   :  { %3051 = vpow2.f32 %v2891_v41  ;;  %v2991_v41 = vld [vmem:[%s4290_s10] ss:$0 sm:$0xff] }
 0xe67   :  { %v3052_v42 = vpop.eup %3051 }
 0xe68   :  { %v895_v43 = vadd.f32 1.0, %v3052_v42  ;;  %v2894_v42 = vld [vmem:[%s4316_s1 + $0x10] sm:$0xff] }
 0xe6a   :  { %3053 = vrcp.f32 %v895_v43  ;;  %v907_v47 = vand.u32 2147483648, %v895_v43  ;;  %vm901_vm8 = vweird.f32 %v895_v43  ;;  %v905_v48 = vand.u32 2147483647, %v895_v43 }
 0xe6c   :  { %v908_v50 = vor.u32 1.1754944e-38, %v907_v47  ;;  %vm906_vm13 = vcmp.eq.f32.partialorder %v905_v48, 8.507059e+37 }
 0xe70   :  { %v3054_v18 = vpop.eup %3053 }
 0xe71   :  { %v897_v44 = vmul.f32 %v3054_v18, %v895_v43  ;;  %vm902_vm7 = vweird.f32 %v3054_v18 }
 0xe72   :  { %vm903_vm12 = vmor %vm901_vm8, %vm902_vm7 }
 0xe73   :  { %v898_v21 = vsub.f32 1.0, %v897_v44  ;;  %v2895_v44 = vld [vmem:[%s4317_s25 + $0x10] sm:$0xff] }
 0xe75   :  { %v899_v45 = vmul.f32 %v3054_v18, %v898_v21 }
 0xe77   :  { %v900_v46 = vadd.f32 %v3054_v18, %v899_v45 }
 0xe79   :  { %v904_v49 = vsel %vm903_vm12, %v3054_v18, %v900_v46 }
 0xe7a   :  { %v909_v52 = vsel %vm906_vm13, %v908_v50, %v904_v49 }
 0xe7b   :  { %v922_v1 = vsub.f32 1.0, %v909_v52  ;;  %v928_v3 = vmul.f32 %v909_v52, %v3571_v0  ;;  %v2988_v0 = vld [vmem:[%s4293_s13] ss:$0 sm:$0xff] }
 0xeb9   :  { %v913_v51 = vpop.permute.xlu2 %912 }
 0xeba   :  { %v915_v54 = vmul.f32 %v913_v51, %v909_v52  ;;  %v1235_v51 = vld [vmem:[%s4297_s17] sm:$0xf]  ;;  %v1234_v52 = vld [vmem:[%s4296_s16 + $0x8] sm:$0xf] }
 0xebb   :  { %2902 = vmatpush.msk.msrb.mxu0 %vm388_vm9, %v1235_v51  ;;  %v2994_v51 = vld [vmem:[%s4293_s13] ss:$0 sm:$0xff] }
 0xebc   :  { %917 = vrot.lane.b32.xlu0 %v915_v54, %s3212_s4 }
 0xf2e   :  { %v918_v61 = vpop.permute.xlu0 %917 }
 0xf2f   :  { %v920_v62 = vadd.f32 %v918_v61, %v891_v40 }
 0xf31   :  { %3055 = vtanh.f32 %v920_v62 }
 0xf37   :  { %v3056_v63 = vpop.eup %3055 }
 0xf38   :  { %924 = vrot.lane.b32.xlu1 %v3056_v63, %s3213_s30 }
 0xfaa   :  { %v925_v2 = vpop.permute.xlu1 %924 }
 0xfab   :  { %v927_v4 = vmul.f32 %v925_v2, %v922_v1  ;;  %v2992_v2 = vld [vmem:[%s4295_s15] ss:$0 sm:$0xff] }
 0xfad   :  { %v929_v5 = vadd.f32 %v928_v3, %v927_v4 }
 0xfaf   :  { %939 = vrot.lane.b32.xlu2 %v929_v5, %s3213_s30 }
0x1009   :  { %v940_v15 = vpop.permute.xlu2 %939 }
0x100a   :  { %2892 = vmatmul.msk.f32.vlgmr.msrb.gmra.mxu1 %vm142_vm3, %v940_v15  ;;  %2896 = vmatmul.msk.f32.vlgmr.msrb.gmra.mxu3 %vm142_vm3, %v940_v15 }
0x100b   :  { %2904 = vmatpush.msk.msrb.mxu1 %vm388_vm9, %v1234_v52 }
0x100d   :  { %1282 = vmatpush.msrb.mxu1 %v3524_v30 }
0x1087   :  { %v960_v17 = vpop.f32.mrf.mxu1 }
0x1088   :  { %v961_v22 = vadd.f32 %v2987_v16, %v960_v17 }
0x108a   :  { %3057 = vtanh.f32 %v961_v22 }
0x108d   :  { %v1044_v23 = vpop.f32.mrf.mxu3 }
0x108e   :  { %v1045_v20 = vadd.f32 %v2988_v0, %v1044_v23  ;;  %v2993_v23 = vld [vmem:[%s4299_s19] ss:$0 sm:$0xff] }
0x1090   :  { %v3058_v19 = vpop.eup %3057 }
0x1091   :  { %2893 = vmatmul.msk.f32.vlgmr.msrb.gmra.mxu2 %vm199_vm4, %v3058_v19  ;;  %2897 = vmatmul.msk.f32.vlgmr.msra.gmra.mxu0 %vm199_vm4, %v3058_v19 }
0x1092   :  { %1303 = vmatpush.msrb.mxu2 %v3447_v57 }
0x1094   :  { %1304 = vmatpush.msrb.mxu2 %v3452_v58 }
0x1096   :  { %1305 = vmatpush.msrb.mxu2 %v3458_v59 }
0x1098   :  { %1306 = vmatpush.msrb.mxu2 %v3464_v60 }
0x1099   :  { %2903 = vmatmul.msk.f32.vlgmr.msrb.gmra.mxu0 %vm379_vm11, %v2895_v44 }
0x110e   :  { %v1066_v24 = vpop.f32.mrf.mxu0 }
0x110f   :  { %v1069_v25 = vadd.f32 %v1066_v24, %v1045_v20 }
0x1111   :  { %1090 = vrot.lane.b32.xlu0 %v1069_v25, %s3211_s0  ;;  %v2898_v53 = vmul.f32 -1.442695, %v1069_v25 }
0x1113   :  { %3059 = vpow2.f32 %v2898_v53 }
0x1114   :  { %v3668_v40 = vpop.f32.mrf.mxu2 }
0x1116   :  { %v1258_v22 = vpop.f32.mrf.mxu0 }
0x1119   :  { %v3060_v26 = vpop.eup %3059 }
0x111a   :  { %v1073_v57 = vadd.f32 1.0, %v3060_v26 }
0x111c   :  { %3061 = vrcp.f32 %v1073_v57  ;;  %v1085_v29 = vand.u32 2147483648, %v1073_v57  ;;  %vm1079_vm15 = vweird.f32 %v1073_v57  ;;  %v1083_v31 = vand.u32 2147483647, %v1073_v57 }
0x111e   :  { %v1086_v33 = vor.u32 1.1754944e-38, %v1085_v29  ;;  %vm1084_vm1 = vcmp.eq.f32.partialorder %v1083_v31, 8.507059e+37 }
0x1122   :  { %v3062_v58 = vpop.eup %3061 }
0x1123   :  { %v1075_v27 = vmul.f32 %v3062_v58, %v1073_v57  ;;  %vm1080_vm14 = vweird.f32 %v3062_v58 }
0x1124   :  { %vm1081_vm0 = vmor %vm1079_vm15, %vm1080_vm14 }
0x1125   :  { %v1076_v59 = vsub.f32 1.0, %v1075_v27 }
0x1127   :  { %v1077_v28 = vmul.f32 %v3062_v58, %v1076_v59 }
0x1129   :  { %v1078_v60 = vadd.f32 %v3062_v58, %v1077_v28 }
0x112b   :  { %v1082_v32 = vsel %vm1081_vm0, %v3062_v58, %v1078_v60 }
0x112c   :  { %v1087_v8 = vsel %vm1084_vm1, %v1086_v33, %v1082_v32 }
0x112d   :  { %v1100_v56 = vsub.f32 1.0, %v1087_v8  ;;  %v1106_v36 = vmul.f32 %v1087_v8, %v929_v5 }
0x1183   :  { %v1091_v34 = vpop.permute.xlu0 %1090 }
0x1184   :  { %v1093_v10 = vmul.f32 %v1091_v34, %v1087_v8 }
0x1186   :  { %1095 = vrot.lane.b32.xlu1 %v1093_v10, %s3212_s4 }
0x11f8   :  { %v1096_v12 = vpop.permute.xlu1 %1095 }
0x11f9   :  { %v1098_v14 = vadd.f32 %v1096_v12, %v1069_v25 }
0x11fb   :  { %3063 = vtanh.f32 %v1098_v14 }
0x1201   :  { %v3064_v55 = vpop.eup %3063 }
0x1202   :  { %1102 = vrot.lane.b32.xlu2 %v3064_v55, %s3213_s30 }
0x125c   :  { %v1103_v35 = vpop.permute.xlu2 %1102 }
0x125d   :  { %v1105_v7 = vmul.f32 %v1103_v35, %v1100_v56  ;;  %v3713_v56 = vld [vmem:[%s4287_s7 + $0x18] sm:$0xff] }
0x125e   :  { %v3718_v35 = vld [vmem:[%s4292_s12 + $0x18] sm:$0xff]  ;;  %1380 = vmatpush.msrb.mxu3 %v3713_v56 }
0x125f   :  { %v3658_v9 = vadd.f32 %v1106_v36, %v1105_v7  ;;  %v3723_v36 = vld [vmem:[%s4287_s7 + $0x10] sm:$0xff] }
0x1260   :  { %v3730_v7 = vld [vmem:[%s4292_s12 + $0x10] sm:$0xff]  ;;  %1381 = vmatpush.msrb.mxu3 %v3723_v36 }
0x1261   :  { %1117 = vrot.lane.b32.xlu0 %v3658_v9, %s3213_s30 }
0x12d3   :  { %v1118_v11 = vpop.permute.xlu0 %1117 }
0x12d4   :  { %2899 = vmatmul.msk.f32.vlgmr.msra.gmra.mxu1 %vm142_vm3, %v1118_v11 }
0x12d5   :  { %1464 = vmatpush.msra.mxu1 %v3718_v35 }
0x12d7   :  { %1465 = vmatpush.msra.mxu1 %v3730_v7 }
0x1351   :  { %v1138_v37 = vpop.f32.mrf.mxu1 }
0x1352   :  { %v1139_v38 = vadd.f32 %v2990_v13, %v1138_v37  ;;  %v3740_v13 = vld [vmem:[%s4292_s12 + $0x8] sm:$0xff]  ;;  %v3747_v37 = vld [vmem:[%s4287_s7] sm:$0xff] }
0x1353   :  { %1466 = vmatpush.msra.mxu1 %v3740_v13 }
0x1354   :  { %3065 = vtanh.f32 %v1139_v38  ;;  %v3752_v38 = vld [vmem:[%s4292_s12] sm:$0xff] }
0x1355   :  { %1467 = vmatpush.msra.mxu1 %v3752_v38 }
0x135a   :  { %v3066_v39 = vpop.eup %3065 }
0x135b   :  { %2900 = vmatmul.msk.f32.vlgmr.msra.gmra.mxu2 %vm199_vm4, %v3066_v39 }
0x1363   :  { %2906 = vmatmul.msk.f32.vlgmr.msrb.gmra.mxu2 %vm142_vm3, %v1118_v11  ;;  %v3735_v11 = vld [vmem:[%s4287_s7 + $0x8] sm:$0xff] }
0x1364   :  { %1382 = vmatpush.msrb.mxu3 %v3735_v11 }
0x1366   :  { %1383 = vmatpush.msrb.mxu3 %v3747_v37 }
0x13de   :  { %v1168_v43 = vpop.f32.mrf.mxu2 }
0x13df   :  { %v1169_v18 = vadd.f32 %v2991_v41, %v1168_v43 }
0x13e1   :  { %v1171_v21 = vsub.f32 %v2894_v42, %v1169_v18  ;;  %v1173_v45 = vsub.f32 0.0, %v1169_v18 }
0x13e3   :  { %v1174_v46 = vmul.f32 1.442695, %v1173_v45  ;;  %v1172_v47 = vmul.f32 %v2895_v44, %v1171_v21  ;;  %v3769_v21 = vld [vmem:[%s4291_s11 + $0x8] sm:$0xff]  ;;  %v3774_v45 = vld [vmem:[%s4291_s11] sm:$0xff] }
0x13e4   :  { %1488 = vmatpush.msra.mxu2 %v3769_v21 }
0x13e5   :  { %3067 = vpow2.f32 %v1174_v46  ;;  %1182 = vrot.lane.b32.xlu2 %v1172_v47, %s3214_s26  ;;  %v3786_v46 = vld [vmem:[%s4289_s9] sm:$0xff] }
0x13e6   :  { %v1308_v20 = vpop.f32.mrf.mxu2  ;;  %1489 = vmatpush.msra.mxu2 %v3774_v45 }
0x13eb   :  { %v3068_v48 = vpop.eup %3067 }
0x13ec   :  { %1177 = vrot.lane.b32.xlu1 %v3068_v48, %s3215_s27 }
0x13ed   :  { %1227 = vrot.lane.b32.xlu2 %v2895_v44, %s3214_s26 }
0x13f4   :  { %1224 = vrot.lane.b32.xlu1 %v2895_v44, %s3216_s5 }
0x143f   :  { %v1183_v54 = vpop.permute.xlu2 %1182 }
0x1440   :  { %v1189_v61 = vsel %vm109_vm2, %v1169_v18, %v1183_v54 }
0x1447   :  { %v1228_v4 = vpop.permute.xlu2 %1227 }
0x145e   :  { %v1178_v49 = vpop.permute.xlu1 %1177 }
0x145f   :  { %v1180_v50 = vmul.f32 %v1178_v49, %v1172_v47  ;;  %v2995_v47 = vld [vmem:[%s4288_s8] ss:$0 sm:$0xff] }
0x1461   :  { %1186 = vrot.lane.b32.xlu0 %v1180_v50, %s4304_s22  ;;  %s4318_s22 = smov 12  }
0x1466   :  { %v1225_v1 = vpop.permute.xlu1 %1224 }
0x1467   :  { %v1230_v3 = vsel %vm379_vm11, %v2895_v44, %v1225_v1 }
0x1468   :  { %v1231_v15 = vsel %vm109_vm2, %v1230_v3, %v1228_v4 }
0x14d3   :  { %v1187_v62 = vpop.permute.xlu0 %1186 }
0x14d4   :  { %v1190_v63 = vsel %vm339_vm10, %v1189_v61, %v1187_v62 }
0x14d5   :  { %1192 = vst.msk [vmem:[#allocation2 + $0x10] sm:$0xff] %vm199_vm4, %v1190_v63  ;;  %2901 = vmatmul.msk.f32.vlgmr.msra.gmra.mxu3 %vm199_vm4, %v1190_v63 }
0x14d6   :  { %1558 = vmatpush.msra.mxu3 %v3713_v56 }
0x14d8   :  { %1559 = vmatpush.msra.mxu3 %v3723_v36 }
0x14da   :  { %1560 = vmatpush.msra.mxu3 %v3735_v11 }
0x14dc   :  { %1561 = vmatpush.msra.mxu3 %v3747_v37 }
0x1558   :  { %v1219_v5 = vpop.f32.mrf.mxu3 }
0x1559   :  { %v1220_v30 = vadd.f32 %v2992_v2, %v1219_v5 }
0x155b   :  { %v1222_v16 = vmax.f32 %v1220_v30, 0.0 }
0x155d   :  { %v1232_v17 = vmul.f32 %v1231_v15, %v1222_v16 }
0x155f   :  { %2905 = vmatmul.msk.f32.vlgmr.msrb.gmra.mxu1 %vm339_vm10, %v1232_v17 }
0x15dc   :  { %v1284_v19 = vpop.f32.mrf.mxu1 }
0x15dd   :  { %v1285_v0 = vadd.f32 %v1284_v19, %v1258_v22 }
0x15df   :  { %v1311_v24 = vadd.f32 %v1308_v20, %v1285_v0 }
0x15e1   :  { %v1316_v25 = vadd.f32 %v2993_v23, %v1311_v24 }
0x15e3   :  { %1337 = vrot.lane.b32.xlu0 %v1316_v25, %s3211_s0  ;;  %v2907_v53 = vmul.f32 -1.442695, %v1316_v25 }
0x15e5   :  { %3069 = vpow2.f32 %v2907_v53 }
0x15eb   :  { %v3070_v26 = vpop.eup %3069 }
0x15ec   :  { %v1320_v57 = vadd.f32 1.0, %v3070_v26 }
0x15ee   :  { %3071 = vrcp.f32 %v1320_v57  ;;  %v1332_v29 = vand.u32 2147483648, %v1320_v57  ;;  %vm1326_vm6 = vweird.f32 %v1320_v57  ;;  %v1330_v31 = vand.u32 2147483647, %v1320_v57 }
0x15f0   :  { %v1333_v33 = vor.u32 1.1754944e-38, %v1332_v29  ;;  %vm1331_vm8 = vcmp.eq.f32.partialorder %v1330_v31, 8.507059e+37  ;;  %v3816_v29 = vld [vmem:[%s4298_s18 + $0x10] sm:$0xff]  ;;  %v3822_v31 = vld [vmem:[%s4298_s18 + $0x8] sm:$0xff] }
0x15f4   :  { %v3072_v58 = vpop.eup %3071 }
0x15f5   :  { %v1322_v27 = vmul.f32 %v3072_v58, %v1320_v57  ;;  %vm1327_vm5 = vweird.f32 %v3072_v58 }
0x15f6   :  { %vm1328_vm7 = vmor %vm1326_vm6, %vm1327_vm5 }
0x15f7   :  { %v1323_v59 = vsub.f32 1.0, %v1322_v27 }
0x15f9   :  { %v1324_v28 = vmul.f32 %v3072_v58, %v1323_v59 }
0x15fb   :  { %v1325_v60 = vadd.f32 %v3072_v58, %v1324_v28 }
0x15fd   :  { %v1329_v32 = vsel %vm1328_vm7, %v3072_v58, %v1325_v60  ;;  %v3811_v60 = vld [vmem:[%s4298_s18 + $0x18] sm:$0xff] }
0x15fe   :  { %v1334_v8 = vsel %vm1331_vm8, %v1333_v33, %v1329_v32  ;;  %v3828_v32 = vld [vmem:[%s4298_s18] sm:$0xff] }
0x15ff   :  { %v1347_v39 = vsub.f32 1.0, %v1334_v8  ;;  %v1353_v42 = vmul.f32 %v1334_v8, %v3658_v9  ;;  %v3779_v9 = vld [vmem:[%s4289_s9 + $0x8] sm:$0xff]  ;;  %v2997_v33 = vld [vmem:[%s4288_s8] ss:$0 sm:$0xff] }
0x1600   :  { %1412 = vmatpush.msra.mxu0 %v3779_v9 }
0x1602   :  { %1413 = vmatpush.msra.mxu0 %v3786_v46 }
0x1604   :  { %1590 = vmatpush.msrb.mxu0 %v3779_v9 }
0x1606   :  { %1591 = vmatpush.msrb.mxu0 %v3786_v46 }
0x1655   :  { %v1338_v34 = vpop.permute.xlu0 %1337 }
0x1656   :  { %v1340_v10 = vmul.f32 %v1338_v34, %v1334_v8 }
0x1658   :  { %1342 = vrot.lane.b32.xlu1 %v1340_v10, %s3212_s4 }
0x16ca   :  { %v1343_v12 = vpop.permute.xlu1 %1342 }
0x16cb   :  { %v1345_v14 = vadd.f32 %v1343_v12, %v1316_v25 }
0x16cd   :  { %3073 = vtanh.f32 %v1345_v14  ;;  %v2998_v14 = vld [vmem:[%s4290_s10] ss:$0 sm:$0xff] }
0x16d3   :  { %v3074_v55 = vpop.eup %3073 }
0x16d4   :  { %1349 = vrot.lane.b32.xlu2 %v3074_v55, %s3213_s30  ;;  %v3847_v55 = vld [vmem:[%s4316_s1 + $0x18] sm:$0xff] }
0x172e   :  { %v1350_v41 = vpop.permute.xlu2 %1349 }
0x172f   :  { %v1352_v43 = vmul.f32 %v1350_v41, %v1347_v39 }
0x1731   :  { %v1354_v18 = vadd.f32 %v1353_v42, %v1352_v43  ;;  %v3852_v42 = vld [vmem:[%s4317_s25 + $0x18] sm:$0xff] }
0x1733   :  { %1364 = vrot.lane.b32.xlu0 %v1354_v18, %s3213_s30 }
0x17a5   :  { %v1365_v44 = vpop.permute.xlu0 %1364 }
0x17a6   :  { %2908 = vmatmul.msk.f32.vlgmr.msrb.gmra.mxu3 %vm142_vm3, %v1365_v44  ;;  %2912 = vmatmul.msk.f32.vlgmr.msra.gmra.mxu1 %vm142_vm3, %v1365_v44 }
0x1823   :  { %v1469_v52 = vpop.f32.mrf.mxu1 }
0x1824   :  { %v1470_v54 = vadd.f32 %v2994_v51, %v1469_v52 }
0x1829   :  { %v1385_v48 = vpop.f32.mrf.mxu3 }
0x182a   :  { %v1386_v49 = vadd.f32 %v2995_v47, %v1385_v48 }
0x182c   :  { %3075 = vtanh.f32 %v1386_v49  ;;  %v1619_v49 = vld [vmem:[%s4294_s14 + $0x8] sm:$0xff] }
0x182d   :  { %1641 = vmatpush.msrb.mxu1 %v1619_v49 }
0x1832   :  { %v3076_v50 = vpop.eup %3075 }
0x1833   :  { %2909 = vmatmul.msk.f32.vlgmr.msra.gmra.mxu0 %vm199_vm4, %v3076_v50  ;;  %2913 = vmatmul.msk.f32.vlgmr.msra.gmra.mxu2 %vm199_vm4, %v3076_v50  ;;  %v1618_v50 = vld [vmem:[%s4294_s14] sm:$0xff] }
0x1834   :  { %1728 = vmatpush.msra.mxu0 %v3811_v60  ;;  %1642 = vmatpush.msrb.mxu1 %v1618_v50 }
0x1836   :  { %1729 = vmatpush.msra.mxu0 %v3816_v29  ;;  %1805 = vmatpush.msra.mxu1 %v3713_v56 }
0x1838   :  { %1730 = vmatpush.msra.mxu0 %v3822_v31  ;;  %1806 = vmatpush.msra.mxu1 %v3723_v36 }
0x183a   :  { %1731 = vmatpush.msra.mxu0 %v3828_v32  ;;  %1807 = vmatpush.msra.mxu1 %v3735_v11 }
0x183c   :  { %1808 = vmatpush.msra.mxu1 %v3747_v37 }
0x18b0   :  { %v3839_v12 = vpop.f32.mrf.mxu0 }
0x18b6   :  { %v1491_v61 = vpop.f32.mrf.mxu2 }
0x18b7   :  { %v1494_v62 = vadd.f32 %v1491_v61, %v1470_v54  ;;  %v1660_v54 = vld [vmem:[%s4297_s17] sm:$0xf]  ;;  %v1659_v61 = vld [vmem:[%s4296_s16 + $0x8] sm:$0xf] }
0x18b8   :  { %2918 = vmatpush.msk.msrb.mxu2 %vm388_vm9, %v1660_v54  ;;  %2920 = vmatpush.msk.msrb.mxu3 %vm388_vm9, %v1659_v61 }
0x18b9   :  { %1515 = vrot.lane.b32.xlu1 %v1494_v62, %s3211_s0  ;;  %v2914_v63 = vmul.f32 -1.442695, %v1494_v62  ;;  %2919 = vmatmul.msk.f32.vlgmr.msrb.gmra.mxu2 %vm379_vm11, %v3852_v42 }
0x18ba   :  { %1837 = vmatpush.msra.mxu2 %v3779_v9 }
0x18bb   :  { %3077 = vpow2.f32 %v2914_v63 }
0x18bc   :  { %1838 = vmatpush.msra.mxu2 %v3786_v46 }
0x18be   :  { %2015 = vmatpush.msrb.mxu2 %v3779_v9 }
0x18c0   :  { %2016 = vmatpush.msrb.mxu2 %v3786_v46 }
0x18c1   :  { %v3078_v1 = vpop.eup %3077 }
0x18c2   :  { %v1498_v2 = vadd.f32 1.0, %v3078_v1 }
0x18c4   :  { %3079 = vrcp.f32 %v1498_v2  ;;  %v1510_v16 = vand.u32 2147483648, %v1498_v2  ;;  %vm1504_vm13 = vweird.f32 %v1498_v2  ;;  %v1508_v17 = vand.u32 2147483647, %v1498_v2 }
0x18c6   :  { %v1511_v19 = vor.u32 1.1754944e-38, %v1510_v16  ;;  %vm1509_vm15 = vcmp.eq.f32.partialorder %v1508_v17, 8.507059e+37 }
0x18ca   :  { %v3080_v3 = vpop.eup %3079 }
0x18cb   :  { %v1500_v4 = vmul.f32 %v3080_v3, %v1498_v2  ;;  %vm1505_vm12 = vweird.f32 %v3080_v3 }
0x18cc   :  { %vm1506_vm14 = vmor %vm1504_vm13, %vm1505_vm12 }
0x18cd   :  { %v1501_v5 = vsub.f32 1.0, %v1500_v4 }
0x18cf   :  { %v1502_v30 = vmul.f32 %v3080_v3, %v1501_v5  ;;  %v2999_v5 = vld [vmem:[%s4295_s15] ss:$0 sm:$0xff] }
0x18d1   :  { %v1503_v15 = vadd.f32 %v3080_v3, %v1502_v30 }
0x18d3   :  { %v1507_v22 = vsel %vm1506_vm14, %v3080_v3, %v1503_v15  ;;  %v3898_v3 = vld [vmem:[%s4296_s16] sm:$0xff] }
0x18d4   :  { %v1512_v23 = vsel %vm1509_vm15, %v1511_v19, %v1507_v22  ;;  %1707 = vmatpush.msrb.mxu3 %v3898_v3 }
0x18d5   :  { %v1525_v26 = vsub.f32 1.0, %v1512_v23  ;;  %v1531_v58 = vmul.f32 %v1512_v23, %v1354_v18 }
0x192b   :  { %v1516_v0 = vpop.permute.xlu1 %1515 }
0x192c   :  { %v1518_v20 = vmul.f32 %v1516_v0, %v1512_v23 }
0x192e   :  { %1520 = vrot.lane.b32.xlu2 %v1518_v20, %s3212_s4 }
0x193c   :  { %v1683_v23 = vpop.f32.mrf.mxu2 }
0x1988   :  { %v1521_v24 = vpop.permute.xlu2 %1520 }
0x1989   :  { %v1523_v25 = vadd.f32 %v1521_v24, %v1494_v62 }
0x198b   :  { %3081 = vtanh.f32 %v1523_v25  ;;  %v3000_v25 = vld [vmem:[%s4299_s19] ss:$0 sm:$0xff] }
0x1991   :  { %v3082_v53 = vpop.eup %3081 }
0x1992   :  { %1527 = vrot.lane.b32.xlu0 %v3082_v53, %s3213_s30 }
0x1a04   :  { %v1528_v57 = vpop.permute.xlu0 %1527 }
0x1a05   :  { %v1530_v27 = vmul.f32 %v1528_v57, %v1525_v26 }
0x1a07   :  { %v3803_v59 = vadd.f32 %v1531_v58, %v1530_v27 }
0x1a09   :  { %1542 = vrot.lane.b32.xlu1 %v3803_v59, %s3213_s30 }
0x1a7b   :  { %v1543_v28 = vpop.permute.xlu1 %1542 }
0x1a7c   :  { %2915 = vmatmul.msk.f32.vlgmr.msra.gmra.mxu3 %vm142_vm3, %v1543_v28 }
0x1a7d   :  { %1889 = vmatpush.msra.mxu3 %v3718_v35 }
0x1a7f   :  { %1890 = vmatpush.msra.mxu3 %v3730_v7 }
0x1a81   :  { %1891 = vmatpush.msra.mxu3 %v3740_v13 }
0x1a83   :  { %1892 = vmatpush.msra.mxu3 %v3752_v38 }
0x1aff   :  { %v1563_v34 = vpop.f32.mrf.mxu3 }
0x1b00   :  { %v1564_v8 = vadd.f32 %v2997_v33, %v1563_v34 }
0x1b02   :  { %3083 = vtanh.f32 %v1564_v8 }
0x1b08   :  { %v3084_v10 = vpop.eup %3083 }
0x1b09   :  { %2916 = vmatmul.msk.f32.vlgmr.msrb.gmra.mxu0 %vm199_vm4, %v3084_v10 }
0x1b0a   :  { %1913 = vmatpush.msrb.mxu0 %v3769_v21 }
0x1b0c   :  { %1914 = vmatpush.msrb.mxu0 %v3774_v45 }
0x1b11   :  { %2922 = vmatmul.msk.f32.vlgmr.msra.gmra.mxu0 %vm142_vm3, %v1543_v28 }
0x1b86   :  { %v1593_v39 = vpop.f32.mrf.mxu0 }
0x1b87   :  { %v1594_v41 = vadd.f32 %v2998_v14, %v1593_v39 }
0x1b89   :  { %v1596_v43 = vsub.f32 %v3847_v55, %v1594_v41  ;;  %v1598_v18 = vsub.f32 0.0, %v1594_v41 }
0x1b8b   :  { %v1599_v44 = vmul.f32 1.442695, %v1598_v18  ;;  %v1597_v47 = vmul.f32 %v3852_v42, %v1596_v43 }
0x1b8d   :  { %3085 = vpow2.f32 %v1599_v44  ;;  %1607 = vrot.lane.b32.xlu0 %v1597_v47, %s3214_s26 }
0x1b8e   :  { %v1733_v53 = vpop.f32.mrf.mxu0 }
0x1b93   :  { %v3086_v48 = vpop.eup %3085 }
0x1b94   :  { %1602 = vrot.lane.b32.xlu2 %v3086_v48, %s3215_s27 }
0x1b95   :  { %1652 = vrot.lane.b32.xlu0 %v3852_v42, %s3214_s26 }
0x1b9c   :  { %1649 = vrot.lane.b32.xlu2 %v3852_v42, %s3216_s5 }
0x1bee   :  { %v1603_v51 = vpop.permute.xlu2 %1602 }
0x1bef   :  { %v1605_v52 = vmul.f32 %v1603_v51, %v1597_v47 }
0x1bf1   :  { %1611 = vrot.lane.b32.xlu1 %v1605_v52, %s4318_s22 }
0x1bf6   :  { %v1650_v4 = vpop.permute.xlu2 %1649 }
0x1bf7   :  { %v1655_v30 = vsel %vm379_vm11, %v3852_v42, %v1650_v4 }
0x1bff   :  { %v1608_v62 = vpop.permute.xlu0 %1607 }
0x1c00   :  { %v1614_v63 = vsel %vm109_vm2, %v1594_v41, %v1608_v62 }
0x1c07   :  { %v1653_v15 = vpop.permute.xlu0 %1652 }
0x1c08   :  { %v1656_v22 = vsel %vm109_vm2, %v1655_v30, %v1653_v15  ;;  %v3002_v30 = vld [vmem:[%s4293_s13] ss:$0 sm:$0xff] }
0x1c63   :  { %v1612_v1 = vpop.permute.xlu1 %1611 }
0x1c64   :  { %v1615_v2 = vsel %vm339_vm10, %v1614_v63, %v1612_v1 }
0x1c65   :  { %1617 = vst.msk [vmem:[#allocation2 + $0x18] sm:$0xff] %vm199_vm4, %v1615_v2  ;;  %2917 = vmatmul.msk.f32.vlgmr.msrb.gmra.mxu1 %vm199_vm4, %v1615_v2 }
0x1c66   :  { %1983 = vmatpush.msrb.mxu1 %v3713_v56 }
0x1c68   :  { %1984 = vmatpush.msrb.mxu1 %v3723_v36 }
0x1c6a   :  { %1985 = vmatpush.msrb.mxu1 %v3735_v11 }
0x1c6c   :  { %1986 = vmatpush.msrb.mxu1 %v3747_v37 }
0x1ce2   :  { %v1644_v16 = vpop.f32.mrf.mxu1 }
0x1ce3   :  { %v1645_v17 = vadd.f32 %v2999_v5, %v1644_v16 }
0x1ce5   :  { %v1647_v19 = vmax.f32 %v1645_v17, 0.0 }
0x1ce7   :  { %v1657_v0 = vmul.f32 %v1656_v22, %v1647_v19 }
0x1ce9   :  { %2921 = vmatmul.msk.f32.vlgmr.msrb.gmra.mxu3 %vm339_vm10, %v1657_v0 }
0x1cea   :  { %2066 = vmatpush.msrb.mxu3 %v1619_v49 }
0x1cec   :  { %2067 = vmatpush.msrb.mxu3 %v1618_v50 }
0x1d6c   :  { %v1709_v20 = vpop.f32.mrf.mxu3 }
0x1d6d   :  { %v1710_v24 = vadd.f32 %v1709_v20, %v1683_v23 }
0x1d6f   :  { %v1736_v26 = vadd.f32 %v1733_v53, %v1710_v24 }
0x1d71   :  { %v1741_v57 = vadd.f32 %v3000_v25, %v1736_v26 }
0x1d73   :  { %1762 = vrot.lane.b32.xlu1 %v1741_v57, %s3211_s0  ;;  %v2923_v58 = vmul.f32 -1.442695, %v1741_v57 }
0x1d75   :  { %3087 = vpow2.f32 %v2923_v58 }
0x1d7b   :  { %v3088_v27 = vpop.eup %3087 }
0x1d7c   :  { %v1745_v28 = vadd.f32 1.0, %v3088_v27 }
0x1d7e   :  { %3089 = vrcp.f32 %v1745_v28  ;;  %v1757_v39 = vand.u32 2147483648, %v1745_v28  ;;  %vm1751_vm1 = vweird.f32 %v1745_v28  ;;  %v1755_v41 = vand.u32 2147483647, %v1745_v28 }
0x1d80   :  { %v1758_v18 = vor.u32 1.1754944e-38, %v1757_v39  ;;  %vm1756_vm6 = vcmp.eq.f32.partialorder %v1755_v41, 8.507059e+37 }
0x1d84   :  { %v3090_v33 = vpop.eup %3089 }
0x1d85   :  { %v1747_v34 = vmul.f32 %v3090_v33, %v1745_v28  ;;  %vm1752_vm0 = vweird.f32 %v3090_v33 }
0x1d86   :  { %vm1753_vm5 = vmor %vm1751_vm1, %vm1752_vm0 }
0x1d87   :  { %v1748_v8 = vsub.f32 1.0, %v1747_v34 }
0x1d89   :  { %v1749_v10 = vmul.f32 %v3090_v33, %v1748_v8 }
0x1d8b   :  { %v1750_v14 = vadd.f32 %v3090_v33, %v1749_v10 }
0x1d8d   :  { %v1754_v43 = vsel %vm1753_vm5, %v3090_v33, %v1750_v14 }
0x1d8e   :  { %v1759_v47 = vsel %vm1756_vm6, %v1758_v18, %v1754_v43  ;;  %v3004_v18 = vld [vmem:[%s4288_s8] ss:$0 sm:$0xff] }
0x1d8f   :  { %v1772_v52 = vsub.f32 1.0, %v1759_v47  ;;  %v1778_v61 = vmul.f32 %v1759_v47, %v3803_v59  ;;  %v3001_v59 = vld [vmem:[%s4288_s8] ss:$0 sm:$0xff] }
0x1de5   :  { %v1763_v44 = vpop.permute.xlu1 %1762 }
0x1de6   :  { %v1765_v48 = vmul.f32 %v1763_v44, %v1759_v47 }
0x1de8   :  { %1767 = vrot.lane.b32.xlu2 %v1765_v48, %s3212_s4 }
0x1e42   :  { %v1768_v49 = vpop.permute.xlu2 %1767 }
0x1e43   :  { %v1770_v50 = vadd.f32 %v1768_v49, %v1741_v57 }
0x1e45   :  { %3091 = vtanh.f32 %v1770_v50  ;;  %v3005_v50 = vld [vmem:[%s4290_s10] ss:$0 sm:$0xff] }
0x1e4b   :  { %v3092_v51 = vpop.eup %3091 }
0x1e4c   :  { %1774 = vrot.lane.b32.xlu0 %v3092_v51, %s3213_s30  ;;  %v3963_v51 = vld [vmem:[%s4316_s1 + $0x20] sm:$0xff] }
0x1ebe   :  { %v1775_v54 = vpop.permute.xlu0 %1774 }
0x1ebf   :  { %v1777_v62 = vmul.f32 %v1775_v54, %v1772_v52 }
0x1ec1   :  { %v1779_v63 = vadd.f32 %v1778_v61, %v1777_v62  ;;  %v3968_v61 = vld [vmem:[%s4317_s25 + $0x20] sm:$0xff] }
0x1ec3   :  { %1789 = vrot.lane.b32.xlu1 %v1779_v63, %s3213_s30 }
0x1f35   :  { %v1790_v1 = vpop.permute.xlu1 %1789 }
0x1f36   :  { %2924 = vmatmul.msk.f32.vlgmr.msra.gmra.mxu1 %vm142_vm3, %v1790_v1  ;;  %2928 = vmatmul.msk.f32.vlgmr.msra.gmra.mxu3 %vm142_vm3, %v1790_v1 }
0x1f37   :  { %2230 = vmatpush.msra.mxu3 %v3713_v56 }
0x1f39   :  { %2231 = vmatpush.msra.mxu3 %v3723_v36 }
0x1f3b   :  { %2232 = vmatpush.msra.mxu3 %v3735_v11 }
0x1f3d   :  { %2233 = vmatpush.msra.mxu3 %v3747_v37 }
0x1fb3   :  { %v1810_v2 = vpop.f32.mrf.mxu1 }
0x1fb4   :  { %v1811_v4 = vadd.f32 %v3001_v59, %v1810_v2 }
0x1fb6   :  { %3093 = vtanh.f32 %v1811_v4  ;;  %v2085_v4 = vld [vmem:[%s4297_s17] sm:$0xf] }
0x1fb7   :  { %2934 = vmatpush.msk.msra.mxu0 %vm388_vm9, %v2085_v4 }
0x1fb9   :  { %v1894_v15 = vpop.f32.mrf.mxu3 }
0x1fba   :  { %v1895_v16 = vadd.f32 %v3002_v30, %v1894_v15 }
0x1fbc   :  { %v3094_v5 = vpop.eup %3093 }
0x1fbd   :  { %2925 = vmatmul.msk.f32.vlgmr.msra.gmra.mxu2 %vm199_vm4, %v3094_v5  ;;  %2929 = vmatmul.msk.f32.vlgmr.msrb.gmra.mxu0 %vm199_vm4, %v3094_v5  ;;  %v2084_v5 = vld [vmem:[%s4296_s16 + $0x8] sm:$0xf] }
0x1fbe   :  { %2153 = vmatpush.msra.mxu2 %v3811_v60  ;;  %2936 = vmatpush.msk.msra.mxu1 %vm388_vm9, %v2084_v5 }
0x1fbf   :  { %2262 = vmatpush.msrb.mxu0 %v3779_v9 }
0x1fc0   :  { %2154 = vmatpush.msra.mxu2 %v3816_v29  ;;  %2132 = vmatpush.msra.mxu1 %v3898_v3 }
0x1fc1   :  { %2263 = vmatpush.msrb.mxu0 %v3786_v46 }
0x1fc2   :  { %2155 = vmatpush.msra.mxu2 %v3822_v31 }
0x1fc4   :  { %2156 = vmatpush.msra.mxu2 %v3828_v32 }
0x1fc5   :  { %2935 = vmatmul.msk.f32.vlgmr.msra.gmra.mxu0 %vm379_vm11, %v3968_v61 }
0x1fc6   :  { %2440 = vmatpush.msra.mxu0 %v3779_v9 }
0x1fc8   :  { %2441 = vmatpush.msra.mxu0 %v3786_v46  ;;  %v3006_v46 = vld [vmem:[%s4295_s15] ss:$0 sm:$0xff] }
0x203a   :  { %v1916_v17 = vpop.f32.mrf.mxu0 }
0x203b   :  { %v1919_v22 = vadd.f32 %v1916_v17, %v1895_v16 }
0x203d   :  { %1940 = vrot.lane.b32.xlu2 %v1919_v22, %s3211_s0  ;;  %v2930_v19 = vmul.f32 -1.442695, %v1919_v22 }
0x203f   :  { %3095 = vpow2.f32 %v2930_v19 }
0x2040   :  { %v3955_v49 = vpop.f32.mrf.mxu2 }
0x2045   :  { %v3096_v0 = vpop.eup %3095 }
0x2046   :  { %v1923_v60 = vadd.f32 1.0, %v3096_v0 }
0x2048   :  { %3097 = vrcp.f32 %v1923_v60  ;;  %v1935_v24 = vand.u32 2147483648, %v1923_v60  ;;  %vm1929_vm8 = vweird.f32 %v1923_v60  ;;  %v1933_v25 = vand.u32 2147483647, %v1923_v60 }
0x204a   :  { %v1936_v26 = vor.u32 1.1754944e-38, %v1935_v24  ;;  %vm1934_vm13 = vcmp.eq.f32.partialorder %v1933_v25, 8.507059e+37 }
0x204e   :  { %v3098_v29 = vpop.eup %3097 }
0x204f   :  { %v1925_v23 = vmul.f32 %v3098_v29, %v1923_v60  ;;  %vm1930_vm7 = vweird.f32 %v3098_v29 }
0x2050   :  { %vm1931_vm12 = vmor %vm1929_vm8, %vm1930_vm7 }
0x2051   :  { %v1926_v31 = vsub.f32 1.0, %v1925_v23  ;;  %v3007_v23 = vld [vmem:[%s4299_s19] ss:$0 sm:$0xff] }
0x2053   :  { %v1927_v20 = vmul.f32 %v3098_v29, %v1926_v31 }
0x2055   :  { %v1928_v32 = vadd.f32 %v3098_v29, %v1927_v20 }
0x2057   :  { %v1932_v53 = vsel %vm1931_vm12, %v3098_v29, %v1928_v32 }
0x2058   :  { %v1937_v58 = vsel %vm1934_vm13, %v1936_v26, %v1932_v53 }
0x2059   :  { %v1950_v8 = vsub.f32 1.0, %v1937_v58  ;;  %v1956_v14 = vmul.f32 %v1937_v58, %v1779_v63 }
0x2097   :  { %v1941_v57 = vpop.permute.xlu2 %1940 }
0x2098   :  { %v1943_v27 = vmul.f32 %v1941_v57, %v1937_v58 }
0x209a   :  { %1945 = vrot.lane.b32.xlu0 %v1943_v27, %s3212_s4 }
0x210c   :  { %v1946_v28 = vpop.permute.xlu0 %1945 }
0x210d   :  { %v1948_v33 = vadd.f32 %v1946_v28, %v1919_v22 }
0x210f   :  { %3099 = vtanh.f32 %v1948_v33 }
0x2115   :  { %v3100_v34 = vpop.eup %3099 }
0x2116   :  { %1952 = vrot.lane.b32.xlu1 %v3100_v34, %s3213_s30 }
0x2188   :  { %v1953_v10 = vpop.permute.xlu1 %1952 }
0x2189   :  { %v1955_v39 = vmul.f32 %v1953_v10, %v1950_v8 }
0x218b   :  { %v3941_v41 = vadd.f32 %v1956_v14, %v1955_v39 }
0x218d   :  { %1967 = vrot.lane.b32.xlu2 %v3941_v41, %s3213_s30 }
0x21e7   :  { %v1968_v43 = vpop.permute.xlu2 %1967 }
0x21e8   :  { %2931 = vmatmul.msk.f32.vlgmr.msrb.gmra.mxu1 %vm142_vm3, %v1968_v43 }
0x21e9   :  { %2314 = vmatpush.msrb.mxu1 %v3718_v35 }
0x21eb   :  { %2315 = vmatpush.msrb.mxu1 %v3730_v7 }
0x21ed   :  { %2316 = vmatpush.msrb.mxu1 %v3740_v13 }
0x21ef   :  { %2317 = vmatpush.msrb.mxu1 %v3752_v38 }
0x2265   :  { %v1988_v44 = vpop.f32.mrf.mxu1 }
0x2266   :  { %v1989_v47 = vadd.f32 %v3004_v18, %v1988_v44 }
0x2268   :  { %3101 = vtanh.f32 %v1989_v47 }
0x226e   :  { %v3102_v48 = vpop.eup %3101 }
0x226f   :  { %2932 = vmatmul.msk.f32.vlgmr.msrb.gmra.mxu2 %vm199_vm4, %v3102_v48 }
0x2270   :  { %2338 = vmatpush.msrb.mxu2 %v3769_v21 }
0x2272   :  { %2339 = vmatpush.msrb.mxu2 %v3774_v45 }
0x2277   :  { %2938 = vmatmul.msk.f32.vlgmr.msra.gmra.mxu2 %vm142_vm3, %v1968_v43 }
0x2278   :  { %2516 = vmatpush.msra.mxu2 %v3769_v21 }
0x227a   :  { %2517 = vmatpush.msra.mxu2 %v3774_v45 }
0x22f2   :  { %v2018_v52 = vpop.f32.mrf.mxu2 }
0x22f3   :  { %v2019_v54 = vadd.f32 %v3005_v50, %v2018_v52  ;;  %v3009_v52 = vld [vmem:[%s4288_s8] ss:$0 sm:$0xff] }
0x22f5   :  { %v2021_v21 = vsub.f32 %v3963_v51, %v2019_v54  ;;  %v2023_v45 = vsub.f32 0.0, %v2019_v54 }
0x22f7   :  { %v2024_v62 = vmul.f32 1.442695, %v2023_v45  ;;  %v2022_v63 = vmul.f32 %v3968_v61, %v2021_v21 }
0x22f9   :  { %3103 = vpow2.f32 %v2024_v62  ;;  %2032 = vrot.lane.b32.xlu1 %v2022_v63, %s3214_s26 }
0x22fa   :  { %v2158_v31 = vpop.f32.mrf.mxu2 }
0x22ff   :  { %v3104_v1 = vpop.eup %3103 }
0x2300   :  { %2027 = vrot.lane.b32.xlu0 %v3104_v1, %s3215_s27 }
0x2301   :  { %2077 = vrot.lane.b32.xlu1 %v3968_v61, %s3214_s26 }
0x2308   :  { %2074 = vrot.lane.b32.xlu0 %v3968_v61, %s3216_s5 }
0x236b   :  { %v2033_v30 = vpop.permute.xlu1 %2032 }
0x236c   :  { %v2039_v15 = vsel %vm109_vm2, %v2019_v54, %v2033_v30 }
0x2372   :  { %v2028_v59 = vpop.permute.xlu0 %2027 }
0x2373   :  { %v2030_v2 = vmul.f32 %v2028_v59, %v2022_v63  ;;  %v2078_v22 = vpop.permute.xlu1 %2077 }
0x2375   :  { %2036 = vrot.lane.b32.xlu2 %v2030_v2, %s4318_s22 }
0x237a   :  { %v2075_v9 = vpop.permute.xlu0 %2074 }
0x237b   :  { %v2080_v17 = vsel %vm379_vm11, %v3968_v61, %v2075_v9 }
0x237c   :  { %v2081_v60 = vsel %vm109_vm2, %v2080_v17, %v2078_v22 }
0x23cf   :  { %v2037_v3 = vpop.permute.xlu2 %2036 }
0x23d0   :  { %v2040_v16 = vsel %vm339_vm10, %v2039_v15, %v2037_v3 }
0x23d1   :  { %2042 = vst.msk [vmem:[#allocation2 + $0x20] sm:$0xff] %vm199_vm4, %v2040_v16  ;;  %2933 = vmatmul.msk.f32.vlgmr.msrb.gmra.mxu3 %vm199_vm4, %v2040_v16 }
0x23d2   :  { %2408 = vmatpush.msrb.mxu3 %v3713_v56 }
0x23d4   :  { %2409 = vmatpush.msrb.mxu3 %v3723_v36  ;;  %v2108_v36 = vpop.f32.mrf.mxu0 }
0x23d6   :  { %2410 = vmatpush.msrb.mxu3 %v3735_v11 }
0x23d8   :  { %2411 = vmatpush.msrb.mxu3 %v3747_v37 }
0x2454   :  { %v2069_v19 = vpop.f32.mrf.mxu3 }
0x2455   :  { %v2070_v0 = vadd.f32 %v3006_v46, %v2069_v19 }
0x2457   :  { %v2072_v56 = vmax.f32 %v2070_v0, 0.0 }
0x2459   :  { %v2082_v29 = vmul.f32 %v2081_v60, %v2072_v56 }
0x245b   :  { %2937 = vmatmul.msk.f32.vlgmr.msra.gmra.mxu1 %vm339_vm10, %v2082_v29 }
0x245c   :  { %2492 = vmatpush.msra.mxu1 %v3718_v35 }
0x245e   :  { %2493 = vmatpush.msra.mxu1 %v3730_v7 }
0x2460   :  { %2494 = vmatpush.msra.mxu1 %v3740_v13 }
0x2462   :  { %2495 = vmatpush.msra.mxu1 %v3752_v38 }
0x24d8   :  { %v2134_v11 = vpop.f32.mrf.mxu1 }
0x24d9   :  { %v2135_v37 = vadd.f32 %v2134_v11, %v2108_v36 }
0x24db   :  { %v2161_v20 = vadd.f32 %v2158_v31, %v2135_v37 }
0x24dd   :  { %v2166_v32 = vadd.f32 %v3007_v23, %v2161_v20 }
0x24df   :  { %2187 = vrot.lane.b32.xlu2 %v2166_v32, %s3211_s0  ;;  %v2939_v24 = vmul.f32 -1.442695, %v2166_v32 }
0x24e1   :  { %3105 = vpow2.f32 %v2939_v24 }
0x24e7   :  { %v3106_v35 = vpop.eup %3105 }
0x24e8   :  { %v2170_v7 = vadd.f32 1.0, %v3106_v35  ;;  %v3012_v35 = vld [vmem:[%s4288_s8] ss:$0 sm:$0xff] }
0x24ea   :  { %3107 = vrcp.f32 %v2170_v7  ;;  %v2182_v57 = vand.u32 2147483648, %v2170_v7  ;;  %vm2176_vm11 = vweird.f32 %v2170_v7  ;;  %v2180_v58 = vand.u32 2147483647, %v2170_v7 }
0x24ec   :  { %v2183_v28 = vor.u32 1.1754944e-38, %v2182_v57  ;;  %vm2181_vm15 = vcmp.eq.f32.partialorder %v2180_v58, 8.507059e+37 }
0x24f0   :  { %v3108_v13 = vpop.eup %3107 }
0x24f1   :  { %v2172_v25 = vmul.f32 %v3108_v13, %v2170_v7  ;;  %vm2177_vm9 = vweird.f32 %v3108_v13 }
0x24f2   :  { %vm2178_vm14 = vmor %vm2176_vm11, %vm2177_vm9 }
0x24f3   :  { %v2173_v38 = vsub.f32 1.0, %v2172_v25 }
0x24f5   :  { %v2174_v53 = vmul.f32 %v3108_v13, %v2173_v38  ;;  %v3011_v38 = vld [vmem:[%s4293_s13] ss:$0 sm:$0xff] }
0x24f7   :  { %v2175_v26 = vadd.f32 %v3108_v13, %v2174_v53 }
0x24f9   :  { %v2179_v27 = vsel %vm2178_vm14, %v3108_v13, %v2175_v26 }
0x24fa   :  { %v2184_v34 = vsel %vm2181_vm15, %v2183_v28, %v2179_v27 }
0x24fb   :  { %v2197_v43 = vsub.f32 1.0, %v2184_v34  ;;  %v2203_v44 = vmul.f32 %v2184_v34, %v3941_v41  ;;  %v3008_v41 = vld [vmem:[%s4293_s13] ss:$0 sm:$0xff] }
0x2539   :  { %v2188_v33 = vpop.permute.xlu2 %2187 }
0x253a   :  { %v2190_v8 = vmul.f32 %v2188_v33, %v2184_v34 }
0x253c   :  { %2192 = vrot.lane.b32.xlu0 %v2190_v8, %s3212_s4 }
0x25ae   :  { %v2193_v10 = vpop.permute.xlu0 %2192 }
0x25af   :  { %v2195_v14 = vadd.f32 %v2193_v10, %v2166_v32 }
0x25b1   :  { %3109 = vtanh.f32 %v2195_v14 }
0x25b7   :  { %v3110_v39 = vpop.eup %3109 }
0x25b8   :  { %2199 = vrot.lane.b32.xlu1 %v3110_v39, %s3213_s30 }
0x262a   :  { %v2200_v18 = vpop.permute.xlu1 %2199 }
0x262b   :  { %v2202_v47 = vmul.f32 %v2200_v18, %v2197_v43 }
0x262d   :  { %v2204_v48 = vadd.f32 %v2203_v44, %v2202_v47 }
0x262f   :  { %2214 = vrot.lane.b32.xlu2 %v2204_v48, %s3213_s30 }
0x2689   :  { %v2215_v50 = vpop.permute.xlu2 %2214 }
0x268a   :  { %2940 = vmatmul.msk.f32.vlgmr.msra.gmra.mxu3 %vm142_vm3, %v2215_v50  ;;  %2944 = vmatmul.msk.f32.vlgmr.msrb.gmra.mxu1 %vm142_vm3, %v2215_v50 }
0x2707   :  { %v2319_v62 = vpop.f32.mrf.mxu1 }
0x2708   :  { %v2320_v63 = vadd.f32 %v3008_v41, %v2319_v62  ;;  %v2564_v41 = vld [vmem:[%s4287_s7 + $0x18] sm:$0xff] }
0x2709   :  { %v2653_v62 = vld [vmem:[%s4292_s12 + $0x18] sm:$0xff]  ;;  %2586 = vmatpush.msra.mxu3 %v2564_v41 }
0x270a   :  { %2670 = vmatpush.msrb.mxu1 %v2653_v62 }
0x270d   :  { %v2235_v54 = vpop.f32.mrf.mxu3 }
0x270e   :  { %v2236_v21 = vadd.f32 %v3009_v52, %v2235_v54 }
0x2710   :  { %3111 = vtanh.f32 %v2236_v21 }
0x2716   :  { %v3112_v45 = vpop.eup %3111 }
0x2717   :  { %2941 = vmatmul.msk.f32.vlgmr.msrb.gmra.mxu0 %vm199_vm4, %v3112_v45  ;;  %2945 = vmatmul.msk.f32.vlgmr.msrb.gmra.mxu2 %vm199_vm4, %v3112_v45 }
0x279a   :  { %v2341_v1 = vpop.f32.mrf.mxu2 }
0x279b   :  { %v2344_v59 = vadd.f32 %v2341_v1, %v2320_v63  ;;  %v2563_v63 = vld [vmem:[%s4287_s7 + $0x10] sm:$0xff] }
0x279c   :  { %v2652_v1 = vld [vmem:[%s4292_s12 + $0x10] sm:$0xff]  ;;  %2587 = vmatpush.msra.mxu3 %v2563_v63 }
0x279d   :  { %2365 = vrot.lane.b32.xlu0 %v2344_v59, %s3211_s0  ;;  %v2946_v2 = vmul.f32 -1.442695, %v2344_v59  ;;  %2671 = vmatpush.msrb.mxu1 %v2652_v1 }
0x279f   :  { %3113 = vpow2.f32 %v2946_v2  ;;  %v2651_v2 = vld [vmem:[%s4292_s12 + $0x8] sm:$0xff] }
0x27a0   :  { %2672 = vmatpush.msrb.mxu1 %v2651_v2 }
0x27a5   :  { %v3114_v4 = vpop.eup %3113 }
0x27a6   :  { %v2348_v5 = vadd.f32 1.0, %v3114_v4  ;;  %v2561_v4 = vld [vmem:[%s4287_s7] sm:$0xff] }
0x27a8   :  { %3115 = vrcp.f32 %v2348_v5  ;;  %v2360_v46 = vand.u32 2147483648, %v2348_v5  ;;  %vm2354_vm1 = vweird.f32 %v2348_v5  ;;  %v2358_v17 = vand.u32 2147483647, %v2348_v5 }
0x27aa   :  { %v2361_v19 = vor.u32 1.1754944e-38, %v2360_v46  ;;  %vm2359_vm6 = vcmp.eq.f32.partialorder %v2358_v17, 8.507059e+37  ;;  %v2679_v17 = vld [vmem:[%s4291_s11 + $0x8] sm:$0xff] }
0x27ab   :  { %2694 = vmatpush.msrb.mxu2 %v2679_v17 }
0x27ae   :  { %v3116_v30 = vpop.eup %3115 }
0x27af   :  { %v2350_v15 = vmul.f32 %v3116_v30, %v2348_v5  ;;  %vm2355_vm0 = vweird.f32 %v3116_v30  ;;  %v2650_v5 = vld [vmem:[%s4292_s12] sm:$0xff] }
0x27b0   :  { %vm2356_vm5 = vmor %vm2354_vm1, %vm2355_vm0  ;;  %2673 = vmatpush.msrb.mxu1 %v2650_v5  ;;  %v3010_v5 = vld [vmem:[%s4290_s10] ss:$0 sm:$0xff] }
0x27b1   :  { %v2351_v3 = vsub.f32 1.0, %v2350_v15 }
0x27b3   :  { %v2352_v16 = vmul.f32 %v3116_v30, %v2351_v3 }
0x27b5   :  { %v2353_v9 = vadd.f32 %v3116_v30, %v2352_v16 }
0x27b7   :  { %v2357_v22 = vsel %vm2356_vm5, %v3116_v30, %v2353_v9 }
0x27b8   :  { %v2362_v60 = vsel %vm2359_vm6, %v2361_v19, %v2357_v22  ;;  %v2678_v22 = vld [vmem:[%s4291_s11] sm:$0xff]  ;;  %v2596_v19 = vld [vmem:[%s4289_s9 + $0x8] sm:$0xff]  ;;  %s3219_s11 = smov 128  }
0x27b9   :  { %v2375_v37 = vsub.f32 1.0, %v2362_v60  ;;  %v2381_v31 = vmul.f32 %v2362_v60, %v2204_v48  ;;  %2618 = vmatpush.msrb.mxu0 %v2596_v19  ;;  %2695 = vmatpush.msrb.mxu2 %v2678_v22 }
0x280f   :  { %v2366_v0 = vpop.permute.xlu0 %2365 }
0x2810   :  { %v2368_v56 = vmul.f32 %v2366_v0, %v2362_v60  ;;  %v2595_v0 = vld [vmem:[%s4289_s9] sm:$0xff] }
0x2811   :  { %2619 = vmatpush.msrb.mxu0 %v2595_v0  ;;  %v3015_v60 = vld [vmem:[%s4288_s8] ss:$0 sm:$0xff] }
0x2812   :  { %2370 = vrot.lane.b32.xlu1 %v2368_v56, %s3212_s4 }
0x2884   :  { %v2371_v29 = vpop.permute.xlu1 %2370 }
0x2885   :  { %v2373_v36 = vadd.f32 %v2371_v29, %v2344_v59  ;;  %v2562_v59 = vld [vmem:[%s4287_s7 + $0x8] sm:$0xff] }
0x2886   :  { %2588 = vmatpush.msra.mxu3 %v2562_v59 }
0x2887   :  { %3117 = vtanh.f32 %v2373_v36 }
0x2888   :  { %2589 = vmatpush.msra.mxu3 %v2561_v4 }
0x288d   :  { %v3118_v11 = vpop.eup %3117 }
0x288e   :  { %2377 = vrot.lane.b32.xlu2 %v3118_v11, %s3213_s30  ;;  %v3014_v11 = vld [vmem:[%s4293_s13] ss:$0 sm:$0xff]  ;;  %s2830_s13 = sshll.u32 %s4300_s20, 4  ;;  %s2831_s13 = int_to_ptr.hbm [resolvable:$true] %s2830_s13 }
0x28e8   :  { %v2378_v23 = vpop.permute.xlu2 %2377 }
0x28e9   :  { %v2380_v20 = vmul.f32 %v2378_v23, %v2375_v37 }
0x28eb   :  { %v4038_v32 = vadd.f32 %v2381_v31, %v2380_v20 }
0x28ed   :  { %2392 = vrot.lane.b32.xlu0 %v4038_v32, %s3213_s30 }
0x295f   :  { %v2393_v24 = vpop.permute.xlu0 %2392 }
0x2960   :  { %2947 = vmatmul.msk.f32.vlgmr.msrb.gmra.mxu3 %vm142_vm3, %v2393_v24  ;;  %2951 = vmatmul.msk.f32.vlgmr.msra.gmra.mxu1 %vm142_vm3, %v2393_v24 }
0x2961   :  { %2764 = vmatpush.msrb.mxu3 %v2564_v41 }
0x2963   :  { %2765 = vmatpush.msrb.mxu3 %v2563_v63  ;;  %v2989_v63 = vld [vmem:[%s4290_s10] ss:$0 sm:$0xff] }
0x2964   :  { %v4140_v1 = vadd.f32 %v2989_v63, %v3668_v40  ;;  %v3154_v40 = vld [vmem:[%s4317_s25] sm:$0xff] }
0x2965   :  { %2766 = vmatpush.msrb.mxu3 %v2562_v59 }
0x2967   :  { %2767 = vmatpush.msrb.mxu3 %v2561_v4  ;;  %v995_v4 = vsub.f32 0.0, %v4140_v1 }
0x29dd   :  { %v2497_v53 = vpop.f32.mrf.mxu1 }
0x29de   :  { %v2498_v26 = vadd.f32 %v3011_v38, %v2497_v53  ;;  %v2982_v38 = vld [vmem:[%s4290_s10] ss:$0 sm:$0xff]  ;;  %v2265_v53 = vpop.f32.mrf.mxu0 }
0x29e3   :  { %v2413_v7 = vpop.f32.mrf.mxu3 }
0x29e4   :  { %v2414_v13 = vadd.f32 %v3012_v35, %v2413_v7 }
0x29e6   :  { %3119 = vtanh.f32 %v2414_v13 }
0x29ec   :  { %v3120_v25 = vpop.eup %3119 }
0x29ed   :  { %2948 = vmatmul.msk.f32.vlgmr.msra.gmra.mxu0 %vm199_vm4, %v3120_v25  ;;  %2952 = vmatmul.msk.f32.vlgmr.msra.gmra.mxu2 %vm199_vm4, %v3120_v25 }
0x29ee   :  { %2796 = vmatpush.msra.mxu0 %v2596_v19 }
0x29f0   :  { %2797 = vmatpush.msra.mxu0 %v2595_v0 }
0x2a70   :  { %v2519_v57 = vpop.f32.mrf.mxu2 }
0x2a71   :  { %v2522_v58 = vadd.f32 %v2519_v57, %v2498_v26  ;;  %v4111_v57 = vadd.f32 %v2982_v38, %v3583_v6 }
0x2a73   :  { %2543 = vrot.lane.b32.xlu1 %v2522_v58, %s3211_s0  ;;  %v2953_v27 = vmul.f32 -1.442695, %v2522_v58 }
0x2a75   :  { %3121 = vpow2.f32 %v2953_v27 }
0x2a7b   :  { %v3122_v28 = vpop.eup %3121 }
0x2a7c   :  { %v2526_v33 = vadd.f32 1.0, %v3122_v28 }
0x2a7e   :  { %3123 = vrcp.f32 %v2526_v33  ;;  %v2538_v43 = vand.u32 2147483648, %v2526_v33  ;;  %vm2532_vm8 = vweird.f32 %v2526_v33  ;;  %v2536_v18 = vand.u32 2147483647, %v2526_v33 }
0x2a80   :  { %v2539_v47 = vor.u32 1.1754944e-38, %v2538_v43  ;;  %vm2537_vm13 = vcmp.eq.f32.partialorder %v2536_v18, 8.507059e+37 }
0x2a84   :  { %v3124_v34 = vpop.eup %3123 }
0x2a85   :  { %v2528_v8 = vmul.f32 %v3124_v34, %v2526_v33  ;;  %vm2533_vm7 = vweird.f32 %v3124_v34  ;;  %v571_v33 = vsub.f32 0.0, %v4111_v57 }
0x2a86   :  { %vm2534_vm12 = vmor %vm2532_vm8, %vm2533_vm7 }
0x2a87   :  { %v2529_v10 = vsub.f32 1.0, %v2528_v8  ;;  %v4117_v8 = vpop.f32.mrf.mxu0 }
0x2a89   :  { %v2530_v14 = vmul.f32 %v3124_v34, %v2529_v10 }
0x2a8b   :  { %v2531_v39 = vadd.f32 %v3124_v34, %v2530_v14 }
0x2a8d   :  { %v2535_v44 = vsel %vm2534_vm12, %v3124_v34, %v2531_v39  ;;  %v3003_v34 = vld [vmem:[%s4290_s10] ss:$0 sm:$0xff]  ;;  %v572_v39 = vmul.f32 1.442695, %v571_v33 }
0x2a8e   :  { %v2540_v50 = vsel %vm2537_vm13, %v2539_v47, %v2535_v44  ;;  %v4120_v6 = vadd.f32 %v3003_v34, %v3955_v49 }
0x2a8f   :  { %v2553_v30 = vsub.f32 1.0, %v2540_v50  ;;  %v2559_v3 = vmul.f32 %v2540_v50, %v4038_v32 }
0x2a90   :  { %v1845_v47 = vsub.f32 0.0, %v4120_v6 }
0x2ae5   :  { %v2544_v48 = vpop.permute.xlu1 %2543 }
0x2ae6   :  { %v2546_v52 = vmul.f32 %v2544_v48, %v2540_v50  ;;  %v3016_v48 = vld [vmem:[%s4290_s10] ss:$0 sm:$0xff] }
0x2ae8   :  { %2548 = vrot.lane.b32.xlu2 %v2546_v52, %s3212_s4  ;;  %v1846_v52 = vmul.f32 1.442695, %v1845_v47  ;;  %v3157_v47 = vld [vmem:[%s4316_s1 + $0x8] sm:$0xff] }
0x2b42   :  { %v2549_v54 = vpop.permute.xlu2 %2548 }
0x2b43   :  { %v2551_v21 = vadd.f32 %v2549_v54, %v2522_v58 }
0x2b45   :  { %3125 = vtanh.f32 %v2551_v21 }
0x2b4b   :  { %v3126_v45 = vpop.eup %3125 }
0x2b4c   :  { %2555 = vrot.lane.b32.xlu0 %v3126_v45, %s3213_s30 }
0x2bbe   :  { %v2556_v15 = vpop.permute.xlu0 %2555 }
0x2bbf   :  { %v2558_v16 = vmul.f32 %v2556_v15, %v2553_v30  ;;  %v3153_v30 = vld [vmem:[%s4316_s1] sm:$0xff] }
0x2bc0   :  { %v569_v15 = vsub.f32 %v3153_v30, %v4111_v57 }
0x2bc1   :  { %v4080_v9 = vadd.f32 %v2559_v3, %v2558_v16  ;;  %v996_v3 = vmul.f32 1.442695, %v995_v4  ;;  %v4150_v16 = vadd.f32 %v3010_v5, %v2265_v53 }
0x2bc3   :  { %2570 = vrot.lane.b32.xlu1 %v4080_v9, %s3213_s30  ;;  %v2270_v0 = vsub.f32 0.0, %v4150_v16 }
0x2c35   :  { %v2571_v46 = vpop.permute.xlu1 %2570 }
0x2c36   :  { %2954 = vmatmul.msk.f32.vlgmr.msra.gmra.mxu3 %vm142_vm3, %v2571_v46  ;;  %2958 = vmatmul.msk.f32.vlgmr.msrb.gmra.mxu1 %vm142_vm3, %v2571_v46  ;;  %v570_v46 = vmul.f32 %v3154_v40, %v569_v15 }
0x2cb3   :  { %v2675_v37 = vpop.f32.mrf.mxu1 }
0x2cb4   :  { %v2676_v23 = vadd.f32 %v3014_v11, %v2675_v37 }
0x2cb9   :  { %v2591_v56 = vpop.f32.mrf.mxu3 }
0x2cba   :  { %v2592_v29 = vadd.f32 %v3015_v60, %v2591_v56  ;;  %v1843_v60 = vsub.f32 %v3847_v55, %v4120_v6  ;;  %v2271_v56 = vmul.f32 1.442695, %v2270_v0  ;;  %v2950_v55 = vld [vmem:[%s4317_s25 + $0x30] sm:$0xff] }
0x2cbc   :  { %3127 = vtanh.f32 %v2592_v29  ;;  %v1844_v29 = vmul.f32 %v3852_v42, %v1843_v60 }
0x2cc2   :  { %v3128_v36 = vpop.eup %3127 }
0x2cc3   :  { %2955 = vmatmul.msk.f32.vlgmr.msrb.gmra.mxu0 %vm199_vm4, %v3128_v36  ;;  %2959 = vmatmul.msk.f32.vlgmr.msrb.gmra.mxu2 %vm199_vm4, %v3128_v36 }
0x2d40   :  { %v2621_v50 = vpop.f32.mrf.mxu0 }
0x2d41   :  { %v4130_v54 = vadd.f32 %v3016_v48, %v2621_v50  ;;  %v993_v48 = vsub.f32 %v3157_v47, %v4140_v1 }
0x2d43   :  { %v2626_v21 = vsub.f32 0.0, %v4130_v54 }
0x2d45   :  { %v2627_v45 = vmul.f32 1.442695, %v2626_v21 }
0x2d46   :  { %v2697_v31 = vpop.f32.mrf.mxu2 }
0x2d47   :  { %v2700_v20 = vadd.f32 %v2697_v31, %v2676_v23  ;;  %v2949_v23 = vld [vmem:[%s4316_s1 + $0x30] sm:$0xff] }
0x2d48   :  { %v2624_v31 = vsub.f32 %v2949_v23, %v4130_v54 }
0x2d49   :  { %2721 = vrot.lane.b32.xlu2 %v2700_v20, %s3211_s0  ;;  %v2960_v32 = vmul.f32 -1.442695, %v2700_v20 }
0x2d4b   :  { %3129 = vpow2.f32 %v2960_v32  ;;  %v2996_v32 = vld [vmem:[%s4290_s10] ss:$0 sm:$0xff] }
0x2d51   :  { %v3130_v24 = vpop.eup %3129 }
0x2d52   :  { %v2704_v35 = vadd.f32 1.0, %v3130_v24  ;;  %v1416_v24 = vadd.f32 %v2996_v32, %v3839_v12 }
0x2d54   :  { %3131 = vrcp.f32 %v2704_v35  ;;  %v2716_v27 = vand.u32 2147483648, %v2704_v35  ;;  %vm2710_vm11 = vweird.f32 %v2704_v35  ;;  %v2714_v28 = vand.u32 2147483647, %v2704_v35 }
0x2d55   :  { %3133 = vpow2.f32 %v572_v39  ;;  %v2942_v39 = vld [vmem:[%s4316_s1 + $0x28] sm:$0xff] }
0x2d56   :  { %v2717_v14 = vor.u32 1.1754944e-38, %v2716_v27  ;;  %vm2715_vm15 = vcmp.eq.f32.partialorder %v2714_v28, 8.507059e+37  ;;  %3135 = vpow2.f32 %v1846_v52  ;;  %v3158_v52 = vld [vmem:[%s4317_s25 + $0x8] sm:$0xff] }
0x2d57   :  { %3137 = vpow2.f32 %v2627_v45  ;;  %v2268_v45 = vsub.f32 %v3963_v51, %v4150_v16 }
0x2d5a   :  { %v3132_v7 = vpop.eup %3131 }
0x2d5b   :  { %v2706_v13 = vmul.f32 %v3132_v7, %v2704_v35  ;;  %vm2711_vm9 = vweird.f32 %v3132_v7  ;;  %v3134_v49 = vpop.eup %3133  ;;  %v1420_v35 = vsub.f32 0.0, %v1416_v24 }
0x2d5c   :  { %vm2712_vm14 = vmor %vm2710_vm11, %vm2711_vm9  ;;  %v3136_v41 = vpop.eup %3135 }
0x2d5d   :  { %v2707_v25 = vsub.f32 1.0, %v2706_v13  ;;  %v3138_v62 = vpop.eup %3137 }
0x2d5f   :  { %v2708_v26 = vmul.f32 %v3132_v7, %v2707_v25 }
0x2d61   :  { %v2709_v58 = vadd.f32 %v3132_v7, %v2708_v26  ;;  %v1421_v26 = vmul.f32 1.442695, %v1420_v35 }
0x2d63   :  { %v2713_v10 = vsel %vm2712_vm14, %v3132_v7, %v2709_v58  ;;  %v3013_v7 = vld [vmem:[%s4290_s10] ss:$0 sm:$0xff] }
0x2d64   :  { %v4122_v18 = vsel %vm2715_vm15, %v2717_v14, %v2713_v10  ;;  %v2444_v58 = vadd.f32 %v3013_v7, %v4117_v8  ;;  %v3156_v10 = vld [vmem:[%s4317_s25 + $0x10] sm:$0xff] }
0x2d65   :  { %v2731_v13 = vsub.f32 1.0, %v4122_v18  ;;  %v2737_v38 = vmul.f32 %v4122_v18, %v4080_v9  ;;  %v3155_v9 = vld [vmem:[%s4316_s1 + $0x10] sm:$0xff] }
0x2d66   :  { %v2448_v12 = vsub.f32 0.0, %v2444_v58  ;;  %v1418_v8 = vsub.f32 %v3155_v9, %v1416_v24 }
0x2d68   :  { %v2449_v28 = vmul.f32 1.442695, %v2448_v12  ;;  %v1419_v14 = vmul.f32 %v3156_v10, %v1418_v8 }
0x2da3   :  { %v2722_v43 = vpop.permute.xlu2 %2721 }
0x2da4   :  { %v2724_v44 = vmul.f32 %v2722_v43, %v4122_v18  ;;  %v2446_v43 = vsub.f32 %v2942_v39, %v2444_v58  ;;  %v2943_v18 = vld [vmem:[%s4317_s25 + $0x28] sm:$0xff] }
0x2da6   :  { %2726 = vrot.lane.b32.xlu0 %v2724_v44, %s3212_s4  ;;  %v2447_v44 = vmul.f32 %v2943_v18, %v2446_v43 }
0x2dae   :  { %575 = vrot.lane.b32.xlu0 %v3134_v49, %s3215_s27  ;;  %v994_v49 = vmul.f32 %v3158_v52, %v993_v48 }
0x2db6   :  { %1849 = vrot.lane.b32.xlu0 %v3136_v41, %s3215_s27 }
0x2dbe   :  { %2630 = vrot.lane.b32.xlu0 %v3138_v62, %s3215_s27  ;;  %v2269_v62 = vmul.f32 %v3968_v61, %v2268_v45 }
0x2e18   :  { %v2727_v59 = vpop.permute.xlu0 %2726 }
0x2e19   :  { %v2729_v2 = vadd.f32 %v2727_v59, %v2700_v20  ;;  %v4172_v20 = vmul.f32 %v2950_v55, %v2624_v31 }
0x2e1b   :  { %3139 = vtanh.f32 %v2729_v2 }
0x2e1c   :  { %3141 = vpow2.f32 %v996_v3 }
0x2e1d   :  { %3143 = vpow2.f32 %v2271_v56  ;;  %v3017_v56 = vld [vmem:[%s4288_s8] ss:$0 sm:$0xff] }
0x2e1e   :  { %3145 = vpow2.f32 %v1421_v26 }
0x2e1f   :  { %3147 = vpow2.f32 %v2449_v28 }
0x2e20   :  { %v576_v17 = vpop.permute.xlu0 %575 }
0x2e21   :  { %v3140_v22 = vpop.eup %3139  ;;  %v578_v19 = vmul.f32 %v576_v17, %v570_v46 }
0x2e22   :  { %2733 = vrot.lane.b32.xlu1 %v3140_v22, %s3213_s30  ;;  %v3142_v11 = vpop.eup %3141 }
0x2e23   :  { %584 = vrot.lane.b32.xlu0 %v578_v19, %s4318_s22  ;;  %v3144_v42 = vpop.eup %3143 }
0x2e24   :  { %v3146_v33 = vpop.eup %3145 }
0x2e25   :  { %v3148_v34 = vpop.eup %3147 }
0x2e28   :  { %v1850_v36 = vpop.permute.xlu0 %1849 }
0x2e29   :  { %v4161_v37 = vmul.f32 %v1850_v36, %v1844_v29 }
0x2e2a   :  { %999 = vrot.lane.b32.xlu1 %v3142_v11, %s3215_s27 }
0x2e2b   :  { %1854 = vrot.lane.b32.xlu0 %v1844_v29, %s3214_s26 }
0x2e30   :  { %v2631_v30 = vpop.permute.xlu0 %2630 }
0x2e32   :  { %2274 = vrot.lane.b32.xlu1 %v3144_v42, %s3215_s27  ;;  %v3018_v42 = vld [vmem:[%s4290_s10] ss:$0 sm:$0xff]  ;;  %s3218_s10 = smov [#allocation4]  }
0x2e33   :  { %2635 = vrot.lane.b32.xlu0 %v4172_v20, %s3214_s26 }
0x2e94   :  { %v2734_v25 = vpop.permute.xlu1 %2733 }
0x2e95   :  { %v2736_v53 = vmul.f32 %v2734_v25, %v2731_v13  ;;  %v585_v3 = vpop.permute.xlu0 %584  ;;  %v2956_v25 = vld [vmem:[%s4316_s1 + $0x38] sm:$0xff]  ;;  %s2841_s1 = sshll.u32 %s3218_s10, 4  ;;  %s2842_s1 = int_to_ptr.vmem [resolvable:$true] %s2841_s1 }
0x2e97   :  { %v2738_v27 = vadd.f32 %v2737_v38, %v2736_v53  ;;  %v2957_v53 = vld [vmem:[%s4317_s25 + $0x38] sm:$0xff] }
0x2e99   :  { %2748 = vrot.lane.b32.xlu2 %v2738_v27, %s3213_s30 }
0x2e9c   :  { %v1000_v50 = vpop.permute.xlu1 %999 }
0x2e9d   :  { %v1002_v21 = vmul.f32 %v1000_v50, %v994_v49 }
0x2ea1   :  { %1424 = vrot.lane.b32.xlu2 %v3146_v33, %s3215_s27 }
0x2ea4   :  { %v2275_v41 = vpop.permute.xlu1 %2274 }
0x2ea5   :  { %v2277_v63 = vmul.f32 %v2275_v41, %v2269_v62 }
0x2ea9   :  { %2452 = vrot.lane.b32.xlu2 %v3148_v34, %s3215_s27 }
0x2eb1   :  { %580 = vrot.lane.b32.xlu2 %v570_v46, %s3214_s26  ;;  %v1855_v46 = vpop.permute.xlu0 %1854 }
0x2eb9   :  { %1429 = vrot.lane.b32.xlu2 %v1419_v14, %s3214_s26  ;;  %v2636_v17 = vpop.permute.xlu0 %2635 }
0x2ec1   :  { %2457 = vrot.lane.b32.xlu2 %v2447_v44, %s3214_s26 }
0x2ec9   :  { %1008 = vrot.lane.b32.xlu2 %v1002_v21, %s4318_s22 }
0x2ed1   :  { %2283 = vrot.lane.b32.xlu2 %v2277_v63, %s4318_s22 }
0x2ef3   :  { %v2749_v59 = vpop.permute.xlu2 %2748 }
0x2ef4   :  { %2961 = vmatmul.msk.f32.vlgmr.msrb.gmra.mxu3 %vm142_vm3, %v2749_v59 }
0x2efb   :  { %v1425_v2 = vpop.permute.xlu2 %1424 }
0x2efc   :  { %v1427_v4 = vmul.f32 %v1425_v2, %v1419_v14 }
0x2efe   :  { %1433 = vrot.lane.b32.xlu0 %v1427_v4, %s4318_s22 }
0x2f03   :  { %v2453_v5 = vpop.permute.xlu2 %2452 }
0x2f04   :  { %v2455_v15 = vmul.f32 %v2453_v5, %v2447_v44 }
0x2f06   :  { %2461 = vrot.lane.b32.xlu0 %v2455_v15, %s4318_s22 }
0x2f0b   :  { %v581_v51 = vpop.permute.xlu2 %580 }
0x2f0c   :  { %v587_v61 = vsel %vm109_vm2, %v4111_v57, %v581_v51 }
0x2f0d   :  { %v588_v40 = vsel %vm339_vm10, %v587_v61, %v585_v3 }
0x2f0e   :  { %589 = vst.msk [vmem:[#allocation4] sm:$0xff] %vm199_vm4, %v588_v40 }
0x2f13   :  { %v1430_v22 = vpop.permute.xlu2 %1429 }
0x2f14   :  { %v1436_v19 = vsel %vm109_vm2, %v1416_v24, %v1430_v22 }
0x2f1b   :  { %v2458_v29 = vpop.permute.xlu2 %2457 }
0x2f1c   :  { %v2464_v36 = vsel %vm109_vm2, %v2444_v58, %v2458_v29  ;;  %v2633_v58 = vmul.f32 %v2631_v30, %v4172_v20 }
0x2f23   :  { %v1009_v28 = vpop.permute.xlu2 %1008 }
0x2f2b   :  { %v2284_v10 = vpop.permute.xlu2 %2283 }
0x2f70   :  { %v1434_v0 = vpop.permute.xlu0 %1433 }
0x2f71   :  { %v1437_v60 = vsel %vm339_vm10, %v1436_v19, %v1434_v0 }
0x2f72   :  { %1439 = vst.msk [vmem:[#allocation4 + $0x10] sm:$0xff] %vm199_vm4, %v1437_v60 }
0x2f77   :  { %v2769_v57 = vpop.f32.mrf.mxu3 }
0x2f78   :  { %v2770_v11 = vadd.f32 %v3017_v56, %v2769_v57  ;;  %v2462_v23 = vpop.permute.xlu0 %2461 }
0x2f79   :  { %v2465_v31 = vsel %vm339_vm10, %v2464_v36, %v2462_v23 }
0x2f7a   :  { %3149 = vtanh.f32 %v2770_v11  ;;  %2467 = vst.msk [vmem:[#allocation2 + $0x28] sm:$0xff] %vm199_vm4, %v2465_v31 }
0x2f80   :  { %v3150_v55 = vpop.eup %3149 }
0x2f81   :  { %2962 = vmatmul.msk.f32.vlgmr.msra.gmra.mxu0 %vm199_vm4, %v3150_v55 }
0x2ffe   :  { %v2799_v32 = vpop.f32.mrf.mxu0 }
0x2fff   :  { %v2800_v24 = vadd.f32 %v3018_v42, %v2799_v32 }
0x3001   :  { %v2804_v35 = vsub.f32 0.0, %v2800_v24  ;;  %v2802_v38 = vsub.f32 %v2956_v25, %v2800_v24 }
0x3003   :  { %v2805_v7 = vmul.f32 1.442695, %v2804_v35  ;;  %v2803_v26 = vmul.f32 %v2957_v53, %v2802_v38 }
0x3005   :  { %3151 = vpow2.f32 %v2805_v7 }
0x300b   :  { %v3152_v13 = vpop.eup %3151 }
0x300c   :  { %2808 = vrot.lane.b32.xlu1 %v3152_v13, %s3215_s27 }
0x3014   :  { %1004 = vrot.lane.b32.xlu1 %v994_v49, %s3214_s26 }
0x301c   :  { %2279 = vrot.lane.b32.xlu1 %v2269_v62, %s3214_s26 }
0x3024   :  { %2813 = vrot.lane.b32.xlu1 %v2803_v26, %s3214_s26 }
0x302c   :  { %1858 = vrot.lane.b32.xlu1 %v4161_v37, %s4318_s22 }
0x3034   :  { %2639 = vrot.lane.b32.xlu1 %v2633_v58, %s4318_s22 }
0x307e   :  { %v2809_v27 = vpop.permute.xlu1 %2808 }
0x307f   :  { %v2811_v12 = vmul.f32 %v2809_v27, %v2803_v26 }
0x3081   :  { %2817 = vrot.lane.b32.xlu2 %v2811_v12, %s4318_s22  ;;  %s2843_s22 = sshll.u32 %s4301_s21, 4  ;;  %s3220_s21 = smov [#allocation2]   ;;  %s2844_s22 = int_to_ptr.hbm [resolvable:$true] %s2843_s22 }
0x3082   :  { %s2828_s2 = sshll.u32 %s3220_s21, 4  ;;  %s2829_s2 = int_to_ptr.vmem [resolvable:$true] %s2828_s2 }
0x3086   :  { %v1005_v33 = vpop.permute.xlu1 %1004 }
0x3087   :  { %v1011_v34 = vsel %vm109_vm2, %v4140_v1, %v1005_v33  ;;  %v1861_v1 = vsel %vm109_vm2, %v4120_v6, %v1855_v46 }
0x3088   :  { %v1012_v9 = vsel %vm339_vm10, %v1011_v34, %v1009_v28 }
0x3089   :  { %1014 = vst.msk [vmem:[#allocation4 + $0x8] sm:$0xff] %vm199_vm4, %v1012_v9 }
0x308e   :  { %v2280_v8 = vpop.permute.xlu1 %2279 }
0x308f   :  { %v2286_v37 = vsel %vm109_vm2, %v4150_v16, %v2280_v8  ;;  %v2642_v16 = vsel %vm109_vm2, %v4130_v54, %v2636_v17 }
0x3090   :  { %v2287_v20 = vsel %vm339_vm10, %v2286_v37, %v2284_v10 }
0x3091   :  { %2289 = vst.msk [vmem:[#allocation4 + $0x20] sm:$0xff] %vm199_vm4, %v2287_v20 }
0x3096   :  { %v2814_v14 = vpop.permute.xlu1 %2813 }
0x3097   :  { %v2820_v6 = vsel %vm109_vm2, %v2800_v24, %v2814_v14 }
0x309e   :  { %v1859_v39 = vpop.permute.xlu1 %1858 }
0x309f   :  { %v1862_v43 = vsel %vm339_vm10, %v1861_v1, %v1859_v39 }
0x30a0   :  { %1864 = vst.msk [vmem:[#allocation4 + $0x18] sm:$0xff] %vm199_vm4, %v1862_v43 }
0x30a1   :  { %2849 = dma.vmem_to_hbm [thread:$0]  %s2842_s1, 640, %s2844_s22, [#allocation5], %s3219_s11, %s3219_s11, %s3214_s26  }
0x30a6   :  { %v2640_v18 = vpop.permute.xlu1 %2639 }
0x30a7   :  { %v2643_v44 = vsel %vm339_vm10, %v2642_v16, %v2640_v18 }
0x30a8   :  { %2645 = vst.msk [vmem:[#allocation2 + $0x30] sm:$0xff] %vm199_vm4, %v2643_v44 }
0x30db   :  { %v2818_v47 = vpop.permute.xlu2 %2817 }
0x30dc   :  { %v2821_v48 = vsel %vm339_vm10, %v2820_v6, %v2818_v47 }
0x30dd   :  { %2823 = vst.msk [vmem:[#allocation2 + $0x38] sm:$0xff] %vm199_vm4, %v2821_v48 }
0x30de   :  { %2836 = dma.vmem_to_hbm [thread:$0]  %s2829_s2, 1024, %s2831_s13, [#allocation3], %s3219_s11, %s3219_s11, %s3214_s26  }
0x30df   :  { %3207 = dma.done.wait [#allocation3], 1024  }
0x30e0   :  { %3208 = vsyncadd [#allocation3], 4294966272 }
0x30e1   :  { %3209 = dma.done.wait [#allocation5], 640  }
0x30e2   :  { %3210 = vsyncadd [#allocation5], 4294966656 }
0x30e3   :  { %2858 = vsyncpa [#allocation3], 1 }
0x30e4   :  { %2859 = vsyncpa [#allocation5], 1 }

</bundles_post_ra>
